<compile_context>
chip_gen: v7x
topology: tpu7x:2x2x1
jax: 0.10.0
libtpu: 0.0.40
codegen_flags: <defaults>
</compile_context>

<pallas_src>
import jax
import jax.numpy as jnp
import numpy as np
from jax import lax
from jax.experimental import pallas as pl
from jax.experimental.pallas import tpu as pltpu

# ---------------- model hyper-parameters (synthetic, deterministic) -----------
VOCAB = 64            # rows of the pretrained word-vector table
EMBEDDING_DIM = 32    # embedding_dim == input_size (layer1 consumes the bag embedding)
INPUT_SIZE = EMBEDDING_DIM
NUM_HIDDEN_LAYERS = 2 # num_hiddin_layer (> 1 -> self.fcs path is exercised)
HIDDEN = 32           # num_neurons_per_layer
NUM_CLASSES = 16
SESSION_SIZE = 8      # tokens per bag
MODE = "mean"         # EmbeddingBag mode
# TODO(synk): only mode="mean" is implemented; "sum"/"max" bag reductions are not wired up.
# TODO(synk): for a realistic vocabulary (>=10k rows) the one-hot / VMEM-resident table
#             must be replaced by an HBM table (memory_space=pl.ANY) + scalar-prefetched
#             indices + DMA gather, and the constant weight specs should be marked
#             pipeline_mode=pl.Buffered(1); not needed at these toy shapes.
# TODO(synk): token indices are not range-checked in-kernel (PyTorch's EmbeddingBag
#             raises on out-of-range indices); indices in [VOCAB, V_PAD) silently hit
#             zero-padded rows and indices >= V_PAD match nothing.

LANE = 128
def _round_up(x, m):
    return (x + m - 1) // m * m

V_PAD = _round_up(VOCAB, LANE)
H_PAD = _round_up(HIDDEN, LANE)
C_PAD = _round_up(NUM_CLASSES, LANE)
NEG_PAD = -1e30   # f32 bias for padded logit columns -> exp()==0, never the row max


def _default_batch_tile():
    """128-row LHS tiles on v5e (single TC, 4x128^2 MXU); 256 on v6e / per-TC on v7x (2x256^2)."""
    try:
        kind = jax.devices()[0].device_kind.lower()
    except Exception:
        return 256
    if "v5 lite" in kind or "v5lite" in kind or "v5e" in kind:
        return 128
    return 256


BATCH_TILE = _default_batch_tile()
BATCH = 512           # rows per pallas_call (512-2048 recommended; dispatch cost dominates below)


def _w2v_mlp_kernel(idx_ref, m_ref, b1_ref, wh_ref, bh_ref, w2_ref, b2_ref, out_ref):
    idx = idx_ref[...]                                  # [TB, S] int32
    tb, s = idx.shape
    v_pad = m_ref.shape[0]

    # --- EmbeddingBag(mean) folded into layer1 -----------------------------
    # Per-row vocab counts: S lane-dense compares accumulated in int32 with a
    # balanced tree (dependence depth ceil(log2 S) instead of S), one cast.
    viota = lax.broadcasted_iota(jnp.int32, (tb, v_pad), 1)
    terms = [(idx[:, j:j + 1] == viota).astype(jnp.int32) for j in range(s)]
    while len(terms) > 1:
        nxt = [terms[i] + terms[i + 1] for i in range(0, len(terms) - 1, 2)]
        if len(terms) % 2:
            nxt.append(terms[-1])
        terms = nxt
    counts = terms[0].astype(m_ref.dtype)               # [TB, V_PAD]

    # x = counts @ (emb @ w1 / S) + b1  (exact fold of EmbeddingBag-mean + layer1)
    x = jnp.dot(counts, m_ref[...], preferred_element_type=jnp.float32) + b1_ref[...]
    x = jnp.maximum(x, 0.0)

    # --- hidden fcs (static unroll; num_hiddin_layer > 1 path) --------------
    for l in range(wh_ref.shape[0]):
        x = jnp.dot(x.astype(wh_ref.dtype), wh_ref[l],
                    preferred_element_type=jnp.float32) + bh_ref[l]
        x = jnp.maximum(x, 0.0)

    # --- layer2 + log_softmax over the lane-padded class dim ----------------
    # Padded columns carry b2 == -1e30 (kept in f32) -> exp()==0 and never the max,
    # so the 128-lane reduction equals log_softmax over the 16 real classes.
    logits = jnp.dot(x.astype(w2_ref.dtype), w2_ref[...],
                     preferred_element_type=jnp.float32) + b2_ref[...]
    m = jnp.max(logits, axis=1, keepdims=True)
    shifted = logits - m
    lse = jnp.log(jnp.sum(jnp.exp(shifted), axis=1, keepdims=True))
    out_ref[...] = shifted - lse                        # [TB, C_PAD] lane-dense store


def word2vec_nn_forward(data_input, kernel_params, batch_tile=None):
    m_p, b1_p, wh_p, bh_p, w2_p, b2_p = kernel_params
    b, s = data_input.shape
    tile = batch_tile or BATCH_TILE
    tile = min(tile, b)
    assert b % tile == 0, "batch must be a multiple of the batch tile"
    grid = (b // tile,)

    def const_spec(arr):
        nd = arr.ndim
        return pl.BlockSpec(arr.shape, lambda i, _nd=nd: (0,) * _nd)

    out_padded = pl.pallas_call(
        _w2v_mlp_kernel,
        out_shape=jax.ShapeDtypeStruct((b, C_PAD), jnp.float32),
        grid=grid,
        in_specs=[
            pl.BlockSpec((tile, s), lambda i: (i, 0)),   # token indices, tiled on batch
            const_spec(m_p), const_spec(b1_p),
            const_spec(wh_p), const_spec(bh_p),
            const_spec(w2_p), const_spec(b2_p),
        ],
        out_specs=pl.BlockSpec((tile, C_PAD), lambda i: (i, 0)),
        compiler_params=pltpu.CompilerParams(dimension_semantics=("parallel",)),
    )(data_input, m_p, b1_p, wh_p, bh_p, w2_p, b2_p)

    # Slice back to the real class count outside the kernel (keeps the kernel's
    # output store lane-dense).  At very large batches this padded writeback
    # becomes the dominant HBM stream; fuse the slice into the consumer then.
    return out_padded[:, :NUM_CLASSES]


def init_params(key):
    """Canonical (PyTorch-equivalent) parameters used by the reference."""
    ks = jax.random.split(key, 8)
    emb = jax.random.normal(ks[0], (VOCAB, EMBEDDING_DIM), jnp.float32) * 0.1
    w1 = jax.random.normal(ks[1], (INPUT_SIZE, HIDDEN), jnp.float32) * 0.1
    b1 = jax.random.normal(ks[2], (1, HIDDEN), jnp.float32) * 0.1
    wh = jax.random.normal(ks[3], (NUM_HIDDEN_LAYERS, HIDDEN, HIDDEN), jnp.float32) * 0.1
    bh = jax.random.normal(ks[4], (NUM_HIDDEN_LAYERS, 1, HIDDEN), jnp.float32) * 0.1
    w2 = jax.random.normal(ks[5], (HIDDEN, NUM_CLASSES), jnp.float32) * 0.1
    b2 = jax.random.normal(ks[6], (1, NUM_CLASSES), jnp.float32) * 0.1
    return (emb, w1, b1, wh, bh, w2, b2)


def prepare_kernel_params(params, weight_dtype=jnp.float32):
    """Pack canonical params into lane-padded (128) kernel operands.

    - Folds EmbeddingBag-mean + layer1 into one matrix M = emb @ w1 / SESSION_SIZE
      (exact: linear ops, and S is a power of two).
    - Pads vocab/feature/class dims to 128 with zeros (exact: padded rows/cols
      contribute nothing).
    - Pads the layer2 bias columns with -1e30 so in-kernel log_softmax over the
      padded width equals log_softmax over the real classes.
    - weight_dtype=jnp.bfloat16 is recommended on *all* generations (the MXU is
      natively bf16, including v5e); biases, accumulation and all elementwise /
      log_softmax math stay f32.  Keep the -1e30 sentinel bias in f32 (it is).
    """
    emb, w1, b1, wh, bh, w2, b2 = params
    V, E = emb.shape
    H = w1.shape[1]
    C = w2.shape[1]
    L = wh.shape[0]

    m = jnp.dot(emb, w1) * (1.0 / SESSION_SIZE)          # [V, H] fold, computed in f32
    m_p = jnp.zeros((V_PAD, H_PAD), jnp.float32).at[:V, :H].set(m)
    b1_p = jnp.zeros((1, H_PAD), jnp.float32).at[:, :H].set(b1)
    wh_p = jnp.zeros((L, H_PAD, H_PAD), jnp.float32).at[:, :H, :H].set(wh)
    bh_p = jnp.zeros((L, 1, H_PAD), jnp.float32).at[:, :, :H].set(bh)
    w2_p = jnp.zeros((H_PAD, C_PAD), jnp.float32).at[:H, :C].set(w2)
    b2_p = jnp.full((1, C_PAD), NEG_PAD, jnp.float32).at[:, :C].set(b2)

    cast = lambda a: a.astype(weight_dtype)              # MXU operands only
    return (cast(m_p), b1_p, cast(wh_p), bh_p, cast(w2_p), b2_p)


def reference_forward(data_input, params):
    """Pure-JAX reference of the PyTorch forward pass (for a sanity check)."""
    emb, w1, b1, wh, bh, w2, b2 = params
    bag = jnp.take(emb, data_input, axis=0).mean(axis=1)          # EmbeddingBag mean
    x = jnp.maximum(bag @ w1 + b1, 0.0)
    for l in range(NUM_HIDDEN_LAYERS):
        x = jnp.maximum(x @ wh[l] + bh[l], 0.0)
    logits = x @ w2 + b2
    return jax.nn.log_softmax(logits, axis=1)


if __name__ == "__main__":
    key = jax.random.PRNGKey(0)
    k_idx, k_params = jax.random.split(key)
    params = init_params(k_params)
    data_input = jax.random.randint(k_idx, (BATCH, SESSION_SIZE), 0, VOCAB, dtype=jnp.int32)
    # PyTorch's EmbeddingBag errors on out-of-range indices; the kernel does not.
    assert int(jnp.max(data_input)) < VOCAB and int(jnp.min(data_input)) >= 0

    ref = jax.block_until_ready(reference_forward(data_input, params))

    # f32 MXU-operand path: tight check against the f32 reference.
    kp_f32 = prepare_kernel_params(params, weight_dtype=jnp.float32)
    out_f32 = jax.block_until_ready(word2vec_nn_forward(data_input, kp_f32))
    assert out_f32.shape == (BATCH, NUM_CLASSES)
    np.testing.assert_allclose(np.asarray(out_f32), np.asarray(ref), rtol=1e-5, atol=1e-5)

    # bf16 MXU-operand path (recommended default on v5e/v6e/v7x): loosened tolerance.
    kp_bf16 = prepare_kernel_params(params, weight_dtype=jnp.bfloat16)
    out_bf16 = jax.block_until_ready(word2vec_nn_forward(data_input, kp_bf16))
    np.testing.assert_allclose(np.asarray(out_bf16), np.asarray(ref), rtol=5e-2, atol=5e-2)

    print("KERNEL_OK")
</pallas_src>

<mosaic_0001>
module attributes {stable_mosaic.version = 11 : i64} {
  func.func @_w2v_mlp_kernel(%arg0: i32, %arg1: memref<256x8xi32, #tpu.memory_space<vmem>>, %arg2: memref<128x128xf32, #tpu.memory_space<vmem>>, %arg3: memref<1x128xf32, #tpu.memory_space<vmem>>, %arg4: memref<2x128x128xf32, #tpu.memory_space<vmem>>, %arg5: memref<2x1x128xf32, #tpu.memory_space<vmem>>, %arg6: memref<128x128xf32, #tpu.memory_space<vmem>>, %arg7: memref<1x128xf32, #tpu.memory_space<vmem>>, %arg8: memref<256x128xf32, #tpu.memory_space<vmem>>) attributes {dimension_semantics = [#tpu.dimension_semantics<parallel>], iteration_bounds = array<i64: 2>, scalar_prefetch = 0 : i64, scratch_operands = 0 : i64, tpu.core_type = #tpu.core_type<tc>, window_params = [{transform_indices = @transform_0, window_bounds = array<i64: 256, 8>}, {pipeline_mode = #tpu.pipeline_mode<synchronous>, transform_indices = @transform_1, window_bounds = array<i64: 128, 128>}, {pipeline_mode = #tpu.pipeline_mode<synchronous>, transform_indices = @transform_2, window_bounds = array<i64: 1, 128>}, {pipeline_mode = #tpu.pipeline_mode<synchronous>, transform_indices = @transform_3, window_bounds = array<i64: 2, 128, 128>}, {pipeline_mode = #tpu.pipeline_mode<synchronous>, transform_indices = @transform_4, window_bounds = array<i64: 2, 1, 128>}, {pipeline_mode = #tpu.pipeline_mode<synchronous>, transform_indices = @transform_5, window_bounds = array<i64: 128, 128>}, {pipeline_mode = #tpu.pipeline_mode<synchronous>, transform_indices = @transform_6, window_bounds = array<i64: 1, 128>}, {transform_indices = @transform_7, window_bounds = array<i64: 256, 128>}]} {
    %c0 = arith.constant 0 : index
    %c0_0 = arith.constant 0 : index
    %0 = vector.load %arg1[%c0, %c0_0] : memref<256x8xi32, #tpu.memory_space<vmem>>, vector<256x8xi32>
    %1 = tpu.iota {dimensions = array<i32: 1>} : vector<256x128xi32>
    %2 = vector.extract_strided_slice %0 {offsets = [0, 0], sizes = [256, 1], strides = [1, 1]} : vector<256x8xi32> to vector<256x1xi32>
    %3 = vector.broadcast %2 : vector<256x1xi32> to vector<256x128xi32>
    %4 = arith.cmpi eq, %3, %1 : vector<256x128xi32>
    %5 = arith.extui %4 : vector<256x128xi1> to vector<256x128xi32>
    %6 = vector.extract_strided_slice %0 {offsets = [0, 1], sizes = [256, 1], strides = [1, 1]} : vector<256x8xi32> to vector<256x1xi32>
    %7 = vector.broadcast %6 : vector<256x1xi32> to vector<256x128xi32>
    %8 = arith.cmpi eq, %7, %1 : vector<256x128xi32>
    %9 = arith.extui %8 : vector<256x128xi1> to vector<256x128xi32>
    %10 = vector.extract_strided_slice %0 {offsets = [0, 2], sizes = [256, 1], strides = [1, 1]} : vector<256x8xi32> to vector<256x1xi32>
    %11 = vector.broadcast %10 : vector<256x1xi32> to vector<256x128xi32>
    %12 = arith.cmpi eq, %11, %1 : vector<256x128xi32>
    %13 = arith.extui %12 : vector<256x128xi1> to vector<256x128xi32>
    %14 = vector.extract_strided_slice %0 {offsets = [0, 3], sizes = [256, 1], strides = [1, 1]} : vector<256x8xi32> to vector<256x1xi32>
    %15 = vector.broadcast %14 : vector<256x1xi32> to vector<256x128xi32>
    %16 = arith.cmpi eq, %15, %1 : vector<256x128xi32>
    %17 = arith.extui %16 : vector<256x128xi1> to vector<256x128xi32>
    %18 = vector.extract_strided_slice %0 {offsets = [0, 4], sizes = [256, 1], strides = [1, 1]} : vector<256x8xi32> to vector<256x1xi32>
    %19 = vector.broadcast %18 : vector<256x1xi32> to vector<256x128xi32>
    %20 = arith.cmpi eq, %19, %1 : vector<256x128xi32>
    %21 = arith.extui %20 : vector<256x128xi1> to vector<256x128xi32>
    %22 = vector.extract_strided_slice %0 {offsets = [0, 5], sizes = [256, 1], strides = [1, 1]} : vector<256x8xi32> to vector<256x1xi32>
    %23 = vector.broadcast %22 : vector<256x1xi32> to vector<256x128xi32>
    %24 = arith.cmpi eq, %23, %1 : vector<256x128xi32>
    %25 = arith.extui %24 : vector<256x128xi1> to vector<256x128xi32>
    %26 = vector.extract_strided_slice %0 {offsets = [0, 6], sizes = [256, 1], strides = [1, 1]} : vector<256x8xi32> to vector<256x1xi32>
    %27 = vector.broadcast %26 : vector<256x1xi32> to vector<256x128xi32>
    %28 = arith.cmpi eq, %27, %1 : vector<256x128xi32>
    %29 = arith.extui %28 : vector<256x128xi1> to vector<256x128xi32>
    %30 = vector.extract_strided_slice %0 {offsets = [0, 7], sizes = [256, 1], strides = [1, 1]} : vector<256x8xi32> to vector<256x1xi32>
    %31 = vector.broadcast %30 : vector<256x1xi32> to vector<256x128xi32>
    %32 = arith.cmpi eq, %31, %1 : vector<256x128xi32>
    %33 = arith.extui %32 : vector<256x128xi1> to vector<256x128xi32>
    %34 = arith.addi %5, %9 : vector<256x128xi32>
    %35 = arith.addi %13, %17 : vector<256x128xi32>
    %36 = arith.addi %21, %25 : vector<256x128xi32>
    %37 = arith.addi %29, %33 : vector<256x128xi32>
    %38 = arith.addi %34, %35 : vector<256x128xi32>
    %39 = arith.addi %36, %37 : vector<256x128xi32>
    %40 = arith.addi %38, %39 : vector<256x128xi32>
    %41 = arith.sitofp %40 : vector<256x128xi32> to vector<256x128xf32>
    %c0_1 = arith.constant 0 : index
    %c0_2 = arith.constant 0 : index
    %42 = vector.load %arg2[%c0_1, %c0_2] : memref<128x128xf32, #tpu.memory_space<vmem>>, vector<128x128xf32>
    %cst = arith.constant dense<0.000000e+00> : vector<256x128xf32>
    %43 = tpu.matmul %41, %42, %cst {dimension_numbers = #tpu.dot_dimension_numbers<[1], [0], [0], [1], [0, 0, 1, 1], [], []>} : vector<256x128xf32>, vector<128x128xf32>, vector<256x128xf32> -> vector<256x128xf32>
    %c0_3 = arith.constant 0 : index
    %c0_4 = arith.constant 0 : index
    %44 = vector.load %arg3[%c0_3, %c0_4] : memref<1x128xf32, #tpu.memory_space<vmem>>, vector<1x128xf32>
    %45 = vector.broadcast %44 : vector<1x128xf32> to vector<256x128xf32>
    %46 = arith.addf %43, %45 : vector<256x128xf32>
    %cst_5 = arith.constant 0.000000e+00 : f32
    %47 = vector.broadcast %cst_5 : f32 to vector<256x128xf32>
    %48 = arith.maximumf %46, %47 : vector<256x128xf32>
    %c0_6 = arith.constant 0 : index
    %c0_7 = arith.constant 0 : index
    %c0_8 = arith.constant 0 : index
    %49 = vector.load %arg4[%c0_6, %c0_7, %c0_8] : memref<2x128x128xf32, #tpu.memory_space<vmem>>, vector<1x128x128xf32>
    %50 = vector.shape_cast %49 : vector<1x128x128xf32> to vector<128x128xf32>
    %cst_9 = arith.constant dense<0.000000e+00> : vector<256x128xf32>
    %51 = tpu.matmul %48, %50, %cst_9 {dimension_numbers = #tpu.dot_dimension_numbers<[1], [0], [0], [1], [0, 0, 1, 1], [], []>} : vector<256x128xf32>, vector<128x128xf32>, vector<256x128xf32> -> vector<256x128xf32>
    %c0_10 = arith.constant 0 : index
    %c0_11 = arith.constant 0 : index
    %c0_12 = arith.constant 0 : index
    %52 = vector.load %arg5[%c0_10, %c0_11, %c0_12] : memref<2x1x128xf32, #tpu.memory_space<vmem>>, vector<1x1x128xf32>
    %53 = vector.shape_cast %52 : vector<1x1x128xf32> to vector<1x128xf32>
    %54 = vector.broadcast %53 : vector<1x128xf32> to vector<256x128xf32>
    %55 = arith.addf %51, %54 : vector<256x128xf32>
    %cst_13 = arith.constant 0.000000e+00 : f32
    %56 = vector.broadcast %cst_13 : f32 to vector<256x128xf32>
    %57 = arith.maximumf %55, %56 : vector<256x128xf32>
    %c1 = arith.constant 1 : index
    %c0_14 = arith.constant 0 : index
    %c0_15 = arith.constant 0 : index
    %58 = vector.load %arg4[%c1, %c0_14, %c0_15] : memref<2x128x128xf32, #tpu.memory_space<vmem>>, vector<1x128x128xf32>
    %59 = vector.shape_cast %58 : vector<1x128x128xf32> to vector<128x128xf32>
    %cst_16 = arith.constant dense<0.000000e+00> : vector<256x128xf32>
    %60 = tpu.matmul %57, %59, %cst_16 {dimension_numbers = #tpu.dot_dimension_numbers<[1], [0], [0], [1], [0, 0, 1, 1], [], []>} : vector<256x128xf32>, vector<128x128xf32>, vector<256x128xf32> -> vector<256x128xf32>
    %c1_17 = arith.constant 1 : index
    %c0_18 = arith.constant 0 : index
    %c0_19 = arith.constant 0 : index
    %61 = vector.load %arg5[%c1_17, %c0_18, %c0_19] : memref<2x1x128xf32, #tpu.memory_space<vmem>>, vector<1x1x128xf32>
    %62 = vector.shape_cast %61 : vector<1x1x128xf32> to vector<1x128xf32>
    %63 = vector.broadcast %62 : vector<1x128xf32> to vector<256x128xf32>
    %64 = arith.addf %60, %63 : vector<256x128xf32>
    %cst_20 = arith.constant 0.000000e+00 : f32
    %65 = vector.broadcast %cst_20 : f32 to vector<256x128xf32>
    %66 = arith.maximumf %64, %65 : vector<256x128xf32>
    %c0_21 = arith.constant 0 : index
    %c0_22 = arith.constant 0 : index
    %67 = vector.load %arg6[%c0_21, %c0_22] : memref<128x128xf32, #tpu.memory_space<vmem>>, vector<128x128xf32>
    %cst_23 = arith.constant dense<0.000000e+00> : vector<256x128xf32>
    %68 = tpu.matmul %66, %67, %cst_23 {dimension_numbers = #tpu.dot_dimension_numbers<[1], [0], [0], [1], [0, 0, 1, 1], [], []>} : vector<256x128xf32>, vector<128x128xf32>, vector<256x128xf32> -> vector<256x128xf32>
    %c0_24 = arith.constant 0 : index
    %c0_25 = arith.constant 0 : index
    %69 = vector.load %arg7[%c0_24, %c0_25] : memref<1x128xf32, #tpu.memory_space<vmem>>, vector<1x128xf32>
    %70 = vector.broadcast %69 : vector<1x128xf32> to vector<256x128xf32>
    %71 = arith.addf %68, %70 : vector<256x128xf32>
    %cst_26 = arith.constant dense<0xFF800000> : vector<256xf32>
    %72 = vector.multi_reduction <maximumf>, %71, %cst_26 [1] : vector<256x128xf32> to vector<256xf32>
    %73 = vector.shape_cast %72 : vector<256xf32> to vector<256x1xf32>
    %74 = vector.broadcast %73 : vector<256x1xf32> to vector<256x128xf32>
    %75 = arith.subf %71, %74 : vector<256x128xf32>
    %76 = math.exp %75 : vector<256x128xf32>
    %cst_27 = arith.constant dense<0.000000e+00> : vector<256xf32>
    %77 = vector.multi_reduction <add>, %76, %cst_27 [1] : vector<256x128xf32> to vector<256xf32>
    %78 = vector.shape_cast %77 : vector<256xf32> to vector<256x1xf32>
    %79 = math.log %78 : vector<256x1xf32>
    %80 = vector.broadcast %79 : vector<256x1xf32> to vector<256x128xf32>
    %81 = arith.subf %75, %80 : vector<256x128xf32>
    %c0_28 = arith.constant 0 : index
    %c0_29 = arith.constant 0 : index
    %82 = vector.load %arg8[%c0_28, %c0_29] : memref<256x128xf32, #tpu.memory_space<vmem>>, vector<256x128xf32>
    tpu.vector_store %arg8[%c0_28, %c0_29], %81 {strides = array<i32>} : memref<256x128xf32, #tpu.memory_space<vmem>>, vector<256x128xf32>,
    return
  }
  func.func @transform_0(%arg0: i32) -> (i32, i32) {
    %c0_i32 = arith.constant 0 : i32
    %c0_i32_0 = arith.constant 0 : i32
    return %arg0, %c0_i32 : i32, i32
  }
  func.func @transform_1(%arg0: i32) -> (i32, i32) {
    %c0_i32 = arith.constant 0 : i32
    %c0_i32_0 = arith.constant 0 : i32
    %c0_i32_1 = arith.constant 0 : i32
    return %c0_i32, %c0_i32_0 : i32, i32
  }
  func.func @transform_2(%arg0: i32) -> (i32, i32) {
    %c0_i32 = arith.constant 0 : i32
    %c0_i32_0 = arith.constant 0 : i32
    %c0_i32_1 = arith.constant 0 : i32
    return %c0_i32, %c0_i32_0 : i32, i32
  }
  func.func @transform_3(%arg0: i32) -> (i32, i32, i32) {
    %c0_i32 = arith.constant 0 : i32
    %c0_i32_0 = arith.constant 0 : i32
    %c0_i32_1 = arith.constant 0 : i32
    %c0_i32_2 = arith.constant 0 : i32
    return %c0_i32, %c0_i32_0, %c0_i32_1 : i32, i32, i32
  }
  func.func @transform_4(%arg0: i32) -> (i32, i32, i32) {
    %c0_i32 = arith.constant 0 : i32
    %c0_i32_0 = arith.constant 0 : i32
    %c0_i32_1 = arith.constant 0 : i32
    %c0_i32_2 = arith.constant 0 : i32
    return %c0_i32, %c0_i32_0, %c0_i32_1 : i32, i32, i32
  }
  func.func @transform_5(%arg0: i32) -> (i32, i32) {
    %c0_i32 = arith.constant 0 : i32
    %c0_i32_0 = arith.constant 0 : i32
    %c0_i32_1 = arith.constant 0 : i32
    return %c0_i32, %c0_i32_0 : i32, i32
  }
  func.func @transform_6(%arg0: i32) -> (i32, i32) {
    %c0_i32 = arith.constant 0 : i32
    %c0_i32_0 = arith.constant 0 : i32
    %c0_i32_1 = arith.constant 0 : i32
    return %c0_i32, %c0_i32_0 : i32, i32
  }
  func.func @transform_7(%arg0: i32) -> (i32, i32) {
    %c0_i32 = arith.constant 0 : i32
    %c0_i32_0 = arith.constant 0 : i32
    return %arg0, %c0_i32 : i32, i32
  }
}

</mosaic_0001>

<bundles_post_ra>
// kernel: tpu_custom_call.1
= control target key start
LH: loop header
LB: loop body
LE: loop exit
PB: predicated region body
PF: predicated region fallthrough
CT: control target
= control target key end

     0   :  { %12 = vsyncpa [#allocation3], 0  ;;  %s6903_s0 = inlined_call_operand.vmem [shape: s32[512,8], index: 0, kind: input, shape index: {}]   ;;  %s6904_s1 = inlined_call_operand.vmem [shape: f32[128,128], index: 1, kind: input, shape index: {}]   ;;  %s6905_s2 = inlined_call_operand.vmem [shape: f32[1,128], index: 2, kind: input, shape index: {}]   ;;  %s6906_s3 = inlined_call_operand.vmem [shape: f32[2,128,128], index: 3, kind: input, shape index: {}]   ;;  %s6907_s4 = inlined_call_operand.vmem [shape: f32[2,1,128], index: 4, kind: input, shape index: {}]   ;;  %s6908_s5 = inlined_call_operand.vmem [shape: f32[128,128], index: 5, kind: input, shape index: {}]   ;;  %s6909_s6 = inlined_call_operand.vmem [shape: f32[1,128], index: 6, kind: input, shape index: {}]   ;;  %s6910_s7 = inlined_call_operand.hbm [shape: f32[512,128], index: 7, kind: output, shape index: {}]  }
   0x1   :  { %14 = vsyncpa [#allocation3 + $0x1], 0  ;;  %s4533_s24 = smov 0   ;;  %s4535_s25 = smov 0  }
   0x2   :  { %s4537_s26 = smov 0   ;;  %s4539_s27 = smov 0  }
   0x3 LB: > { %s4554_s28 = sadd.s32 4294967295, %s4480_s27   ;;  %s3368_s29 = sadd.s32 4294967294, %s4480_s27   ;;  %s4480_s27 = sphi %s4539_s27, %s7097_s27   ;;  %s4476_s26 = sphi %s4537_s26, %s7096_s26   ;;  %s4472_s25 = sphi %s4535_s25, %s7095_s25   ;;  %s4468_s24 = sphi %s4533_s24, %s7094_s24  }
   0x4   : > { %s4558_s30 = sadd.s32 1, %s4480_s27   ;;  %s179_s8 = sadd.s32 1, %s4476_s26 }
   0x5   : > { %s176_s9 = ssub.s32 %s4480_s27, %s4558_s30  ;;  %p189_p0 = scmp.ne.s32.totalorder %s4476_s26, %s4472_s25 }
   0x6   : > { %p177_p1 = scmp.eq.s32.totalorder %s176_s9, 0  ;;  %p190_p2 = scmp.eq.s32.totalorder %s4554_s28, 1 }
   0x7   : > { %p195_p3 = scmp.ne.s32.totalorder %s4472_s25, %s4468_s24  ;;  %p196_p4 = scmp.eq.s32.totalorder %s3368_s29, 1 }
   0x8   : > { %s4569_s10 = scalar_select %p177_p1, %s4476_s26, %s179_s8  }
   0x9   : > { %p4571_p5 = por %p190_p2, %p189_p0  ;;  %p4575_p6 = por %p196_p4, %p195_p3 }
   0xa   : > { %p3371_p7 = scmp.ge.s32.totalorder %s4480_s27, 1  ;;  %p241_p8 = scmp.lt.s32.totalorder %s4480_s27, 3 }
   0xc   : > { %p242_p9 = pnand %p3371_p7, %p241_p8 }
   0xe   : > { %245 = sbr.rel (%p242_p9) target bundleno = 2209 (0x8a1), region = 48 }
  0x15   : > { %s3373_s13 = sshll.u32 %s4554_s28, 5  ;;  %v6921_v0 = vmov 3   ;;  %v6925_v1 = vmov 2   ;;  %v6911_v6 = vmov 4   ;;  %v6917_v9 = vmov 6   ;;  %s270_s21 = sand.u32 1, %s4472_s25  }
  0x16   : > { %4098 = vset.pattern.permute.xlu0 %v6921_v0  ;;  %4091 = vset.pattern.permute.xlu1 %v6925_v1  ;;  %p274_p10 = scmp.lt.s32.totalorder %s3373_s13, 63  ;;  %v6913_v11 = vmov 7   ;;  %v6915_v12 = vmov 1   ;;  %v6919_v13 = vmov 5   ;;  %v6923_v16 = vmov 0   ;;  %s3372_s22 = sshll.u32 %s270_s21, 8 }
  0x17   : > { %s6787_s23 = scalar_lea.vmem [#allocation2], %s3372_s22  ;;  %s3401_s29 = sshll.u32 %s4554_s28, 12 }
  0x18   : > { %s7099_s13 = smov (!%p274_p10, %s3373_s13), 63  ;;  %s3306_s8 = sshll.u32 %s6787_s23, 4  ;;  %s6855_s8 = int_to_ptr.vmem [resolvable:$true] %s3306_s8 }
  0x19   : > { %s3374_s14 = sshll.u32 %s7099_s13, 3  ;;  %s6853_s13 = scalar_lea.hbm %s6910_s7, %s3401_s29 }
  0x1a   : > { %s4587_s17 = scalar_lea.vmem %s6903_s0, %s3374_s14  ;;  %s6862_s28 = scalar_lea.sflag [#allocation3], %s270_s21 }
  0x1b   : > { %v4590_v2 = vld [vmem:[%s4587_s17 + $0x8] sm:$0xff]  ;;  %v4593_v3 = vld [vmem:[%s4587_s17] sm:$0xff]  ;;  %v4604_v5 = vld [vmem:[%s4587_s17 + $0x38] sm:$0xff]  ;;  %s4418_s14 = scalar_lea.vmem %s6855_s8, 4096  ;;  %s4490_s15 = smov [#allocation2]  }
  0x1c   : > { %798 = vperm.xlu0 %4098, %v4590_v2   ;;  %635 = vperm.xlu1 %4091, %v4593_v3   ;;  %v4598_v4 = vld [vmem:[%s4587_s17 + $0x20] sm:$0xff]  ;;  %v4609_v7 = vld [vmem:[%s4587_s17 + $0x50] sm:$0xff]  ;;  %v4614_v8 = vld [vmem:[%s4587_s17 + $0x68] sm:$0xff]  ;;  %p4419_p11 = scmp.ne.s32.totalorder %s6855_s8, %s4418_s14  ;;  %s4422_s16 = sshll.u32 %s4490_s15, 4  ;;  %s4423_s16 = int_to_ptr.vmem [resolvable:$false] %s4422_s16 }
  0x1d   : > { %v4620_v10 = vld [vmem:[%s4587_s17 + $0x80] sm:$0xff]  ;;  %v4643_v14 = vld [vmem:[%s4587_s17 + $0x98] sm:$0xff]  ;;  %v4646_v15 = vld [vmem:[%s4587_s17 + $0x10] sm:$0xff]  ;;  %s4424_s18 = scalar_lea.vmem %s4423_s16, 8192  ;;  %p4425_p0 = scmp.lt.s32.totalorder %s6855_s8, %s4423_s16 }
  0x1e   : > { %v4652_v17 = vld [vmem:[%s4587_s17 + $0xb0] sm:$0xff]  ;;  %v4657_v18 = vld [vmem:[%s4587_s17 + $0xc8] sm:$0xff]  ;;  %v4662_v19 = vld [vmem:[%s4587_s17 + $0xe0] sm:$0xff]  ;;  %p4420_p12 = pnand %p4419_p11, %p4571_p5  ;;  %p4426_p1 = scmp.lt.s32.totalorder %s4424_s18, %s4418_s14 }
  0x1f   : > { %v4675_v20 = vld [vmem:[%s4587_s17 + $0x28] sm:$0xff]  ;;  %v4678_v21 = vld [vmem:[%s4587_s17 + $0x18] sm:$0xff]  ;;  %v4684_v22 = vld [vmem:[%s4587_s17 + $0x40] sm:$0xff] }
  0x20   : > { %807 = vperm.xlu0 %4098, %v4598_v4   ;;  %4092 = vset.pattern.permute.xlu1 %v6921_v0  ;;  %v4689_v23 = vld [vmem:[%s4587_s17 + $0x58] sm:$0xff]  ;;  %v4694_v24 = vld [vmem:[%s4587_s17 + $0x70] sm:$0xff]  ;;  %v4700_v25 = vld [vmem:[%s4587_s17 + $0x88] sm:$0xff]  ;;  %p4421_p13 = pneg %p4420_p12  ;;  %p4427_p2 = por %p4426_p1, %p4425_p0 }
  0x21   : > { %795 = vperm.xlu1 %4092, %v4593_v3   ;;  %v4706_v26 = vld [vmem:[%s4587_s17 + $0xa0] sm:$0xff]  ;;  %v4712_v27 = vld [vmem:[%s4587_s17 + $0xb8] sm:$0xff]  ;;  %v4717_v28 = vld [vmem:[%s4587_s17 + $0xd0] sm:$0xff] }
  0x22   : > { %v4722_v29 = vld [vmem:[%s4587_s17 + $0xe8] sm:$0xff]  ;;  %v4785_v43 = vld [vmem:[%s4587_s17 + $0x30] sm:$0xff]  ;;  %p4428_p3 = pnand %p4427_p2, %p4421_p13 }
  0x24   : > { %816 = vperm.xlu0 %4098, %v4604_v5  }
  0x25   : > { %4093 = vset.pattern.permute.xlu1 %v6911_v6 }
  0x26   : > { %955 = vperm.xlu1 %4093, %v4593_v3  }
  0x28   : > { %825 = vperm.xlu0 %4098, %v4609_v7  }
  0x2a   : > { %4094 = vset.pattern.permute.xlu1 %v6917_v9 }
  0x2b   : > { %1275 = vperm.xlu1 %4094, %v4593_v3  }
  0x2c   : > { %834 = vperm.xlu0 %4098, %v4614_v8  }
  0x2f   : > { %4095 = vset.pattern.permute.xlu1 %v6913_v11 }
  0x30   : > { %843 = vperm.xlu0 %4098, %v4620_v10   ;;  %1435 = vperm.xlu1 %4095, %v4593_v3  }
  0x34   : > { %4179 = vset.pattern.permute.xlu0 %v6917_v9  ;;  %4096 = vset.pattern.permute.xlu1 %v6915_v12 }
  0x35   : > { %1278 = vperm.xlu0 %4179, %v4590_v2   ;;  %478 = vperm.xlu1 %4096, %v4590_v2  }
  0x39   : > { %1287 = vperm.xlu0 %4179, %v4598_v4   ;;  %4097 = vset.pattern.permute.xlu1 %v6925_v1 }
  0x3a   : > { %638 = vperm.xlu1 %4097, %v4590_v2  }
  0x3d   : > { %1296 = vperm.xlu0 %4179, %v4604_v5  }
  0x3e   : > { %4099 = vset.pattern.permute.xlu1 %v6911_v6 }
  0x3f   : > { %958 = vperm.xlu1 %4099, %v4590_v2  }
  0x41   : > { %1305 = vperm.xlu0 %4179, %v4609_v7  }
  0x43   : > { %4100 = vset.pattern.permute.xlu1 %v6919_v13 }
  0x44   : > { %1118 = vperm.xlu1 %4100, %v4590_v2  }
  0x45   : > { %1314 = vperm.xlu0 %4179, %v4614_v8  }
  0x48   : > { %4101 = vset.pattern.permute.xlu1 %v6913_v11 }
  0x49   : > { %1323 = vperm.xlu0 %4179, %v4620_v10   ;;  %1438 = vperm.xlu1 %4101, %v4590_v2  }
  0x4d   : > { %1332 = vperm.xlu0 %4179, %v4643_v14   ;;  %4102 = vset.pattern.permute.xlu1 %v6923_v16 }
  0x4e   : > { %321 = vperm.xlu1 %4102, %v4646_v15  }
  0x51   : > { %1341 = vperm.xlu0 %4179, %v4652_v17  }
  0x52   : > { %4103 = vset.pattern.permute.xlu1 %v6925_v1 }
  0x53   : > { %641 = vperm.xlu1 %4103, %v4646_v15  }
  0x55   : > { %1350 = vperm.xlu0 %4179, %v4657_v18  }
  0x57   : > { %4104 = vset.pattern.permute.xlu1 %v6921_v0 }
  0x58   : > { %801 = vperm.xlu1 %4104, %v4646_v15  }
  0x59   : > { %1359 = vperm.xlu0 %4179, %v4662_v19  }
  0x5c   : > { %4105 = vset.pattern.permute.xlu1 %v6919_v13 }
  0x5d   : > { %4246 = vset.pattern.permute.xlu0 %v6915_v12  ;;  %1121 = vperm.xlu1 %4105, %v4646_v15  }
  0x5e   : > { %475 = vperm.xlu0 %4246, %v4593_v3  }
  0x61   : > { %4106 = vset.pattern.permute.xlu1 %v6917_v9 }
  0x62   : > { %481 = vperm.xlu0 %4246, %v4646_v15   ;;  %1281 = vperm.xlu1 %4106, %v4646_v15  }
  0x66   : > { %490 = vperm.xlu0 %4246, %v4675_v20   ;;  %4107 = vset.pattern.permute.xlu1 %v6923_v16 }
  0x67   : > { %324 = vperm.xlu1 %4107, %v4678_v21  }
  0x6a   : > { %499 = vperm.xlu0 %4246, %v4684_v22  }
  0x6b   : > { %4108 = vset.pattern.permute.xlu1 %v6915_v12 }
  0x6c   : > { %484 = vperm.xlu1 %4108, %v4678_v21  }
  0x6e   : > { %508 = vperm.xlu0 %4246, %v4689_v23  }
  0x70   : > { %4109 = vset.pattern.permute.xlu1 %v6921_v0 }
  0x71   : > { %804 = vperm.xlu1 %4109, %v4678_v21  }
  0x72   : > { %517 = vperm.xlu0 %4246, %v4694_v24  }
  0x75   : > { %4110 = vset.pattern.permute.xlu1 %v6911_v6 }
  0x76   : > { %526 = vperm.xlu0 %4246, %v4700_v25   ;;  %964 = vperm.xlu1 %4110, %v4678_v21  }
  0x7a   : > { %535 = vperm.xlu0 %4246, %v4706_v26   ;;  %4111 = vset.pattern.permute.xlu1 %v6917_v9 }
  0x7b   : > { %1284 = vperm.xlu1 %4111, %v4678_v21  }
  0x7e   : > { %544 = vperm.xlu0 %4246, %v4712_v27  }
  0x7f   : > { %4112 = vset.pattern.permute.xlu1 %v6913_v11 }
  0x80   : > { %1444 = vperm.xlu1 %4112, %v4678_v21  }
  0x82   : > { %553 = vperm.xlu0 %4246, %v4717_v28  }
  0x84   : > { %4113 = vset.pattern.permute.xlu1 %v6915_v12 }
  0x85   : > { %487 = vperm.xlu1 %4113, %v4598_v4  }
  0x86   : > { %562 = vperm.xlu0 %4246, %v4722_v29  }
  0x89   : > { %4114 = vset.pattern.permute.xlu1 %v6925_v1 }
  0x8a   : > { %4249 = vset.pattern.permute.xlu0 %v6911_v6  ;;  %647 = vperm.xlu1 %4114, %v4598_v4  }
  0x8b   : > { %961 = vperm.xlu0 %4249, %v4646_v15  }
  0x8e   : > { %4115 = vset.pattern.permute.xlu1 %v6911_v6 }
  0x8f   : > { %970 = vperm.xlu0 %4249, %v4675_v20   ;;  %967 = vperm.xlu1 %4115, %v4598_v4  }
  0x93   : > { %979 = vperm.xlu0 %4249, %v4684_v22   ;;  %4116 = vset.pattern.permute.xlu1 %v6919_v13 }
  0x94   : > { %1127 = vperm.xlu1 %4116, %v4598_v4  }
  0x97   : > { %988 = vperm.xlu0 %4249, %v4689_v23  }
  0x98   : > { %4117 = vset.pattern.permute.xlu1 %v6913_v11 }
  0x99   : > { %1447 = vperm.xlu1 %4117, %v4598_v4  }
  0x9b   : > { %997 = vperm.xlu0 %4249, %v4694_v24   ;;  %v4741_v30 = vpop.permute.xlu1 %635  ;;  %v4743_v31 = vpop.permute.xlu0 %798 }
  0x9d   : > { %4118 = vset.pattern.permute.xlu1 %v6923_v16 }
  0x9e   : > { %330 = vperm.xlu1 %4118, %v4675_v20  }
  0x9f   : > { %1006 = vperm.xlu0 %4249, %v4700_v25   ;;  %v4748_v32 = vpop.permute.xlu0 %807 }
  0xa0   : > { %v4750_v33 = vpop.permute.xlu1 %795 }
  0xa2   : > { %4119 = vset.pattern.permute.xlu1 %v6925_v1 }
  0xa3   : > { %1015 = vperm.xlu0 %4249, %v4706_v26   ;;  %650 = vperm.xlu1 %4119, %v4675_v20   ;;  %v4755_v34 = vpop.permute.xlu0 %816 }
  0xa5   : > { %v4757_v35 = vpop.permute.xlu1 %955 }
  0xa7   : > { %1024 = vperm.xlu0 %4249, %v4712_v27   ;;  %4120 = vset.pattern.permute.xlu1 %v6921_v0  ;;  %v4761_v36 = vpop.permute.xlu0 %825 }
  0xa8   : > { %810 = vperm.xlu1 %4120, %v4675_v20  }
  0xaa   : > { %v4764_v37 = vpop.permute.xlu1 %1275 }
  0xab   : > { %1033 = vperm.xlu0 %4249, %v4717_v28   ;;  %v4767_v38 = vpop.permute.xlu0 %834 }
  0xac   : > { %6944 = vst [vmem:[#allocation5_spill] sm:$0xff] %v4767_v38  ;;  %4121 = vset.pattern.permute.xlu1 %v6919_v13 }
  0xad   : > { %1130 = vperm.xlu1 %4121, %v4675_v20  }
  0xaf   : > { %1042 = vperm.xlu0 %4249, %v4722_v29   ;;  %v4772_v39 = vpop.permute.xlu1 %1435  ;;  %v4774_v40 = vpop.permute.xlu0 %843 }
  0xb0   : > { %6945 = vst [vmem:[#allocation6_spill] sm:$0xff] %v4774_v40  ;;  %v4916_v40 = vld [vmem:[%s4587_s17 + $0xf0] sm:$0xff] }
  0xb1   : > { %4122 = vset.pattern.permute.xlu1 %v6917_v9 }
  0xb2   : > { %1290 = vperm.xlu1 %4122, %v4675_v20  }
  0xb3   : > { %4252 = vset.pattern.permute.xlu0 %v6913_v11 }
  0xb4   : > { %1441 = vperm.xlu0 %4252, %v4646_v15   ;;  %v4780_v41 = vpop.permute.xlu1 %478  ;;  %v4782_v42 = vpop.permute.xlu0 %1278  ;;  %v4858_v15 = vld [vmem:[%s4587_s17 + $0x48] sm:$0xff] }
  0xb6   : > { %4123 = vset.pattern.permute.xlu1 %v6923_v16 }
  0xb7   : > { %333 = vperm.xlu1 %4123, %v4785_v43  }
  0xb8   : > { %1450 = vperm.xlu0 %4252, %v4675_v20   ;;  %v4790_v44 = vpop.permute.xlu0 %1287 }
  0xb9   : > { %v4792_v45 = vpop.permute.xlu1 %638 }
  0xbb   : > { %4124 = vset.pattern.permute.xlu1 %v6915_v12 }
  0xbc   : > { %1459 = vperm.xlu0 %4252, %v4684_v22   ;;  %493 = vperm.xlu1 %4124, %v4785_v43   ;;  %v4797_v46 = vpop.permute.xlu0 %1296 }
  0xbe   : > { %v4799_v47 = vpop.permute.xlu1 %958 }
  0xc0   : > { %1468 = vperm.xlu0 %4252, %v4689_v23   ;;  %4125 = vset.pattern.permute.xlu1 %v6921_v0  ;;  %v4803_v48 = vpop.permute.xlu0 %1305 }
  0xc1   : > { %813 = vperm.xlu1 %4125, %v4785_v43  }
  0xc3   : > { %v4806_v49 = vpop.permute.xlu1 %1118 }
  0xc4   : > { %1477 = vperm.xlu0 %4252, %v4694_v24   ;;  %v4809_v50 = vpop.permute.xlu0 %1314 }
  0xc5   : > { %6946 = vst [vmem:[#allocation7_spill] sm:$0xff] %v4809_v50  ;;  %4126 = vset.pattern.permute.xlu1 %v6911_v6  ;;  %v6963_v50 = vmov 6  }
  0xc6   : > { %973 = vperm.xlu1 %4126, %v4785_v43  }
  0xc8   : > { %1486 = vperm.xlu0 %4252, %v4700_v25   ;;  %v4814_v51 = vpop.permute.xlu1 %1438  ;;  %v4816_v52 = vpop.permute.xlu0 %1323 }
  0xc9   : > { %6947 = vst [vmem:[#allocation8_spill] sm:$0xff] %v4816_v52  ;;  %v6960_v52 = vmov 5  }
  0xca   : > { %4127 = vset.pattern.permute.xlu1 %v6917_v9 }
  0xcb   : > { %1293 = vperm.xlu1 %4127, %v4785_v43  }
  0xcc   : > { %1495 = vperm.xlu0 %4252, %v4706_v26   ;;  %v4821_v53 = vpop.permute.xlu0 %1332  ;;  %v4868_v26 = vld [vmem:[%s4587_s17 + $0x60] sm:$0xff] }
  0xcd   : > { %6948 = vst [vmem:[#allocation9_spill] sm:$0xff] %v4821_v53  ;;  %v4823_v54 = vpop.permute.xlu1 %321  ;;  %v4908_v53 = vld [vmem:[%s4587_s17 + $0xd8] sm:$0xff] }
  0xcf   : > { %4128 = vset.pattern.permute.xlu1 %v6913_v11 }
  0xd0   : > { %1504 = vperm.xlu0 %4252, %v4712_v27   ;;  %1453 = vperm.xlu1 %4128, %v4785_v43   ;;  %v4828_v55 = vpop.permute.xlu0 %1341 }
  0xd1   : > { %6949 = vst [vmem:[#allocation10_spill] sm:$0xff] %v4828_v55 }
  0xd2   : > { %v4830_v56 = vpop.permute.xlu1 %641 }
  0xd4   : > { %1513 = vperm.xlu0 %4252, %v4717_v28   ;;  %4129 = vset.pattern.permute.xlu1 %v6915_v12  ;;  %v4834_v57 = vpop.permute.xlu0 %1350  ;;  %v4876_v28 = vld [vmem:[%s4587_s17 + $0x78] sm:$0xff] }
  0xd5   : > { %6950 = vst [vmem:[#allocation11_spill] sm:$0xff] %v4834_v57  ;;  %496 = vperm.xlu1 %4129, %v4604_v5   ;;  %6952 = vst [vmem:[#allocation13_spill] sm:$0xff] %v4876_v28  ;;  %v6957_v57 = vmov 3  }
  0xd7   : > { %v4837_v58 = vpop.permute.xlu1 %801 }
  0xd8   : > { %1522 = vperm.xlu0 %4252, %v4722_v29   ;;  %v4840_v59 = vpop.permute.xlu0 %1359 }
  0xd9   : > { %6951 = vst [vmem:[#allocation12_spill] sm:$0xff] %v4840_v59  ;;  %4130 = vset.pattern.permute.xlu1 %v6925_v1  ;;  %v4898_v59 = vld [vmem:[%s4587_s17 + $0xc0] sm:$0xff] }
  0xda   : > { %656 = vperm.xlu1 %4130, %v4604_v5  }
  0xdc   : > { %4255 = vset.pattern.permute.xlu0 %v6925_v1  ;;  %v4845_v60 = vpop.permute.xlu1 %1121 }
  0xdd   : > { %644 = vperm.xlu0 %4255, %v4678_v21   ;;  %v4848_v61 = vpop.permute.xlu0 %475 }
  0xde   : > { %4131 = vset.pattern.permute.xlu1 %v6911_v6 }
  0xdf   : > { %976 = vperm.xlu1 %4131, %v4604_v5  }
  0xe1   : > { %653 = vperm.xlu0 %4255, %v4785_v43   ;;  %v4853_v62 = vpop.permute.xlu0 %481  ;;  %v4855_v63 = vpop.permute.xlu1 %1281 }
  0xe3   : > { %4132 = vset.pattern.permute.xlu1 %v6919_v13  ;;  %v301_v13 = vld [vmem:[%s4587_s17 + $0xa8] sm:$0xff] }
  0xe4   : > { %1136 = vperm.xlu1 %4132, %v4604_v5  }
  0xe5   : > { %662 = vperm.xlu0 %4255, %v4858_v15   ;;  %v4863_v20 = vpop.permute.xlu0 %490 }
  0xe6   : > { %v4865_v25 = vpop.permute.xlu1 %324 }
  0xe8   : > { %4133 = vset.pattern.permute.xlu1 %v6913_v11  ;;  %v298_v11 = vld [vmem:[%s4587_s17 + $0x90] sm:$0xff] }
  0xe9   : > { %671 = vperm.xlu0 %4255, %v4868_v26   ;;  %1456 = vperm.xlu1 %4133, %v4604_v5   ;;  %v4873_v27 = vpop.permute.xlu0 %499 }
  0xeb   : > { %v4878_v29 = vpop.permute.xlu1 %484 }
  0xed   : > { %680 = vperm.xlu0 %4255, %v4876_v28   ;;  %4134 = vset.pattern.permute.xlu1 %v6923_v16  ;;  %v4882_v6 = vpop.permute.xlu0 %508 }
  0xee   : > { %6953 = vst [vmem:[#allocation14_spill] sm:$0xff] %v4882_v6  ;;  %339 = vperm.xlu1 %4134, %v4684_v22  }
  0xf0   : > { %v4886_v12 = vpop.permute.xlu1 %804 }
  0xf1   : > { %689 = vperm.xlu0 %4255, %v298_v11   ;;  %v4888_v9 = vpop.permute.xlu0 %517 }
  0xf2   : > { %6954 = vst [vmem:[#allocation15_spill] sm:$0xff] %v4888_v9  ;;  %4135 = vset.pattern.permute.xlu1 %v6925_v1 }
  0xf3   : > { %659 = vperm.xlu1 %4135, %v4684_v22  }
  0xf5   : > { %698 = vperm.xlu0 %4255, %v301_v13   ;;  %v4893_v0 = vpop.permute.xlu1 %964  ;;  %v4895_v16 = vpop.permute.xlu0 %526 }
  0xf6   : > { %6955 = vst [vmem:[#allocation16_spill] sm:$0xff] %v4893_v0  ;;  %6956 = vst [vmem:[#allocation17_spill] sm:$0xff] %v4895_v16 }
  0xf7   : > { %4136 = vset.pattern.permute.xlu1 %v6957_v57 }
  0xf8   : > { %819 = vperm.xlu1 %4136, %v4684_v22  }
  0xf9   : > { %707 = vperm.xlu0 %4255, %v4898_v59   ;;  %v4903_v55 = vpop.permute.xlu0 %535 }
  0xfa   : > { %6958 = vst [vmem:[#allocation18_spill] sm:$0xff] %v4903_v55  ;;  %v4905_v1 = vpop.permute.xlu1 %1284 }
  0xfb   : > { %6959 = vst [vmem:[#allocation19_spill] sm:$0xff] %v4905_v1 }
  0xfc   : > { %4137 = vset.pattern.permute.xlu1 %v6960_v52 }
  0xfd   : > { %716 = vperm.xlu0 %4255, %v4908_v53   ;;  %1139 = vperm.xlu1 %4137, %v4684_v22   ;;  %v4913_v16 = vpop.permute.xlu0 %544 }
  0xfe   : > { %6961 = vst [vmem:[#allocation20_spill] sm:$0xff] %v4913_v16  ;;  %v6967_v16 = vmov 0  }
  0xff   : > { %v4918_v9 = vpop.permute.xlu1 %1444 }
 0x100   : > { %6962 = vst [vmem:[#allocation21_spill] sm:$0xff] %v4918_v9 }
 0x101   : > { %725 = vperm.xlu0 %4255, %v4916_v40   ;;  %4138 = vset.pattern.permute.xlu1 %v6963_v50  ;;  %v4922_v55 = vpop.permute.xlu0 %553 }
 0x102   : > { %6964 = vst [vmem:[#allocation22_spill] sm:$0xff] %v4922_v55  ;;  %1299 = vperm.xlu1 %4138, %v4684_v22   ;;  %v6970_v55 = vmov 1  }
 0x104   : > { %v4925_v38 = vpop.permute.xlu1 %487 }
 0x105   : > { %6965 = vst [vmem:[#allocation23_spill] sm:$0xff] %v4925_v38  ;;  %4258 = vset.pattern.permute.xlu0 %v6960_v52  ;;  %v4928_v6 = vpop.permute.xlu0 %562 }
 0x106   : > { %6966 = vst [vmem:[#allocation24_spill] sm:$0xff] %v4928_v6  ;;  %1115 = vperm.xlu0 %4258, %v4593_v3   ;;  %4139 = vset.pattern.permute.xlu1 %v6967_v16 }
 0x107   : > { %342 = vperm.xlu1 %4139, %v4858_v15  }
 0x109   : > { %v4933_v9 = vpop.permute.xlu1 %647 }
 0x10a   : > { %6968 = vst [vmem:[#allocation25_spill] sm:$0xff] %v4933_v9  ;;  %1124 = vperm.xlu0 %4258, %v4678_v21   ;;  %v4936_v1 = vpop.permute.xlu0 %961  ;;  %v6975_v9 = vmov 4  }
 0x10b   : > { %6969 = vst [vmem:[#allocation26_spill] sm:$0xff] %v4936_v1  ;;  %4140 = vset.pattern.permute.xlu1 %v6970_v55  ;;  %v1850_v1 = vld [vmem:[%s6904_s1] sm:$0xff] }
 0x10c   : > { %502 = vperm.xlu1 %4140, %v4858_v15  }
 0x10e   : > { %1133 = vperm.xlu0 %4258, %v4785_v43   ;;  %v4941_v22 = vpop.permute.xlu1 %967  ;;  %v4943_v6 = vpop.permute.xlu0 %970 }
 0x10f   : > { %6971 = vst [vmem:[#allocation27_spill] sm:$0xff] %v4941_v22  ;;  %6972 = vst [vmem:[#allocation28_spill] sm:$0xff] %v4943_v6 }
 0x110   : > { %4141 = vset.pattern.permute.xlu1 %v6957_v57 }
 0x111   : > { %822 = vperm.xlu1 %4141, %v4858_v15  }
 0x112   : > { %1142 = vperm.xlu0 %4258, %v4858_v15   ;;  %v4948_v38 = vpop.permute.xlu0 %979 }
 0x113   : > { %6973 = vst [vmem:[#allocation29_spill] sm:$0xff] %v4948_v38  ;;  %v4950_v21 = vpop.permute.xlu1 %1127 }
 0x114   : > { %6974 = vst [vmem:[#allocation30_spill] sm:$0xff] %v4950_v21 }
 0x115   : > { %4142 = vset.pattern.permute.xlu1 %v6975_v9 }
 0x116   : > { %1151 = vperm.xlu0 %4258, %v4868_v26   ;;  %982 = vperm.xlu1 %4142, %v4858_v15   ;;  %v4955_v43 = vpop.permute.xlu0 %988 }
 0x117   : > { %6976 = vst [vmem:[#allocation31_spill] sm:$0xff] %v4955_v43  ;;  %v1851_v43 = vld [vmem:[%s6904_s1 + $0x8] sm:$0xff] }
 0x118   : > { %v4957_v22 = vpop.permute.xlu1 %1447 }
 0x119   : > { %6977 = vst [vmem:[#allocation32_spill] sm:$0xff] %v4957_v22  ;;  %v3914_v22 = vpack.c.bf16 %v1851_v43, %v1850_v1  ;;  %v1857_v43 = vld [vmem:[%s6904_s1 + $0x38] sm:$0xff] }
 0x11a   : > { %1160 = vperm.xlu0 %4258, %v4876_v28   ;;  %4143 = vset.pattern.permute.xlu1 %v6963_v50  ;;  %v4961_v6 = vpop.permute.xlu0 %997  ;;  %v6981_v28 = vmov 7  }
 0x11b   : > { %6978 = vst [vmem:[#allocation33_spill] sm:$0xff] %v4961_v6  ;;  %1302 = vperm.xlu1 %4143, %v4858_v15   ;;  %3915 = vmatprep.subr.bf16.mxu0 %v3914_v22 }
 0x11c   : > { %3917 = vmatpush3.bf16.msra.mxu0 %v3914_v22 }
 0x11d   : > { %v4964_v38 = vpop.permute.xlu1 %330 }
 0x11e   : > { %6979 = vst [vmem:[#allocation34_spill] sm:$0xff] %v4964_v38  ;;  %1169 = vperm.xlu0 %4258, %v298_v11   ;;  %v4966_v21 = vpop.permute.xlu0 %1006  ;;  %v1853_v38 = vld [vmem:[%s6904_s1 + $0x18] sm:$0xff] }
 0x11f   : > { %6980 = vst [vmem:[#allocation35_spill] sm:$0xff] %v4966_v21  ;;  %4144 = vset.pattern.permute.xlu1 %v6981_v28  ;;  %v1852_v21 = vld [vmem:[%s6904_s1 + $0x10] sm:$0xff] }
 0x120   : > { %1462 = vperm.xlu1 %4144, %v4858_v15   ;;  %v3918_v0 = vpack.c.bf16 %v1853_v38, %v1852_v21  ;;  %v1855_v15 = vld [vmem:[%s6904_s1 + $0x28] sm:$0xff]  ;;  %v6985_v21 = vmov 2  }
 0x122   : > { %1178 = vperm.xlu0 %4258, %v301_v13   ;;  %v4976_v6 = vpop.permute.xlu1 %650  ;;  %v4978_v11 = vpop.permute.xlu0 %1015  ;;  %3919 = vmatprep.subr.bf16.mxu0 %v3918_v0  ;;  %v1854_v13 = vld [vmem:[%s6904_s1 + $0x20] sm:$0xff] }
 0x123   : > { %6982 = vst [vmem:[#allocation36_spill] sm:$0xff] %v4976_v6  ;;  %6983 = vst [vmem:[#allocation37_spill] sm:$0xff] %v4978_v11  ;;  %3921 = vmatpush3.bf16.msra.mxu0 %v3918_v0  ;;  %v3922_v38 = vpack.c.bf16 %v1855_v15, %v1854_v13  ;;  %v1856_v0 = vld [vmem:[%s6904_s1 + $0x30] sm:$0xff]  ;;  %v1858_v15 = vld [vmem:[%s6904_s1 + $0x40] sm:$0xff] }
 0x124   : > { %4145 = vset.pattern.permute.xlu1 %v6970_v55  ;;  %v1863_v11 = vld [vmem:[%s6904_s1 + $0x68] sm:$0xff] }
 0x125   : > { %505 = vperm.xlu1 %4145, %v4609_v7   ;;  %3923 = vmatprep.subr.bf16.mxu0 %v3922_v38 }
 0x126   : > { %1187 = vperm.xlu0 %4258, %v4898_v59   ;;  %v4989_v1 = vpop.permute.xlu0 %1024 }
 0x127   : > { %6984 = vst [vmem:[#allocation38_spill] sm:$0xff] %v4989_v1  ;;  %v4997_v22 = vpop.permute.xlu1 %810  ;;  %3925 = vmatpush3.bf16.msra.mxu0 %v3922_v38  ;;  %v3926_v1 = vpack.c.bf16 %v1857_v43, %v1856_v0  ;;  %v1861_v43 = vld [vmem:[%s6904_s1 + $0x58] sm:$0xff] }
 0x129   : > { %4146 = vset.pattern.permute.xlu1 %v6985_v21  ;;  %3927 = vmatprep.subr.bf16.mxu0 %v3926_v1 }
 0x12a   : > { %1196 = vperm.xlu0 %4258, %v4908_v53   ;;  %665 = vperm.xlu1 %4146, %v4609_v7   ;;  %v5002_v59 = vpop.permute.xlu0 %1033 }
 0x12b   : > { %6986 = vst [vmem:[#allocation39_spill] sm:$0xff] %v5002_v59  ;;  %v1859_v59 = vld [vmem:[%s6904_s1 + $0x48] sm:$0xff]  ;;  %3929 = vmatpush3.bf16.msra.mxu0 %v3926_v1 }
 0x12c   : > { %v5010_v13 = vpop.permute.xlu1 %1130  ;;  %v3930_v38 = vpack.c.bf16 %v1859_v59, %v1858_v15  ;;  %v1862_v15 = vld [vmem:[%s6904_s1 + $0x60] sm:$0xff] }
 0x12d   : > { %v3938_v6 = vpack.c.bf16 %v1863_v11, %v1862_v15 }
 0x12e   : > { %1205 = vperm.xlu0 %4258, %v4916_v40   ;;  %4147 = vset.pattern.permute.xlu1 %v6975_v9  ;;  %v5014_v53 = vpop.permute.xlu0 %1042  ;;  %v1860_v40 = vld [vmem:[%s6904_s1 + $0x50] sm:$0xff] }
 0x12f   : > { %6987 = vst [vmem:[#allocation40_spill] sm:$0xff] %v5014_v53  ;;  %985 = vperm.xlu1 %4147, %v4609_v7   ;;  %3931 = vmatprep.subr.bf16.mxu0 %v3930_v38  ;;  %v3934_v1 = vpack.c.bf16 %v1861_v43, %v1860_v40  ;;  %v1865_v40 = vld [vmem:[%s6904_s1 + $0x78] sm:$0xff] }
 0x130   : > { %3933 = vmatpush3.bf16.msra.mxu0 %v3930_v38  ;;  %v1864_v38 = vld [vmem:[%s6904_s1 + $0x70] sm:$0xff] }
 0x131   : > { %v5023_v0 = vpop.permute.xlu1 %1290  ;;  %3935 = vmatprep.subr.bf16.mxu0 %v3934_v1  ;;  %v3942_v11 = vpack.c.bf16 %v1865_v40, %v1864_v38 }
 0x132   : > { %4261 = vset.pattern.permute.xlu0 %v6967_v16 }
 0x133   : > { %315 = vperm.xlu0 %4261, %v4593_v3   ;;  %v5033_v53 = vpop.permute.xlu0 %1441  ;;  %4148 = vset.pattern.permute.xlu1 %v6960_v52 }
 0x134   : > { %1145 = vperm.xlu1 %4148, %v4609_v7   ;;  %3937 = vmatpush3.bf16.msra.mxu0 %v3934_v1 }
 0x135   : > { %3939 = vmatprep.subr.bf16.mxu0 %v3938_v6 }
 0x136   : > { %v5037_v59 = vpop.permute.xlu1 %333 }
 0x137   : > { %318 = vperm.xlu0 %4261, %v4590_v2   ;;  %v5046_v3 = vpop.permute.xlu0 %1450 }
 0x138   : > { %4149 = vset.pattern.permute.xlu1 %v6981_v28  ;;  %3941 = vmatpush3.bf16.msra.mxu0 %v3938_v6 }
 0x139   : > { %1465 = vperm.xlu1 %4149, %v4609_v7   ;;  %3943 = vmatprep.subr.bf16.mxu0 %v3942_v11 }
 0x13b   : > { %327 = vperm.xlu0 %4261, %v4598_v4   ;;  %v5057_v2 = vpop.permute.xlu1 %493  ;;  %v5059_v43 = vpop.permute.xlu0 %1459 }
 0x13c   : > { %3945 = vmatpush3.bf16.msra.mxu0 %v3942_v11 }
 0x13d   : > { %4150 = vset.pattern.permute.xlu1 %v6967_v16 }
 0x13e   : > { %348 = vperm.xlu1 %4150, %v4689_v23  }
 0x13f   : > { %336 = vperm.xlu0 %4261, %v4604_v5   ;;  %v5064_v1 = vpop.permute.xlu0 %1468 }
 0x140   : > { %6988 = vst [vmem:[#allocation41_spill] sm:$0xff] %v5064_v1  ;;  %v5066_v15 = vpop.permute.xlu1 %813 }
 0x142   : > { %4151 = vset.pattern.permute.xlu1 %v6985_v21 }
 0x143   : > { %345 = vperm.xlu0 %4261, %v4609_v7   ;;  %668 = vperm.xlu1 %4151, %v4689_v23   ;;  %v5071_v4 = vpop.permute.xlu0 %1477 }
 0x144   : > { %6989 = vst [vmem:[#allocation42_spill] sm:$0xff] %v5071_v4 }
 0x145   : > { %v5073_v6 = vpop.permute.xlu1 %973 }
 0x146   : > { %6990 = vst [vmem:[#allocation43_spill] sm:$0xff] %v5073_v6 }
 0x147   : > { %4152 = vset.pattern.permute.xlu1 %v6957_v57  ;;  %v5076_v38 = vpop.permute.xlu0 %1486  ;;  %354 = vperm.xlu0 %4261, %v4614_v8  }
 0x148   : > { %6991 = vst [vmem:[#allocation44_spill] sm:$0xff] %v5076_v38  ;;  %828 = vperm.xlu1 %4152, %v4689_v23  }
 0x14a   : > { %v5080_v5 = vpop.permute.xlu1 %1293 }
 0x14b   : > { %6992 = vst [vmem:[#allocation45_spill] sm:$0xff] %v5080_v5  ;;  %v5082_v40 = vpop.permute.xlu0 %1495  ;;  %363 = vperm.xlu0 %4261, %v4620_v10  }
 0x14c   : > { %6993 = vst [vmem:[#allocation46_spill] sm:$0xff] %v5082_v40  ;;  %4153 = vset.pattern.permute.xlu1 %v6960_v52 }
 0x14d   : > { %1148 = vperm.xlu1 %4153, %v4689_v23  }
 0x14f   : > { %v5087_v7 = vpop.permute.xlu1 %1453  ;;  %v5089_v11 = vpop.permute.xlu0 %1504  ;;  %372 = vperm.xlu0 %4261, %v4643_v14  }
 0x150   : > { %6994 = vst [vmem:[#allocation47_spill] sm:$0xff] %v5089_v11 }
 0x151   : > { %4154 = vset.pattern.permute.xlu1 %v6963_v50 }
 0x152   : > { %1308 = vperm.xlu1 %4154, %v4689_v23  }
 0x153   : > { %v5094_v38 = vpop.permute.xlu0 %1513  ;;  %381 = vperm.xlu0 %4261, %v4652_v17  }
 0x154   : > { %6995 = vst [vmem:[#allocation48_spill] sm:$0xff] %v5094_v38  ;;  %v5097_v40 = vpop.permute.xlu1 %496 }
 0x155   : > { %6996 = vst [vmem:[#allocation49_spill] sm:$0xff] %v5097_v40 }
 0x156   : > { %4155 = vset.pattern.permute.xlu1 %v6967_v16 }
 0x157   : > { %351 = vperm.xlu1 %4155, %v4868_v26   ;;  %v5101_v10 = vpop.permute.xlu0 %1522  ;;  %390 = vperm.xlu0 %4261, %v4657_v18  }
 0x158   : > { %6997 = vst [vmem:[#allocation50_spill] sm:$0xff] %v5101_v10 }
 0x159   : > { %v5104_v11 = vpop.permute.xlu1 %656 }
 0x15b   : > { %4156 = vset.pattern.permute.xlu1 %v6970_v55  ;;  %399 = vperm.xlu0 %4261, %v4662_v19  }
 0x15c   : > { %v5108_v23 = vpop.permute.xlu0 %644  ;;  %511 = vperm.xlu1 %4156, %v4868_v26  }
 0x15e   : > { %v5111_v38 = vpop.permute.xlu1 %976 }
 0x15f   : > { %6998 = vst [vmem:[#allocation51_spill] sm:$0xff] %v5111_v38 }
 0x160   : > { %v5113_v4 = vpop.permute.xlu0 %653  ;;  %4157 = vset.pattern.permute.xlu1 %v6957_v57 }
 0x161   : > { %831 = vperm.xlu1 %4157, %v4868_v26  }
 0x163   : > { %v5117_v10 = vpop.permute.xlu1 %1136 }
 0x164   : > { %6999 = vst [vmem:[#allocation52_spill] sm:$0xff] %v5117_v10  ;;  %v5119_v1 = vpop.permute.xlu0 %662 }
 0x165   : > { %7000 = vst [vmem:[#allocation53_spill] sm:$0xff] %v5119_v1  ;;  %4158 = vset.pattern.permute.xlu1 %v6975_v9 }
 0x166   : > { %991 = vperm.xlu1 %4158, %v4868_v26  }
 0x168   : > { %v5123_v19 = vpop.permute.xlu1 %1456  ;;  %v5125_v40 = vpop.permute.xlu0 %671 }
 0x169   : > { %7001 = vst [vmem:[#allocation54_spill] sm:$0xff] %v5123_v19  ;;  %7002 = vst [vmem:[#allocation55_spill] sm:$0xff] %v5125_v40 }
 0x16a   : > { %4159 = vset.pattern.permute.xlu1 %v6963_v50 }
 0x16b   : > { %1311 = vperm.xlu1 %4159, %v4868_v26  }
 0x16c   : > { %v5129_v38 = vpop.permute.xlu0 %680 }
 0x16d   : > { %7003 = vst [vmem:[#allocation56_spill] sm:$0xff] %v5129_v38  ;;  %v5131_v5 = vpop.permute.xlu1 %339 }
 0x16f   : > { %4160 = vset.pattern.permute.xlu1 %v6981_v28 }
 0x170   : > { %1471 = vperm.xlu1 %4160, %v4868_v26   ;;  %v5135_v1 = vpop.permute.xlu0 %689 }
 0x171   : > { %7004 = vst [vmem:[#allocation57_spill] sm:$0xff] %v5135_v1  ;;  %v312_v1 = vlaneseq }
 0x172   : > { %v5137_v10 = vpop.permute.xlu1 %659 }
 0x173   : > { %7005 = vst [vmem:[#allocation58_spill] sm:$0xff] %v5137_v10 }
 0x174   : > { %4161 = vset.pattern.permute.xlu1 %v6970_v55  ;;  %v5140_v19 = vpop.permute.xlu0 %698 }
 0x175   : > { %7006 = vst [vmem:[#allocation59_spill] sm:$0xff] %v5140_v19  ;;  %514 = vperm.xlu1 %4161, %v4614_v8  }
 0x177   : > { %v5143_v40 = vpop.permute.xlu1 %819 }
 0x178   : > { %7007 = vst [vmem:[#allocation60_spill] sm:$0xff] %v5143_v40  ;;  %v5145_v6 = vpop.permute.xlu0 %707 }
 0x179   : > { %7008 = vst [vmem:[#allocation61_spill] sm:$0xff] %v5145_v6  ;;  %4162 = vset.pattern.permute.xlu1 %v6985_v21  ;;  %v5160_v6 = vand.u32 127, %v312_v1 }
 0x17a   : > { %674 = vperm.xlu1 %4162, %v4614_v8  }
 0x17b   : > { %vm890_vm0 = vcmp.eq.s32.totalorder %v4750_v33, %v5160_v6  ;;  %vm730_vm1 = vcmp.eq.s32.totalorder %v4741_v30, %v5160_v6  ;;  %vm891_vm2 = vcmp.eq.s32.totalorder %v4743_v31, %v5160_v6  ;;  %vm894_vm3 = vcmp.eq.s32.totalorder %v4748_v32, %v5160_v6 }
 0x17c   : > { %v5149_v38 = vpop.permute.xlu1 %1139  ;;  %v5151_v26 = vpop.permute.xlu0 %716  ;;  %vm1530_vm4 = vcmp.eq.s32.totalorder %v4772_v39, %v5160_v6  ;;  %v922_v33 = vsel %vm890_vm0, 1, %v6967_v16  ;;  %vm897_vm5 = vcmp.eq.s32.totalorder %v4755_v34, %v5160_v6  ;;  %vm1050_vm6 = vcmp.eq.s32.totalorder %v4757_v35, %v5160_v6 }
 0x17d   : > { %7009 = vst [vmem:[#allocation62_spill] sm:$0xff] %v5149_v38  ;;  %7010 = vst [vmem:[#allocation63_spill] sm:$0xff] %v5151_v26  ;;  %v762_v30 = vsel %vm730_vm1, 1, %v6967_v16  ;;  %v923_v31 = vsel %vm891_vm2, 1, %v6967_v16  ;;  %v5189_v32 = vsel %vm894_vm3, 1, %v6967_v16  ;;  %vm1370_vm7 = vcmp.eq.s32.totalorder %v4764_v37, %v5160_v6 }
 0x17e   : > { %4163 = vset.pattern.permute.xlu1 %v6975_v9  ;;  %vm900_vm8 = vcmp.eq.s32.totalorder %v4761_v36, %v5160_v6  ;;  %vm1371_vm9 = vcmp.eq.s32.totalorder %v4782_v42, %v5160_v6  ;;  %vm1531_vm10 = vcmp.eq.s32.totalorder %v4814_v51, %v5160_v6  ;;  %v5202_v34 = vadd.s32 %v922_v33, %v762_v30 }
 0x17f   : > { %994 = vperm.xlu1 %4163, %v4614_v8   ;;  %v5205_v35 = vsel %vm897_vm5, 1, %v6967_v16  ;;  %v5208_v37 = vsel %vm1050_vm6, 1, %v6967_v16  ;;  %vm731_vm11 = vcmp.eq.s32.totalorder %v4792_v45, %v5160_v6  ;;  %v1402_v42 = vsel %vm1370_vm7, 1, %v6967_v16 }
 0x180   : > { %v5155_v19 = vpop.permute.xlu0 %725  ;;  %vm571_vm12 = vcmp.eq.s32.totalorder %v4780_v41, %v5160_v6  ;;  %vm1374_vm13 = vcmp.eq.s32.totalorder %v4790_v44, %v5160_v6  ;;  %vm1211_vm14 = vcmp.eq.s32.totalorder %v4806_v49, %v5160_v6  ;;  %v5224_v51 = vsel %vm900_vm8, 1, %v6967_v16 }
 0x181   : > { %7011 = vst [vmem:[#allocation64_spill] sm:$0xff] %v5155_v19  ;;  %v5157_v10 = vpop.permute.xlu1 %1299  ;;  %7012 = vst [vmem:[#allocation65_spill] sm:$0xff] %v5224_v51  ;;  %v1403_v33 = vsel %vm1371_vm9, 1, %v6967_v16  ;;  %v1563_v30 = vsel %vm1531_vm10, 1, %v6967_v16  ;;  %v763_v19 = vsel %vm731_vm11, 1, %v6967_v16  ;;  %vm1051_vm15 = vcmp.eq.s32.totalorder %v4799_v47, %v5160_v6 }
 0x182   : > { %vm892_vm0 = vcmp.eq.s32.totalorder %v4837_v58, %v5160_v6  ;;  %vm572_vm1 = vcmp.eq.s32.totalorder %v4853_v62, %v5160_v6  ;;  %v5240_v44 = vsel %vm571_vm12, 1, %v6967_v16  ;;  %v5243_v49 = vsel %vm1374_vm13, 1, %v6967_v16 }
 0x183   : > { %4164 = vset.pattern.permute.xlu1 %v6960_v52  ;;  %vm1377_vm2 = vcmp.eq.s32.totalorder %v4797_v46, %v5160_v6  ;;  %vm1380_vm3 = vcmp.eq.s32.totalorder %v4803_v48, %v5160_v6  ;;  %v1691_v58 = vadd.s32 %v1563_v30, %v1403_v33  ;;  %vm732_vm5 = vcmp.eq.s32.totalorder %v4830_v56, %v5160_v6 }
 0x184   : > { %1154 = vperm.xlu1 %4164, %v4614_v8   ;;  %v5257_v62 = vadd.s32 %v923_v31, %v763_v19  ;;  %v1083_v46 = vsel %vm1051_vm15, 1, %v6967_v16  ;;  %v604_v26 = vsel %vm572_vm1, 1, %v6967_v16  ;;  %v5264_v48 = vsel %vm1377_vm2, 1, %v6967_v16 }
 0x185   : > { %v5163_v40 = vpop.permute.xlu0 %1115  ;;  %vm1212_vm6 = vcmp.eq.s32.totalorder %v4845_v60, %v5160_v6  ;;  %vm570_vm7 = vcmp.eq.s32.totalorder %v4848_v61, %v5160_v6  ;;  %v5274_v56 = vsel %vm1380_vm3, 1, %v6967_v16  ;;  %v764_v31 = vsel %vm732_vm5, 1, %v6967_v16 }
 0x186   : > { %v5165_v38 = vpop.permute.xlu1 %342  ;;  %7014 = vst [vmem:[#allocation67_spill] sm:$0xff] %v5274_v56  ;;  %vm573_vm8 = vcmp.eq.s32.totalorder %v4878_v29, %v5160_v6  ;;  %vm1372_vm9 = vcmp.eq.s32.totalorder %v4855_v63, %v5160_v6  ;;  %v5291_v56 = vsel %vm570_vm7, 1, %v6967_v16  ;;  %vm413_vm10 = vcmp.eq.s32.totalorder %v4865_v25, %v5160_v6  ;;  %v7018_v29 = vld [vmem:[#allocation16_spill] sm:$0xff] }
 0x187   : > { %vm1532_vm11 = vcmp.eq.s32.totalorder %v5033_v53, %v5160_v6  ;;  %vm575_vm12 = vcmp.eq.s32.totalorder %v4863_v20, %v5160_v6  ;;  %vm578_vm13 = vcmp.eq.s32.totalorder %v4873_v27, %v5160_v6  ;;  %v605_v63 = vsel %vm573_vm8, 1, %v6967_v16 }
 0x188   : > { %4165 = vset.pattern.permute.xlu1 %v6981_v28  ;;  %v1404_v25 = vsel %vm1372_vm9, 1, %v6967_v16  ;;  %vm1053_vm15 = vcmp.eq.s32.totalorder %v7018_v29, %v5160_v6  ;;  %v1564_v29 = vsel %vm1532_vm11, 1, %v6967_v16  ;;  %vm1535_vm3 = vcmp.eq.s32.totalorder %v5046_v3, %v5160_v6 }
 0x189   : > { %v5178_v1 = vpop.permute.xlu0 %1124  ;;  %1474 = vperm.xlu1 %4165, %v4614_v8   ;;  %v1562_v8 = vsel %vm1530_vm4, 1, %v6967_v16  ;;  %vm412_vm4 = vcmp.eq.s32.totalorder %v4823_v54, %v5160_v6  ;;  %v5271_v54 = vld [vmem:[%s4587_s17 + $0xf8] sm:$0xff]  ;;  %vm895_vm7 = vcmp.eq.s32.totalorder %v4997_v22, %v5160_v6  ;;  %vm1215_vm8 = vcmp.eq.s32.totalorder %v5010_v13, %v5160_v6 }
 0x18a   : > { %v5226_v45 = vadd.s32 %v1562_v8, %v1402_v42  ;;  %v1243_v8 = vsel %vm1211_vm14, 1, %v6967_v16  ;;  %v924_v42 = vsel %vm892_vm0, 1, %v6967_v16  ;;  %v444_v19 = vsel %vm412_vm4, 1, %v6967_v16  ;;  %408 = vperm.xlu0 %4261, %v5271_v54  }
 0x18b   : > { %v5193_v39 = vpop.permute.xlu1 %502  ;;  %v1659_v33 = vadd.s32 %v1243_v8, %v1083_v46  ;;  %v1628_v61 = vadd.s32 %v924_v42, %v764_v31  ;;  %v1596_v46 = vadd.s32 %v604_v26, %v444_v19  ;;  %vm893_vm14 = vcmp.eq.s32.totalorder %v4886_v12, %v5160_v6  ;;  %v7019_v26 = vld [vmem:[#allocation19_spill] sm:$0xff]  ;;  %v7022_v31 = vld [vmem:[#allocation21_spill] sm:$0xff]  ;;  %v7025_v12 = vld [vmem:[#allocation32_spill] sm:$0xff] }
 0x18c   : > { %vm1373_vm0 = vcmp.eq.s32.totalorder %v7019_v26, %v5160_v6  ;;  %v445_v19 = vsel %vm413_vm10, 1, %v6967_v16  ;;  %vm1533_vm2 = vcmp.eq.s32.totalorder %v7022_v31, %v5160_v6  ;;  %v607_v26 = vsel %vm575_vm12, 1, %v6967_v16 }
 0x18d   : > { %v5212_v36 = vpop.permute.xlu0 %1133  ;;  %4166 = vset.pattern.permute.xlu1 %v6967_v16  ;;  %v5285_v60 = vadd.s32 %v1691_v58, %v1659_v33  ;;  %v7020_v58 = vld [vmem:[#allocation26_spill] sm:$0xff]  ;;  %v1724_v33 = vadd.s32 %v1628_v61, %v1596_v46  ;;  %v5334_v61 = vsel %vm578_vm13, 1, %v6967_v16  ;;  %v5336_v46 = vadd.s32 %v605_v63, %v445_v19  ;;  %v7024_v63 = vld [vmem:[#allocation28_spill] sm:$0xff] }
 0x18e   : > { %357 = vperm.xlu1 %4166, %v4694_v24   ;;  %vm1052_vm1 = vcmp.eq.s32.totalorder %v7020_v58, %v5160_v6  ;;  %4264 = vset.pattern.permute.xlu0 %v6957_v57  ;;  %v5342_v53 = vsel %vm893_vm14, 1, %v6967_v16  ;;  %v1405_v20 = vsel %vm1373_vm0, 1, %v6967_v16  ;;  %v1565_v27 = vsel %vm1533_vm2, 1, %v6967_v16 }
 0x18f   : > { %7017 = vst [vmem:[#allocation70_spill] sm:$0xff] %v5285_v60  ;;  %852 = vperm.xlu0 %4264, %v4643_v14   ;;  %v5345_v14 = vsel %vm1053_vm15, 1, %v6967_v16  ;;  %v1084_v58 = vsel %vm1052_vm1, 1, %v6967_v16  ;;  %vm1055_vm4 = vcmp.eq.s32.totalorder %v7024_v63, %v5160_v6  ;;  %vm1534_vm5 = vcmp.eq.s32.totalorder %v7025_v12, %v5160_v6 }
 0x190   : > { %v5237_v41 = vpop.permute.xlu1 %822  ;;  %v1692_v19 = vadd.s32 %v1564_v29, %v1404_v25  ;;  %vm1375_vm9 = vcmp.eq.s32.totalorder %v5023_v0, %v5160_v6  ;;  %v7028_v25 = vld [vmem:[#allocation27_spill] sm:$0xff]  ;;  %v7029_v29 = vld [vmem:[#allocation30_spill] sm:$0xff]  ;;  %v1567_v22 = vsel %vm1535_vm3, 1, %v6967_v16  ;;  %v1087_v13 = vsel %vm1055_vm4, 1, %v6967_v16 }
 0x191   : > { %v5248_v47 = vpop.permute.xlu0 %1142  ;;  %vm1054_vm10 = vcmp.eq.s32.totalorder %v7028_v25, %v5160_v6  ;;  %vm1214_vm11 = vcmp.eq.s32.totalorder %v7029_v29, %v5160_v6  ;;  %v1566_v0 = vsel %vm1534_vm5, 1, %v6967_v16  ;;  %v1247_v29 = vsel %vm1215_vm8, 1, %v6967_v16 }
 0x192   : > { %7013 = vst [vmem:[#allocation66_spill] sm:$0xff] %v5248_v47  ;;  %4167 = vset.pattern.permute.xlu1 %v6985_v21  ;;  %v1244_v21 = vsel %vm1212_vm6, 1, %v6967_v16  ;;  %v5391_v51 = vadd.s32 %v1565_v27, %v1405_v20  ;;  %v1086_v20 = vsel %vm1054_vm10, 1, %v6967_v16  ;;  %v1694_v27 = vadd.s32 %v1566_v0, %v5243_v49 }
 0x193   : > { %677 = vperm.xlu1 %4167, %v4694_v24   ;;  %861 = vperm.xlu0 %4264, %v4652_v17   ;;  %v1660_v63 = vadd.s32 %v1244_v21, %v1084_v58  ;;  %v7030_v17 = vld [vmem:[#allocation34_spill] sm:$0xff]  ;;  %v7031_v21 = vld [vmem:[#allocation36_spill] sm:$0xff]  ;;  %v927_v58 = vsel %vm895_vm7, 1, %v6967_v16  ;;  %vm576_vm0 = vcmp.eq.s32.totalorder %v5057_v2, %v5160_v6  ;;  %vm416_vm1 = vcmp.eq.s32.totalorder %v5037_v59, %v5160_v6  ;;  %v7035_v59 = vld [vmem:[#allocation13_spill] sm:$0xff] }
 0x194   : > { %vm415_vm12 = vcmp.eq.s32.totalorder %v7030_v17, %v5160_v6  ;;  %vm735_vm13 = vcmp.eq.s32.totalorder %v7031_v21, %v5160_v6  ;;  %vm1538_vm2 = vcmp.eq.s32.totalorder %v5059_v43, %v5160_v6  ;;  %vm733_vm3 = vcmp.eq.s32.totalorder %v5108_v23, %v5160_v6 }
 0x195   : > { %v5280_v30 = vpop.permute.xlu1 %982  ;;  %v5282_v8 = vpop.permute.xlu0 %1151  ;;  %v1756_v3 = vadd.s32 %v1692_v19, %v1660_v63  ;;  %v7033_v19 = vld [vmem:[#allocation23_spill] sm:$0xff]  ;;  %v1663_v63 = vadd.s32 %v1247_v29, %v1087_v13  ;;  %vm736_vm4 = vcmp.eq.s32.totalorder %v5113_v4, %v5160_v6  ;;  %vm896_vm5 = vcmp.eq.s32.totalorder %v5066_v15, %v5160_v6  ;;  %v7037_v29 = vld [vmem:[#allocation45_spill] sm:$0xff] }
 0x196   : > { %7015 = vst [vmem:[#allocation68_spill] sm:$0xff] %v5280_v30  ;;  %7016 = vst [vmem:[#allocation69_spill] sm:$0xff] %v5282_v8  ;;  %v1246_v30 = vsel %vm1214_vm11, 1, %v6967_v16  ;;  %vm574_vm14 = vcmp.eq.s32.totalorder %v7033_v19, %v5160_v6  ;;  %v448_v43 = vsel %vm416_vm1, 1, %v6967_v16  ;;  %vm737_vm7 = vcmp.eq.s32.totalorder %v5104_v11, %v5160_v6  ;;  %v7041_v11 = vld [vmem:[#allocation52_spill] sm:$0xff] }
 0x197   : > { %4168 = vset.pattern.permute.xlu1 %v6957_v57  ;;  %870 = vperm.xlu0 %4264, %v4657_v18   ;;  %v7034_v18 = vld [vmem:[#allocation29_spill] sm:$0xff]  ;;  %v1662_v17 = vadd.s32 %v1246_v30, %v1086_v20  ;;  %v5426_v21 = vadd.s32 %v1756_v3, %v1724_v33  ;;  %v608_v33 = vsel %vm576_vm0, 1, %v6967_v16  ;;  %v5467_v2 = vsel %vm1538_vm2, 1, %v6967_v16 }
 0x198   : > { %837 = vperm.xlu1 %4168, %v4694_v24   ;;  %vm1058_vm15 = vcmp.eq.s32.totalorder %v7034_v18, %v5160_v6  ;;  %v768_v15 = vsel %vm736_vm4, 1, %v6967_v16  ;;  %v928_v0 = vsel %vm896_vm5, 1, %v6967_v16  ;;  %v7038_v20 = vld [vmem:[#allocation49_spill] sm:$0xff]  ;;  %vm1378_vm0 = vcmp.eq.s32.totalorder %v5157_v10, %v5160_v6 }
 0x199   : > { %v5313_v42 = vpop.permute.xlu0 %1160  ;;  %v5439_v30 = vsel %vm1058_vm15, 1, %v6967_v16  ;;  %vm577_vm10 = vcmp.eq.s32.totalorder %v7038_v20, %v5160_v6  ;;  %vm1213_vm15 = vcmp.eq.s32.totalorder %v5178_v1, %v5160_v6  ;;  %vm418_vm2 = vcmp.eq.s32.totalorder %v5131_v5, %v5160_v6 }
 0x19a   : > { %7021 = vst [vmem:[#allocation16_spill] sm:$0xff] %v5313_v42  ;;  %v5323_v8 = vpop.permute.xlu1 %1302  ;;  %v7027_v42 = vld [vmem:[#allocation25_spill] sm:$0xff]  ;;  %v1245_v10 = vsel %vm1213_vm15, 1, %v6967_v16  ;;  %vm1216_vm4 = vcmp.eq.s32.totalorder %v5212_v36, %v5160_v6 }
 0x19b   : > { %7023 = vst [vmem:[#allocation19_spill] sm:$0xff] %v5323_v8  ;;  %vm734_vm6 = vcmp.eq.s32.totalorder %v7027_v42, %v5160_v6  ;;  %v447_v42 = vsel %vm415_vm12, 1, %v6967_v16 }
 0x19c   : > { %4169 = vset.pattern.permute.xlu1 %v6960_v52  ;;  %v766_v8 = vsel %vm734_vm6, 1, %v6967_v16  ;;  %v1599_v47 = vadd.s32 %v607_v26, %v447_v42  ;;  %vm1536_vm6 = vcmp.eq.s32.totalorder %v5087_v7, %v5160_v6  ;;  %v765_v26 = vsel %vm733_vm3, 1, %v6967_v16 }
 0x19d   : > { %1157 = vperm.xlu1 %4169, %v4694_v24   ;;  %v5358_v31 = vpop.permute.xlu0 %1169  ;;  %v1600_v7 = vadd.s32 %v608_v33, %v448_v43  ;;  %v1568_v3 = vsel %vm1536_vm6, 1, %v6967_v16  ;;  %v769_v42 = vsel %vm737_vm7, 1, %v6967_v16  ;;  %v1629_v18 = vadd.s32 %v5342_v53, %v765_v26 }
 0x19e   : > { %7026 = vst [vmem:[#allocation26_spill] sm:$0xff] %v5358_v31  ;;  %v1407_v31 = vsel %vm1375_vm9, 1, %v6967_v16  ;;  %vm1376_vm9 = vcmp.eq.s32.totalorder %v7037_v29, %v5160_v6  ;;  %v5516_v33 = vsel %vm577_vm10, 1, %v6967_v16  ;;  %v5524_v26 = vadd.s32 %v5205_v35, %v769_v42  ;;  %v7044_v42 = vld [vmem:[#allocation60_spill] sm:$0xff] }
 0x19f   : > { %v5377_v12 = vpop.permute.xlu1 %1462  ;;  %v1695_v60 = vadd.s32 %v1567_v22, %v1407_v31  ;;  %v5420_v22 = vadd.s32 %v5189_v32, %v766_v8  ;;  %v4400_v32 = vld [vmem:[%s4587_s17 + $0xe0] sm:$0xff]  ;;  %v5448_v8 = vadd.s32 %v1694_v27, %v1662_v17  ;;  %v7040_v27 = vld [vmem:[#allocation51_spill] sm:$0xff]  ;;  %v1408_v17 = vsel %vm1376_vm9, 1, %v6967_v16 }
 0x1a0   : > { %879 = vperm.xlu0 %4264, %v4400_v32   ;;  %vm1057_vm12 = vcmp.eq.s32.totalorder %v7040_v27, %v5160_v6  ;;  %vm898_vm6 = vcmp.eq.s32.totalorder %v7044_v42, %v5160_v6  ;;  %vm579_vm9 = vcmp.eq.s32.totalorder %v5193_v39, %v5160_v6  ;;  %vm899_vm10 = vcmp.eq.s32.totalorder %v5237_v41, %v5160_v6 }
 0x1a1   : > { %4170 = vset.pattern.permute.xlu1 %v6963_v50  ;;  %v5389_v52 = vpop.permute.xlu0 %1178  ;;  %v1759_v49 = vadd.s32 %v1695_v60, %v1663_v63  ;;  %v931_v39 = vsel %vm899_vm10, 1, %v6967_v16 }
 0x1a2   : > { %7032 = vst [vmem:[#allocation21_spill] sm:$0xff] %v5389_v52  ;;  %1317 = vperm.xlu1 %4170, %v4694_v24   ;;  %v767_v24 = vsel %vm735_vm13, 1, %v6967_v16  ;;  %v5429_v52 = vsel %vm574_vm14, 1, %v6967_v16  ;;  %vm1210_vm13 = vcmp.eq.s32.totalorder %v5163_v40, %v5160_v6  ;;  %vm1217_vm14 = vcmp.eq.s32.totalorder %v7041_v11, %v5160_v6  ;;  %v7042_v40 = vld [vmem:[#allocation53_spill] sm:$0xff] }
 0x1a3   : > { %v1631_v31 = vadd.s32 %v927_v58, %v767_v24  ;;  %v7036_v58 = vld [vmem:[#allocation43_spill] sm:$0xff]  ;;  %v7039_v24 = vld [vmem:[#allocation54_spill] sm:$0xff]  ;;  %v1249_v35 = vsel %vm1217_vm14, 1, %v6967_v16  ;;  %vm739_vm1 = vcmp.eq.s32.totalorder %v7042_v40, %v5160_v6 }
 0x1a4   : > { %v5417_v25 = vpop.permute.xlu1 %505  ;;  %888 = vperm.xlu0 %4264, %v5271_v54   ;;  %vm1056_vm8 = vcmp.eq.s32.totalorder %v7036_v58, %v5160_v6  ;;  %vm1537_vm11 = vcmp.eq.s32.totalorder %v7039_v24, %v5160_v6  ;;  %v1661_v24 = vadd.s32 %v1245_v10, %v5345_v14  ;;  %v5569_v27 = vsel %vm739_vm1, 1, %v6967_v16 }
 0x1a5   : > { %v5424_v19 = vpop.permute.xlu0 %1187  ;;  %v1727_v60 = vadd.s32 %v1631_v31, %v1599_v47  ;;  %v1820_v47 = vcvt.s32.f32 %v5426_v21  ;;  %v1632_v31 = vadd.s32 %v928_v0, %v768_v15  ;;  %v1088_v32 = vsel %vm1056_vm8, 1, %v6967_v16 }
 0x1a6   : > { %4171 = vset.pattern.permute.xlu1 %v6967_v16  ;;  %v1569_v43 = vsel %vm1537_vm11, 1, %v6967_v16  ;;  %v1089_v15 = vsel %vm1057_vm12, 1, %v6967_v16  ;;  %v1242_v0 = vsel %vm1210_vm13, 1, %v6967_v16  ;;  %v450_v14 = vsel %vm418_vm2, 1, %v6967_v16 }
 0x1a7   : > { %360 = vperm.xlu1 %4171, %v7035_v59   ;;  %v5471_v13 = vadd.s32 %v1759_v49, %v1727_v60  ;;  %v5510_v60 = vadd.s32 %v1568_v3, %v1408_v17  ;;  %v5538_v58 = vadd.s32 %v1632_v31, %v1600_v7  ;;  %v1697_v29 = vadd.s32 %v1569_v43, %v5264_v48 }
 0x1a8   : > { %4269 = vset.pattern.permute.xlu0 %v6963_v50  ;;  %v1410_v3 = vsel %vm1378_vm0, 1, %v6967_v16  ;;  %v1658_v20 = vadd.s32 %v1242_v0, %v5208_v37  ;;  %v1665_v48 = vadd.s32 %v1249_v35, %v1089_v15  ;;  %v7045_v37 = vld [vmem:[#allocation58_spill] sm:$0xff]  ;;  %v1248_v15 = vsel %vm1216_vm4, 1, %v6967_v16 }
 0x1a9   : > { %v5461_v4 = vpop.permute.xlu1 %665  ;;  %v5463_v23 = vpop.permute.xlu0 %1196  ;;  %v1823_v53 = vcvt.s32.f32 %v5471_v13  ;;  %1368 = vperm.xlu0 %4269, %v5271_v54   ;;  %v1725_v54 = vadd.s32 %v1629_v18, %v5336_v46  ;;  %v7043_v46 = vld [vmem:[#allocation62_spill] sm:$0xff]  ;;  %vm738_vm7 = vcmp.eq.s32.totalorder %v7045_v37, %v5160_v6  ;;  %v1698_v43 = vadd.s32 %v5467_v2, %v1410_v3  ;;  %v7055_v13 = vld [vmem:[#allocation41_spill] sm:$0xff] }
 0x1aa   : > { %vm1218_vm3 = vcmp.eq.s32.totalorder %v7043_v46, %v5160_v6  ;;  %v5576_v11 = vadd.s32 %v1697_v29, %v1665_v48  ;;  %v1754_v10 = vadd.s32 %v5226_v45, %v1658_v20  ;;  %v770_v5 = vsel %vm738_vm7, 1, %v6967_v16  ;;  %v7047_v37 = vld [vmem:[#allocation70_spill] sm:$0xff] }
 0x1ab   : > { %4172 = vset.pattern.permute.xlu1 %v6970_v55  ;;  %v1250_v31 = vsel %vm1218_vm3, 1, %v6967_v16  ;;  %v1757_v40 = vadd.s32 %v5391_v51, %v1661_v24  ;;  %v1664_v46 = vadd.s32 %v1248_v15, %v1088_v32  ;;  %vm1539_vm11 = vcmp.eq.s32.totalorder %v5377_v12, %v5160_v6 }
 0x1ac   : > { %520 = vperm.xlu1 %4172, %v7035_v59   ;;  %v1666_v2 = vadd.s32 %v1250_v31, %v5439_v30  ;;  %vm419_vm13 = vcmp.eq.s32.totalorder %v5165_v38, %v5160_v6  ;;  %vm740_vm1 = vcmp.eq.s32.totalorder %v5461_v4, %v5160_v6  ;;  %vm580_vm4 = vcmp.eq.s32.totalorder %v5417_v25, %v5160_v6 }
 0x1ad   : > { %v5495_v63 = vpop.permute.xlu0 %1205  ;;  %4271 = vset.pattern.permute.xlu0 %v6981_v28  ;;  %v1789_v48 = vadd.s32 %v1757_v40, %v1725_v54  ;;  %v1760_v42 = vadd.s32 %v5510_v60, %v1664_v46  ;;  %v7049_v60 = vld [vmem:[#allocation19_spill] sm:$0xff]  ;;  %v612_v4 = vsel %vm580_vm4, 1, %v6967_v16 }
 0x1ae   : > { %v5502_v49 = vpop.permute.xlu1 %985  ;;  %v5604_v20 = vadd.s32 %v1698_v43, %v1666_v2  ;;  %vm1379_vm0 = vcmp.eq.s32.totalorder %v7049_v60, %v5160_v6  ;;  %v7053_v60 = vld [vmem:[#allocation14_spill] sm:$0xff] }
 0x1af   : > { %v1821_v12 = vcvt.s32.f32 %v1789_v48  ;;  %vm1060_vm7 = vcmp.eq.s32.totalorder %v5502_v49, %v5160_v6  ;;  %v1792_v21 = vadd.s32 %v1760_v42, %v5538_v58  ;;  %v7050_v58 = vld [vmem:[#allocation65_spill] sm:$0xff] }
 0x1b0   : > { %4173 = vset.pattern.permute.xlu1 %v6957_v57 }
 0x1b1   : > { %840 = vperm.xlu1 %4173, %v7035_v59  }
 0x1b2   : > { %v316_v7 = vpop.permute.xlu0 %315 }
 0x1b3   : > { %vm410_vm5 = vcmp.eq.s32.totalorder %v316_v7, %v5160_v6  ;;  %v5561_v1 = vpop.permute.xlu1 %1145 }
 0x1b4   : > { %v442_v18 = vsel %vm410_vm5, 1, %v6967_v16  ;;  %vm1220_vm5 = vcmp.eq.s32.totalorder %v5561_v1, %v5160_v6 }
 0x1b5   : > { %v1594_v17 = vadd.s32 %v5291_v56, %v442_v18  ;;  %4174 = vset.pattern.permute.xlu1 %v6975_v9  ;;  %v930_v56 = vsel %vm898_vm6, 1, %v6967_v16 }
 0x1b6   : > { %v319_v0 = vpop.permute.xlu0 %318  ;;  %1000 = vperm.xlu1 %4174, %v7035_v59   ;;  %v5602_v45 = vadd.s32 %v930_v56, %v770_v5 }
 0x1b7   : > { %vm411_vm8 = vcmp.eq.s32.totalorder %v319_v0, %v5160_v6  ;;  %v1722_v35 = vadd.s32 %v5202_v34, %v1594_v17  ;;  %v5600_v34 = vadd.s32 %v5334_v61, %v450_v14  ;;  %v611_v61 = vsel %vm579_vm9, 1, %v6967_v16  ;;  %v7048_v17 = vld [vmem:[#allocation68_spill] sm:$0xff] }
 0x1b8   : > { %v443_v36 = vsel %vm411_vm8, 1, %v6967_v16  ;;  %v1466_v29 = vpop.permute.xlu1 %1465  ;;  %vm1059_vm15 = vcmp.eq.s32.totalorder %v7048_v17, %v5160_v6  ;;  %v1411_v0 = vsel %vm1379_vm0, 1, %v6967_v16  ;;  %vm581_vm9 = vcmp.eq.s32.totalorder %v7053_v60, %v5160_v6 }
 0x1b9   : > { %v1595_v7 = vadd.s32 %v5240_v44, %v443_v36  ;;  %v1786_v3 = vadd.s32 %v1754_v10, %v1722_v35  ;;  %vm1540_vm3 = vcmp.eq.s32.totalorder %v1466_v29, %v5160_v6  ;;  %v1091_v35 = vsel %vm1059_vm15, 1, %v6967_v16  ;;  %v5680_v29 = vld [vmem:[%s4587_s17 + $0x80] sm:$0xff] }
 0x1ba   : > { %v328_v51 = vpop.permute.xlu0 %327  ;;  %4175 = vset.pattern.permute.xlu1 %v6963_v50  ;;  %v1252_v36 = vsel %vm1220_vm5, 1, %v6967_v16  ;;  %v1730_v46 = vadd.s32 %v5602_v45, %v5600_v34 }
 0x1bb   : > { %v1723_v30 = vadd.s32 %v5257_v62, %v1595_v7  ;;  %vm414_vm12 = vcmp.eq.s32.totalorder %v328_v51, %v5160_v6  ;;  %1320 = vperm.xlu1 %4175, %v7035_v59   ;;  %v1818_v44 = vcvt.s32.f32 %v1786_v3  ;;  %v7046_v62 = vld [vmem:[#allocation66_spill] sm:$0xff]  ;;  %v451_v7 = vsel %vm419_vm13, 1, %v6967_v16 }
 0x1bc   : > { %v446_v32 = vsel %vm414_vm12, 1, %v6967_v16  ;;  %vm1219_vm14 = vcmp.eq.s32.totalorder %v7046_v62, %v5160_v6  ;;  %v1824_v62 = vcvt.s32.f32 %v1792_v21  ;;  %v1794_v38 = vadd.s32 %v5604_v20, %v1730_v46  ;;  %v7054_v20 = vld [vmem:[#allocation31_spill] sm:$0xff]  ;;  %v4402_v21 = vld [vmem:[%s4587_s17 + $0x88] sm:$0xff] }
 0x1bd   : > { %v1598_v24 = vadd.s32 %v5429_v52, %v446_v32  ;;  %3626 = vmatprep.mubr.f32.mxu0 %v1818_v44  ;;  %v5625_v18 = vpop.permute.xlu1 %348  ;;  %v1787_v31 = vadd.s32 %v7047_v37, %v1723_v30  ;;  %v1571_v52 = vsel %vm1539_vm11, 1, %v6967_v16  ;;  %v1251_v43 = vsel %vm1219_vm14, 1, %v6967_v16 }
 0x1be   : > { %v337_v54 = vpop.permute.xlu0 %336  ;;  %v1699_v10 = vadd.s32 %v1571_v52, %v1411_v0  ;;  %v1667_v40 = vadd.s32 %v1251_v43, %v1091_v35  ;;  %v1603_v30 = vadd.s32 %v611_v61, %v451_v7  ;;  %v1092_v32 = vsel %vm1060_vm7, 1, %v6967_v16 }
 0x1bf   : > { %v1726_v14 = vadd.s32 %v5420_v22, %v1598_v24  ;;  %vm417_vm2 = vcmp.eq.s32.totalorder %v337_v54, %v5160_v6  ;;  %4176 = vset.pattern.permute.xlu1 %v6981_v28  ;;  %v1819_v41 = vcvt.s32.f32 %v1787_v31  ;;  %v1668_v45 = vadd.s32 %v1252_v36, %v1092_v32  ;;  %v7057_v36 = vld [vmem:[#allocation55_spill] sm:$0xff] }
 0x1c0   : > { %v449_v15 = vsel %vm417_vm2, 1, %v6967_v16  ;;  %1480 = vperm.xlu1 %4176, %v7035_v59   ;;  %v772_v59 = vsel %vm740_vm1, 1, %v6967_v16  ;;  %v1763_v44 = vadd.s32 %v1699_v10, %v1667_v40  ;;  %v7052_v37 = vmov 2  }
 0x1c1   : > { %v1601_v22 = vadd.s32 %v5516_v33, %v449_v15  ;;  %3627 = vmatmul.mubr.f32.vlgmr.msra.gmra.mrb[0].mxu0 %v1819_v41  ;;  %v1790_v56 = vadd.s32 %v5448_v8, %v1726_v14  ;;  %v1572_v33 = vsel %vm1540_vm3, 1, %v6967_v16  ;;  %v1636_v3 = vadd.s32 %v7050_v58, %v772_v59 }
 0x1c2   : > { %v346_v25 = vpop.permute.xlu0 %345  ;;  %3629 = vmatprep.mubr.f32.mxu0 %v1820_v47  ;;  %v669_v8 = vpop.permute.xlu1 %668  ;;  %v1635_v47 = vadd.s32 %v931_v39, %v5569_v27  ;;  %v7051_v27 = vld [vmem:[#allocation67_spill] sm:$0xff]  ;;  %v1826_v39 = vcvt.s32.f32 %v1794_v38  ;;  %vm1061_vm10 = vcmp.eq.s32.totalorder %v7054_v20, %v5160_v6  ;;  %vm1541_vm11 = vcmp.eq.s32.totalorder %v7055_v13, %v5160_v6  ;;  %v2133_v13 = vld [vmem:[%s6906_s3 + $0x18] sm:$0xff] }
 0x1c3   : > { %v1729_v5 = vadd.s32 %v5524_v26, %v1601_v22  ;;  %vm420_vm6 = vcmp.eq.s32.totalorder %v346_v25, %v5160_v6  ;;  %v1822_v2 = vcvt.s32.f32 %v1790_v56  ;;  %v1700_v51 = vadd.s32 %v1572_v33, %v7051_v27  ;;  %v2132_v20 = vld [vmem:[%s6906_s3 + $0x10] sm:$0xff] }
 0x1c4   : > { %v452_v1 = vsel %vm420_vm6, 1, %v6967_v16  ;;  %4177 = vset.pattern.permute.xlu1 %v6970_v55  ;;  %v1731_v24 = vadd.s32 %v1635_v47, %v1603_v30  ;;  %vm421_vm12 = vcmp.eq.s32.totalorder %v5625_v18, %v5160_v6  ;;  %vm741_vm13 = vcmp.eq.s32.totalorder %v669_v8, %v5160_v6 }
 0x1c5   : > { %v1604_v26 = vadd.s32 %v612_v4, %v452_v1  ;;  %3630 = vmatmul.mubr.f32.gmra.mrb[2].mxu0 %v1821_v12  ;;  %523 = vperm.xlu1 %4177, %v5680_v29   ;;  %v1793_v34 = vadd.s32 %v5576_v11, %v1729_v5  ;;  %v1764_v61 = vadd.s32 %v1700_v51, %v1668_v45  ;;  %v613_v54 = vsel %vm581_vm9, 1, %v6967_v16 }
 0x1c6   : > { %3632 = vmatprep.mubr.f32.mxu0 %v1822_v2  ;;  %v1795_v31 = vadd.s32 %v1763_v44, %v1731_v24  ;;  %v1093_v14 = vsel %vm1061_vm10, 1, %v6967_v16  ;;  %v1573_v43 = vsel %vm1541_vm11, 1, %v6967_v16  ;;  %v453_v18 = vsel %vm421_vm12, 1, %v6967_v16 }
 0x1c7   : > { %v829_v48 = vpop.permute.xlu1 %828  ;;  %v1732_v42 = vadd.s32 %v1636_v3, %v1604_v26  ;;  %v1825_v49 = vcvt.s32.f32 %v1793_v34  ;;  %v773_v15 = vsel %vm741_vm13, 1, %v6967_v16  ;;  %v7056_v35 = vmov 5  }
 0x1c8   : > { %vm901_vm8 = vcmp.eq.s32.totalorder %v829_v48, %v5160_v6  ;;  %v1827_v52 = vcvt.s32.f32 %v1795_v31  ;;  %v1605_v10 = vadd.s32 %v613_v54, %v453_v18  ;;  %vm742_vm0 = vcmp.eq.s32.totalorder %v7057_v36, %v5160_v6  ;;  %v2134_v54 = vld [vmem:[%s6906_s3 + $0x20] sm:$0xff] }
 0x1c9   : > { %3633 = vmatmul.mubr.f32.gmra.mrb[4].mxu0 %v1823_v53  ;;  %4178 = vset.pattern.permute.xlu1 %v7052_v37  ;;  %v1796_v17 = vadd.s32 %v1764_v61, %v1732_v42  ;;  %v933_v53 = vsel %vm901_vm8, 1, %v6967_v16  ;;  %v774_v46 = vsel %vm742_vm0, 1, %v6967_v16  ;;  %v7059_v18 = vld [vmem:[#allocation5_spill] sm:$0xff] }
 0x1ca   : > { %3635 = vmatprep.mubr.f32.mxu0 %v1824_v62  ;;  %683 = vperm.xlu1 %4178, %v5680_v29   ;;  %v1637_v22 = vadd.s32 %v933_v53, %v773_v15  ;;  %v3950_v53 = vpack.c.bf16 %v2133_v13, %v2132_v20  ;;  %vm903_vm8 = vcmp.eq.s32.totalorder %v7059_v18, %v5160_v6 }
 0x1cb   : > { %v1828_v41 = vcvt.s32.f32 %v1796_v17 }
 0x1cc   : > { %v1149_v11 = vpop.permute.xlu1 %1148  ;;  %v1733_v8 = vadd.s32 %v1637_v22, %v1605_v10  ;;  %v2137_v22 = vld [vmem:[%s6906_s3 + $0x38] sm:$0xff]  ;;  %v935_v10 = vsel %vm903_vm8, 1, %v6967_v16 }
 0x1cd   : > { %3636 = vmatmul.mubr.f32.gmra.mrb[6].mxu0 %v1825_v49  ;;  %vm1221_vm14 = vcmp.eq.s32.totalorder %v1149_v11, %v5160_v6  ;;  %v5753_v49 = vld [vmem:[%s4587_s17 + $0x90] sm:$0xff]  ;;  %v2130_v11 = vld [vmem:[%s6906_s3] sm:$0xff] }
 0x1ce   : > { %4180 = vset.pattern.permute.xlu1 %v6975_v9  ;;  %3638 = vmatprep.mubr.f32.mxu0 %v1826_v39  ;;  %v1253_v12 = vsel %vm1221_vm14, 1, %v6967_v16  ;;  %v2131_v39 = vld [vmem:[%s6906_s3 + $0x8] sm:$0xff] }
 0x1cf   : > { %1003 = vperm.xlu1 %4180, %v5680_v29   ;;  %v1669_v59 = vadd.s32 %v1253_v12, %v1093_v14  ;;  %v3946_v60 = vpack.c.bf16 %v2131_v39, %v2130_v11  ;;  %v2135_v14 = vld [vmem:[%s6906_s3 + $0x28] sm:$0xff]  ;;  %v7060_v12 = vld [vmem:[#allocation7_spill] sm:$0xff]  ;;  %v7062_v39 = vld [vmem:[#allocation33_spill] sm:$0xff] }
 0x1d0   : > { %vm1383_vm10 = vcmp.eq.s32.totalorder %v7060_v12, %v5160_v6  ;;  %v7061_v11 = vld [vmem:[#allocation15_spill] sm:$0xff] }
 0x1d1   : > { %3639 = vmatmul.mubr.f32.gmra.mrb[8].mxu0 %v1827_v52  ;;  %v1309_v0 = vpop.permute.xlu1 %1308  ;;  %3947 = vmatprep.subr.bf16.mxu1 %v3946_v60 }
 0x1d2   : > { %vm1381_vm15 = vcmp.eq.s32.totalorder %v1309_v0, %v5160_v6  ;;  %3641 = vmatprep.mubr.f32.mxu0 %v1828_v41  ;;  %3949 = vmatpush3.bf16.msra.mxu1 %v3946_v60  ;;  %v3954_v41 = vpack.c.bf16 %v2135_v14, %v2134_v54  ;;  %v2136_v0 = vld [vmem:[%s6906_s3 + $0x30] sm:$0xff] }
 0x1d3   : > { %v1413_v56 = vsel %vm1381_vm15, 1, %v6967_v16  ;;  %4181 = vset.pattern.permute.xlu1 %v7056_v35  ;;  %3951 = vmatprep.subr.bf16.mxu1 %v3950_v53 }
 0x1d4   : > { %v1701_v25 = vadd.s32 %v1573_v43, %v1413_v56  ;;  %1163 = vperm.xlu1 %4181, %v5680_v29   ;;  %v355_v43 = vpop.permute.xlu0 %354  ;;  %v3958_v56 = vpack.c.bf16 %v2137_v22, %v2136_v0 }
 0x1d5   : > { %vm423_vm11 = vcmp.eq.s32.totalorder %v355_v43, %v5160_v6 }
 0x1d6   : > { %v1765_v33 = vadd.s32 %v1701_v25, %v1669_v59  ;;  %v352_v5 = vpop.permute.xlu1 %351  ;;  %3953 = vmatpush3.bf16.msra.mxu1 %v3950_v53  ;;  %v1415_v25 = vsel %vm1383_vm10, 1, %v6967_v16 }
 0x1d7   : > { %vm422_vm5 = vcmp.eq.s32.totalorder %v352_v5, %v5160_v6  ;;  %3955 = vmatprep.subr.bf16.mxu1 %v3954_v41 }
 0x1d8   : > { %4182 = vset.pattern.permute.xlu1 %v6981_v28  ;;  %v1797_v2 = vadd.s32 %v1765_v33, %v1733_v8  ;;  %v454_v44 = vsel %vm422_vm5, 1, %v6967_v16  ;;  %v455_v8 = vsel %vm423_vm11, 1, %v6967_v16 }
 0x1d9   : > { %1483 = vperm.xlu1 %4182, %v5680_v29   ;;  %v7058_v29 = vld [vmem:[#allocation69_spill] sm:$0xff] }
 0x1da   : > { %v1829_v4 = vcvt.s32.f32 %v1797_v2  ;;  %vm1222_vm2 = vcmp.eq.s32.totalorder %v7058_v29, %v5160_v6  ;;  %3957 = vmatpush3.bf16.msra.mxu1 %v3954_v41 }
 0x1db   : > { %v512_v1 = vpop.permute.xlu1 %511  ;;  %v1254_v58 = vsel %vm1222_vm2, 1, %v6967_v16  ;;  %3959 = vmatprep.subr.bf16.mxu1 %v3958_v56  ;;  %vm1064_vm2 = vcmp.eq.s32.totalorder %v7062_v39, %v5160_v6 }
 0x1dc   : > { %3642 = vmatmul.mubr.f32.gmra.mrb[10].mxu0 %v1829_v4  ;;  %vm582_vm3 = vcmp.eq.s32.totalorder %v512_v1, %v5160_v6  ;;  %v2138_v4 = vld [vmem:[%s6906_s3 + $0x40] sm:$0xff]  ;;  %v2139_v1 = vld [vmem:[%s6906_s3 + $0x48] sm:$0xff]  ;;  %v1096_v13 = vsel %vm1064_vm2, 1, %v6967_v16 }
 0x1dd   : > { %4183 = vset.pattern.permute.xlu1 %v6967_v16  ;;  %v614_v3 = vsel %vm582_vm3, 1, %v6967_v16 }
 0x1de   : > { %366 = vperm.xlu1 %4183, %v4402_v21   ;;  %v1606_v34 = vadd.s32 %v614_v3, %v454_v44  ;;  %3961 = vmatpush3.bf16.msra.mxu1 %v3958_v56 }
 0x1e0   : > { %v832_v47 = vpop.permute.xlu1 %831 }
 0x1e1   : > { %vm902_vm1 = vcmp.eq.s32.totalorder %v832_v47, %v5160_v6  ;;  %v3962_v47 = vpack.c.bf16 %v2139_v1, %v2138_v4  ;;  %v7064_v4 = vld [vmem:[#allocation56_spill] sm:$0xff] }
 0x1e2   : > { %4184 = vset.pattern.permute.xlu1 %v7052_v37  ;;  %v934_v7 = vsel %vm902_vm1, 1, %v6967_v16  ;;  %vm584_vm1 = vcmp.eq.s32.totalorder %v7061_v11, %v5160_v6  ;;  %vm745_vm8 = vcmp.eq.s32.totalorder %v7064_v4, %v5160_v6  ;;  %v7067_v11 = vld [vmem:[#allocation8_spill] sm:$0xff] }
 0x1e3   : > { %686 = vperm.xlu1 %4184, %v4402_v21   ;;  %v1638_v30 = vadd.s32 %v934_v7, %v774_v46  ;;  %3963 = vmatprep.subr.bf16.mxu1 %v3962_v47  ;;  %v2140_v7 = vld [vmem:[%s6906_s3 + $0x50] sm:$0xff]  ;;  %v616_v20 = vsel %vm584_vm1, 1, %v6967_v16  ;;  %vm1386_vm2 = vcmp.eq.s32.totalorder %v7067_v11, %v5160_v6  ;;  %v7070_v4 = vld [vmem:[#allocation44_spill] sm:$0xff]  ;;  %v7072_v11 = vld [vmem:[#allocation26_spill] sm:$0xff] }
 0x1e4   : > { %3965 = vmatpush3.bf16.msra.mxu1 %v3962_v47  ;;  %v777_v47 = vsel %vm745_vm8, 1, %v6967_v16 }
 0x1e5   : > { %v992_v40 = vpop.permute.xlu1 %991  ;;  %v1734_v62 = vadd.s32 %v1638_v30, %v1606_v34 }
 0x1e6   : > { %vm1062_vm4 = vcmp.eq.s32.totalorder %v992_v40, %v5160_v6 }
 0x1e7   : > { %4185 = vset.pattern.permute.xlu1 %v6957_v57  ;;  %v1094_v27 = vsel %vm1062_vm4, 1, %v6967_v16 }
 0x1e8   : > { %846 = vperm.xlu1 %4185, %v4402_v21   ;;  %v1670_v45 = vadd.s32 %v1254_v58, %v1094_v27  ;;  %v2141_v58 = vld [vmem:[%s6906_s3 + $0x58] sm:$0xff] }
 0x1e9   : > { %v3966_v30 = vpack.c.bf16 %v2141_v58, %v2140_v7 }
 0x1ea   : > { %v1312_v26 = vpop.permute.xlu1 %1311 }
 0x1eb   : > { %vm1382_vm6 = vcmp.eq.s32.totalorder %v1312_v26, %v5160_v6  ;;  %3967 = vmatprep.subr.bf16.mxu1 %v3966_v30 }
 0x1ec   : > { %4186 = vset.pattern.permute.xlu1 %v7056_v35  ;;  %v1414_v32 = vsel %vm1382_vm6, 1, %v6967_v16  ;;  %3969 = vmatpush3.bf16.msra.mxu1 %v3966_v30 }
 0x1ed   : > { %1166 = vperm.xlu1 %4186, %v4402_v21  }
 0x1ef   : > { %v1472_v51 = vpop.permute.xlu1 %1471 }
 0x1f0   : > { %vm1542_vm7 = vcmp.eq.s32.totalorder %v1472_v51, %v5160_v6 }
 0x1f1   : > { %v1574_v48 = vsel %vm1542_vm7, 1, %v6967_v16  ;;  %4187 = vset.pattern.permute.xlu1 %v6963_v50 }
 0x1f2   : > { %v1702_v42 = vadd.s32 %v1574_v48, %v1414_v32  ;;  %1326 = vperm.xlu1 %4187, %v4402_v21   ;;  %v2142_v32 = vld [vmem:[%s6906_s3 + $0x60] sm:$0xff]  ;;  %v2143_v48 = vld [vmem:[%s6906_s3 + $0x68] sm:$0xff] }
 0x1f4   : > { %v1766_v38 = vadd.s32 %v1702_v42, %v1670_v45  ;;  %v515_v24 = vpop.permute.xlu1 %514  ;;  %v3970_v45 = vpack.c.bf16 %v2143_v48, %v2142_v32 }
 0x1f5   : > { %vm583_vm12 = vcmp.eq.s32.totalorder %v515_v24, %v5160_v6  ;;  %v4404_v24 = vld [vmem:[%s4587_s17 + $0x98] sm:$0xff] }
 0x1f6   : > { %4188 = vset.pattern.permute.xlu1 %v6967_v16  ;;  %v1798_v61 = vadd.s32 %v1766_v38, %v1734_v62  ;;  %v615_v33 = vsel %vm583_vm12, 1, %v6967_v16  ;;  %3971 = vmatprep.subr.bf16.mxu1 %v3970_v45  ;;  %v2144_v62 = vld [vmem:[%s6906_s3 + $0x70] sm:$0xff]  ;;  %v2145_v38 = vld [vmem:[%s6906_s3 + $0x78] sm:$0xff] }
 0x1f7   : > { %369 = vperm.xlu1 %4188, %v5753_v49   ;;  %v1607_v26 = vadd.s32 %v615_v33, %v455_v8  ;;  %3973 = vmatpush3.bf16.msra.mxu1 %v3970_v45  ;;  %v4405_v33 = vld [vmem:[%s4587_s17 + $0xa0] sm:$0xff] }
 0x1f8   : > { %v1830_v31 = vcvt.s32.f32 %v1798_v61  ;;  %v3974_v61 = vpack.c.bf16 %v2145_v38, %v2144_v62 }
 0x1f9   : > { %v675_v17 = vpop.permute.xlu1 %674 }
 0x1fa   : > { %3644 = vmatprep.mubr.f32.mxu0 %v1830_v31  ;;  %vm743_vm9 = vcmp.eq.s32.totalorder %v675_v17, %v5160_v6  ;;  %3975 = vmatprep.subr.bf16.mxu1 %v3974_v61  ;;  %v7063_v17 = vld [vmem:[#allocation42_spill] sm:$0xff] }
 0x1fb   : > { %4189 = vset.pattern.permute.xlu1 %v6970_v55  ;;  %v775_v59 = vsel %vm743_vm9, 1, %v6967_v16  ;;  %3977 = vmatpush3.bf16.msra.mxu1 %v3974_v61  ;;  %vm1544_vm3 = vcmp.eq.s32.totalorder %v7063_v17, %v5160_v6  ;;  %v364_v61 = vpop.permute.xlu0 %363 }
 0x1fc   : > { %529 = vperm.xlu1 %4189, %v5753_v49   ;;  %v1639_v21 = vadd.s32 %v935_v10, %v775_v59  ;;  %v1576_v53 = vsel %vm1544_vm3, 1, %v6967_v16  ;;  %vm426_vm3 = vcmp.eq.s32.totalorder %v364_v61, %v5160_v6 }
 0x1fe   : > { %v995_v52 = vpop.permute.xlu1 %994  ;;  %v1735_v3 = vadd.s32 %v1639_v21, %v1607_v26  ;;  %v7065_v21 = vld [vmem:[#allocation16_spill] sm:$0xff] }
 0x1ff   : > { %vm1063_vm14 = vcmp.eq.s32.totalorder %v995_v52, %v5160_v6  ;;  %vm1225_vm10 = vcmp.eq.s32.totalorder %v7065_v21, %v5160_v6 }
 0x200   : > { %4190 = vset.pattern.permute.xlu1 %v6957_v57  ;;  %v1095_v40 = vsel %vm1063_vm14, 1, %v6967_v16 }
 0x201   : > { %849 = vperm.xlu1 %4190, %v5753_v49  }
 0x203   : > { %v1155_v15 = vpop.permute.xlu1 %1154 }
 0x204   : > { %vm1223_vm13 = vcmp.eq.s32.totalorder %v1155_v15, %v5160_v6 }
 0x205   : > { %4191 = vset.pattern.permute.xlu1 %v6975_v9  ;;  %v1255_v5 = vsel %vm1223_vm13, 1, %v6967_v16 }
 0x206   : > { %1009 = vperm.xlu1 %4191, %v5753_v49   ;;  %v1671_v29 = vadd.s32 %v1255_v5, %v1095_v40 }
 0x208   : > { %v1475_v2 = vpop.permute.xlu1 %1474 }
 0x209   : > { %vm1543_vm15 = vcmp.eq.s32.totalorder %v1475_v2, %v5160_v6 }
 0x20a   : > { %v1575_v36 = vsel %vm1543_vm15, 1, %v6967_v16  ;;  %4192 = vset.pattern.permute.xlu1 %v6963_v50 }
 0x20b   : > { %v1703_v46 = vadd.s32 %v1575_v36, %v1415_v25  ;;  %1329 = vperm.xlu1 %4192, %v5753_v49   ;;  %v1257_v36 = vsel %vm1225_vm10, 1, %v6967_v16 }
 0x20d   : > { %v1767_v27 = vadd.s32 %v1703_v46, %v1671_v29  ;;  %v358_v51 = vpop.permute.xlu1 %357 }
 0x20e   : > { %vm424_vm4 = vcmp.eq.s32.totalorder %v358_v51, %v5160_v6 }
 0x20f   : > { %4193 = vset.pattern.permute.xlu1 %v6981_v28  ;;  %v1799_v44 = vadd.s32 %v1767_v27, %v1735_v3  ;;  %v456_v52 = vsel %vm424_vm4, 1, %v6967_v16 }
 0x210   : > { %1489 = vperm.xlu1 %4193, %v5753_v49   ;;  %v1608_v15 = vadd.s32 %v616_v20, %v456_v52  ;;  %v458_v20 = vsel %vm426_vm3, 1, %v6967_v16 }
 0x211   : > { %v1831_v34 = vcvt.s32.f32 %v1799_v44 }
 0x212   : > { %v678_v42 = vpop.permute.xlu1 %677 }
 0x213   : > { %3645 = vmatmul.mubr.f32.gmra.mrb[12].mxu0 %v1831_v34  ;;  %vm744_vm5 = vcmp.eq.s32.totalorder %v678_v42, %v5160_v6  ;;  %v4406_v42 = vld [vmem:[%s4587_s17 + $0xa8] sm:$0xff] }
 0x214   : > { %4194 = vset.pattern.permute.xlu1 %v6970_v55  ;;  %v776_v54 = vsel %vm744_vm5, 1, %v6967_v16 }
 0x215   : > { %532 = vperm.xlu1 %4194, %v4404_v24  }
 0x217   : > { %v838_v49 = vpop.permute.xlu1 %837 }
 0x218   : > { %vm904_vm0 = vcmp.eq.s32.totalorder %v838_v49, %v5160_v6  ;;  %v7066_v49 = vld [vmem:[#allocation6_spill] sm:$0xff] }
 0x219   : > { %4195 = vset.pattern.permute.xlu1 %v7052_v37  ;;  %v936_v60 = vsel %vm904_vm0, 1, %v6967_v16  ;;  %vm906_vm0 = vcmp.eq.s32.totalorder %v7066_v49, %v5160_v6  ;;  %v7071_v49 = vld [vmem:[#allocation57_spill] sm:$0xff] }
 0x21a   : > { %692 = vperm.xlu1 %4195, %v4404_v24   ;;  %v1640_v43 = vadd.s32 %v936_v60, %v776_v54  ;;  %v938_v39 = vsel %vm906_vm0, 1, %v6967_v16  ;;  %v1418_v60 = vsel %vm1386_vm2, 1, %v6967_v16  ;;  %vm748_vm0 = vcmp.eq.s32.totalorder %v7071_v49, %v5160_v6 }
 0x21b   : > { %vm1228_vm2 = vcmp.eq.s32.totalorder %v7072_v11, %v5160_v6 }
 0x21c   : > { %v1158_v31 = vpop.permute.xlu1 %1157  ;;  %v1736_v22 = vadd.s32 %v1640_v43, %v1608_v15 }
 0x21d   : > { %vm1224_vm6 = vcmp.eq.s32.totalorder %v1158_v31, %v5160_v6 }
 0x21e   : > { %4196 = vset.pattern.permute.xlu1 %v6975_v9  ;;  %v1256_v14 = vsel %vm1224_vm6, 1, %v6967_v16 }
 0x21f   : > { %1012 = vperm.xlu1 %4196, %v4404_v24   ;;  %v1672_v12 = vadd.s32 %v1256_v14, %v1096_v13 }
 0x221   : > { %v1318_v41 = vpop.permute.xlu1 %1317 }
 0x222   : > { %vm1384_vm7 = vcmp.eq.s32.totalorder %v1318_v41, %v5160_v6 }
 0x223   : > { %v1416_v18 = vsel %vm1384_vm7, 1, %v6967_v16  ;;  %4197 = vset.pattern.permute.xlu1 %v7056_v35 }
 0x224   : > { %v1704_v0 = vadd.s32 %v1576_v53, %v1416_v18  ;;  %1172 = vperm.xlu1 %4197, %v4404_v24  }
 0x226   : > { %v1768_v56 = vadd.s32 %v1704_v0, %v1672_v12  ;;  %v361_v10 = vpop.permute.xlu1 %360 }
 0x227   : > { %vm425_vm13 = vcmp.eq.s32.totalorder %v361_v10, %v5160_v6 }
 0x228   : > { %4198 = vset.pattern.permute.xlu1 %v6981_v28  ;;  %v1800_v59 = vadd.s32 %v1768_v56, %v1736_v22  ;;  %v457_v58 = vsel %vm425_vm13, 1, %v6967_v16 }
 0x229   : > { %1492 = vperm.xlu1 %4198, %v4404_v24  }
 0x22a   : > { %v1832_v25 = vcvt.s32.f32 %v1800_v59 }
 0x22b   : > { %v521_v8 = vpop.permute.xlu1 %520 }
 0x22c   : > { %3647 = vmatprep.mubr.f32.mxu0 %v1832_v25  ;;  %vm585_vm11 = vcmp.eq.s32.totalorder %v521_v8, %v5160_v6  ;;  %v4407_v25 = vld [vmem:[%s4587_s17 + $0xb0] sm:$0xff] }
 0x22d   : > { %4199 = vset.pattern.permute.xlu1 %v6967_v16  ;;  %v617_v26 = vsel %vm585_vm11, 1, %v6967_v16  ;;  %vm1547_vm11 = vcmp.eq.s32.totalorder %v7070_v4, %v5160_v6  ;;  %v5974_v4 = vld [vmem:[%s4587_s17 + $0xc0] sm:$0xff] }
 0x22e   : > { %375 = vperm.xlu1 %4199, %v4405_v33   ;;  %v1609_v51 = vadd.s32 %v617_v26, %v457_v58 }
 0x230   : > { %v841_v5 = vpop.permute.xlu1 %840 }
 0x231   : > { %vm905_vm9 = vcmp.eq.s32.totalorder %v841_v5, %v5160_v6  ;;  %v7068_v5 = vld [vmem:[#allocation17_spill] sm:$0xff] }
 0x232   : > { %4200 = vset.pattern.permute.xlu1 %v7052_v37  ;;  %v937_v40 = vsel %vm905_vm9, 1, %v6967_v16  ;;  %vm587_vm9 = vcmp.eq.s32.totalorder %v7068_v5, %v5160_v6 }
 0x233   : > { %695 = vperm.xlu1 %4200, %v4405_v33   ;;  %v1641_v7 = vadd.s32 %v937_v40, %v777_v47  ;;  %v619_v21 = vsel %vm587_vm9, 1, %v6967_v16  ;;  %v1579_v40 = vsel %vm1547_vm11, 1, %v6967_v16 }
 0x235   : > { %v1001_v2 = vpop.permute.xlu1 %1000  ;;  %v1737_v32 = vadd.s32 %v1641_v7, %v1609_v51 }
 0x236   : > { %vm1065_vm12 = vcmp.eq.s32.totalorder %v1001_v2, %v5160_v6  ;;  %v7069_v2 = vld [vmem:[#allocation35_spill] sm:$0xff] }
 0x237   : > { %4201 = vset.pattern.permute.xlu1 %v6957_v57  ;;  %v1097_v29 = vsel %vm1065_vm12, 1, %v6967_v16  ;;  %vm1067_vm10 = vcmp.eq.s32.totalorder %v7069_v2, %v5160_v6 }
 0x238   : > { %855 = vperm.xlu1 %4201, %v4405_v33   ;;  %v1673_v30 = vadd.s32 %v1257_v36, %v1097_v29  ;;  %v1099_v47 = vsel %vm1067_vm10, 1, %v6967_v16 }
 0x23a   : > { %v1321_v1 = vpop.permute.xlu1 %1320 }
 0x23b   : > { %vm1385_vm14 = vcmp.eq.s32.totalorder %v1321_v1, %v5160_v6 }
 0x23c   : > { %4202 = vset.pattern.permute.xlu1 %v7056_v35  ;;  %v1417_v3 = vsel %vm1385_vm14, 1, %v6967_v16 }
 0x23d   : > { %1175 = vperm.xlu1 %4202, %v4405_v33  }
 0x23f   : > { %v1481_v46 = vpop.permute.xlu1 %1480 }
 0x240   : > { %vm1545_vm15 = vcmp.eq.s32.totalorder %v1481_v46, %v5160_v6 }
 0x241   : > { %v1577_v27 = vsel %vm1545_vm15, 1, %v6967_v16  ;;  %4203 = vset.pattern.permute.xlu1 %v6963_v50 }
 0x242   : > { %v1705_v44 = vadd.s32 %v1577_v27, %v1417_v3  ;;  %1335 = vperm.xlu1 %4203, %v4405_v33  }
 0x244   : > { %v1769_v48 = vadd.s32 %v1705_v44, %v1673_v30  ;;  %v524_v34 = vpop.permute.xlu1 %523 }
 0x245   : > { %vm586_vm4 = vcmp.eq.s32.totalorder %v524_v34, %v5160_v6 }
 0x246   : > { %4204 = vset.pattern.permute.xlu1 %v6967_v16  ;;  %v1801_v45 = vadd.s32 %v1769_v48, %v1737_v32  ;;  %v618_v13 = vsel %vm586_vm4, 1, %v6967_v16 }
 0x247   : > { %378 = vperm.xlu1 %4204, %v4406_v42   ;;  %v1610_v43 = vadd.s32 %v618_v13, %v458_v20  ;;  %v1260_v20 = vsel %vm1228_vm2, 1, %v6967_v16 }
 0x248   : > { %v1833_v62 = vcvt.s32.f32 %v1801_v45 }
 0x249   : > { %v684_v38 = vpop.permute.xlu1 %683 }
 0x24a   : > { %3648 = vmatmul.mubr.f32.gmra.mrb[14].mxu0 %v1833_v62  ;;  %vm746_vm1 = vcmp.eq.s32.totalorder %v684_v38, %v5160_v6  ;;  %v5933_v38 = vpop.permute.xlu0 %372 }
 0x24b   : > { %4205 = vset.pattern.permute.xlu1 %v6970_v55  ;;  %v778_v17 = vsel %vm746_vm1, 1, %v6967_v16  ;;  %vm429_vm10 = vcmp.eq.s32.totalorder %v5933_v38, %v5160_v6 }
 0x24c   : > { %538 = vperm.xlu1 %4205, %v4406_v42   ;;  %v1642_v54 = vadd.s32 %v938_v39, %v778_v17  ;;  %v780_v39 = vsel %vm748_vm0, 1, %v6967_v16 }
 0x24e   : > { %v1004_v24 = vpop.permute.xlu1 %1003  ;;  %v1738_v12 = vadd.s32 %v1642_v54, %v1610_v43  ;;  %v5937_v61 = vpop.permute.xlu0 %381 }
 0x24f   : > { %vm1066_vm6 = vcmp.eq.s32.totalorder %v1004_v24, %v5160_v6 }
 0x250   : > { %4206 = vset.pattern.permute.xlu1 %v6957_v57  ;;  %v1098_v14 = vsel %vm1066_vm6, 1, %v6967_v16 }
 0x251   : > { %858 = vperm.xlu1 %4206, %v4406_v42  }
 0x253   : > { %v1164_v31 = vpop.permute.xlu1 %1163 }
 0x254   : > { %vm1226_vm5 = vcmp.eq.s32.totalorder %v1164_v31, %v5160_v6 }
 0x255   : > { %4207 = vset.pattern.permute.xlu1 %v6975_v9  ;;  %v1258_v53 = vsel %vm1226_vm5, 1, %v6967_v16 }
 0x256   : > { %1018 = vperm.xlu1 %4207, %v4406_v42   ;;  %v1674_v18 = vadd.s32 %v1258_v53, %v1098_v14 }
 0x258   : > { %v1484_v52 = vpop.permute.xlu1 %1483 }
 0x259   : > { %vm1546_vm7 = vcmp.eq.s32.totalorder %v1484_v52, %v5160_v6 }
 0x25a   : > { %v1578_v41 = vsel %vm1546_vm7, 1, %v6967_v16  ;;  %4208 = vset.pattern.permute.xlu1 %v6963_v50 }
 0x25b   : > { %v1706_v15 = vadd.s32 %v1578_v41, %v1418_v60  ;;  %1338 = vperm.xlu1 %4208, %v4406_v42   ;;  %v5949_v60 = vpop.permute.xlu0 %390 }
 0x25d   : > { %v1770_v0 = vadd.s32 %v1706_v15, %v1674_v18  ;;  %v367_v22 = vpop.permute.xlu1 %366 }
 0x25e   : > { %vm427_vm12 = vcmp.eq.s32.totalorder %v367_v22, %v5160_v6 }
 0x25f   : > { %4209 = vset.pattern.permute.xlu1 %v6981_v28  ;;  %v1802_v56 = vadd.s32 %v1770_v0, %v1738_v12  ;;  %v459_v36 = vsel %vm427_vm12, 1, %v6967_v16  ;;  %v5964_v0 = vld [vmem:[%s6905_s2] ss:$0 sm:$0xff]  ;;  %v5966_v22 = vpop.permute.xlu0 %399 }
 0x260   : > { %1498 = vperm.xlu1 %4209, %v4406_v42   ;;  %v1611_v3 = vadd.s32 %v619_v21, %v459_v36  ;;  %v4408_v42 = vld [vmem:[%s4587_s17 + $0xb8] sm:$0xff] }
 0x261   : > { %v1834_v10 = vcvt.s32.f32 %v1802_v56 }
 0x262   : > { %v687_v59 = vpop.permute.xlu1 %686 }
 0x263   : > { %3650 = vmatprep.mubr.f32.mxu0 %v1834_v10  ;;  %vm747_vm13 = vcmp.eq.s32.totalorder %v687_v59, %v5160_v6 }
 0x264   : > { %4210 = vset.pattern.permute.xlu1 %v6970_v55  ;;  %v779_v26 = vsel %vm747_vm13, 1, %v6967_v16 }
 0x265   : > { %541 = vperm.xlu1 %4210, %v4407_v25  }
 0x267   : > { %v847_v8 = vpop.permute.xlu1 %846 }
 0x268   : > { %vm907_vm8 = vcmp.eq.s32.totalorder %v847_v8, %v5160_v6 }
 0x269   : > { %4211 = vset.pattern.permute.xlu1 %v7052_v37  ;;  %v939_v1 = vsel %vm907_vm8, 1, %v6967_v16 }
 0x26a   : > { %701 = vperm.xlu1 %4211, %v4407_v25   ;;  %v1643_v7 = vadd.s32 %v939_v1, %v779_v26 }
 0x26c   : > { %v1167_v33 = vpop.permute.xlu1 %1166  ;;  %v1739_v30 = vadd.s32 %v1643_v7, %v1611_v3 }
 0x26d   : > { %vm1227_vm14 = vcmp.eq.s32.totalorder %v1167_v33, %v5160_v6 }
 0x26e   : > { %4212 = vset.pattern.permute.xlu1 %v6975_v9  ;;  %v1259_v29 = vsel %vm1227_vm14, 1, %v6967_v16 }
 0x26f   : > { %1021 = vperm.xlu1 %4212, %v4407_v25   ;;  %v1675_v27 = vadd.s32 %v1259_v29, %v1099_v47 }
 0x271   : > { %v1327_v46 = vpop.permute.xlu1 %1326 }
 0x272   : > { %vm1387_vm15 = vcmp.eq.s32.totalorder %v1327_v46, %v5160_v6  ;;  %v5978_v46 = vpop.permute.xlu0 %408 }
 0x273   : > { %v1419_v58 = vsel %vm1387_vm15, 1, %v6967_v16  ;;  %4213 = vset.pattern.permute.xlu1 %v7056_v35 }
 0x274   : > { %v1707_v51 = vadd.s32 %v1579_v40, %v1419_v58  ;;  %1181 = vperm.xlu1 %4213, %v4407_v25  }
 0x276   : > { %v1771_v44 = vadd.s32 %v1707_v51, %v1675_v27  ;;  %v370_v32 = vpop.permute.xlu1 %369 }
 0x277   : > { %vm428_vm5 = vcmp.eq.s32.totalorder %v370_v32, %v5160_v6 }
 0x278   : > { %4214 = vset.pattern.permute.xlu1 %v6981_v28  ;;  %v1803_v48 = vadd.s32 %v1771_v44, %v1739_v30  ;;  %v460_v14 = vsel %vm428_vm5, 1, %v6967_v16 }
 0x279   : > { %1501 = vperm.xlu1 %4214, %v4407_v25  }
 0x27a   : > { %v1835_v34 = vcvt.s32.f32 %v1803_v48  ;;  %v853_v48 = vpop.permute.xlu0 %852 }
 0x27b   : > { %v530_v45 = vpop.permute.xlu1 %529  ;;  %vm909_vm8 = vcmp.eq.s32.totalorder %v853_v48, %v5160_v6  ;;  %v7076_v48 = vld [vmem:[#allocation46_spill] sm:$0xff] }
 0x27c   : > { %3651 = vmatmul.mubr.f32.gmra.mrb[16].mxu0 %v1835_v34  ;;  %vm588_vm3 = vcmp.eq.s32.totalorder %v530_v45, %v5160_v6 }
 0x27d   : > { %4215 = vset.pattern.permute.xlu1 %v6967_v16  ;;  %v620_v13 = vsel %vm588_vm3, 1, %v6967_v16  ;;  %vm1550_vm3 = vcmp.eq.s32.totalorder %v7076_v48, %v5160_v6 }
 0x27e   : > { %384 = vperm.xlu1 %4215, %v4408_v42   ;;  %v1612_v18 = vadd.s32 %v620_v13, %v460_v14  ;;  %v7073_v14 = vld [vmem:[#allocation9_spill] sm:$0xff] }
 0x27f   : > { %vm1389_vm13 = vcmp.eq.s32.totalorder %v7073_v14, %v5160_v6 }
 0x280   : > { %v850_v62 = vpop.permute.xlu1 %849 }
 0x281   : > { %vm908_vm1 = vcmp.eq.s32.totalorder %v850_v62, %v5160_v6 }
 0x282   : > { %4216 = vset.pattern.permute.xlu1 %v7052_v37  ;;  %v940_v17 = vsel %vm908_vm1, 1, %v6967_v16 }
 0x283   : > { %704 = vperm.xlu1 %4216, %v4408_v42   ;;  %v1644_v54 = vadd.s32 %v940_v17, %v780_v39 }
 0x285   : > { %v1010_v24 = vpop.permute.xlu1 %1009  ;;  %v1740_v56 = vadd.s32 %v1644_v54, %v1612_v18 }
 0x286   : > { %vm1068_vm4 = vcmp.eq.s32.totalorder %v1010_v24, %v5160_v6 }
 0x287   : > { %4217 = vset.pattern.permute.xlu1 %v6957_v57  ;;  %v1100_v53 = vsel %vm1068_vm4, 1, %v6967_v16 }
 0x288   : > { %864 = vperm.xlu1 %4217, %v4408_v42   ;;  %v1676_v15 = vadd.s32 %v1260_v20, %v1100_v53  ;;  %v941_v53 = vsel %vm909_vm8, 1, %v6967_v16 }
 0x28a   : > { %v1330_v31 = vpop.permute.xlu1 %1329 }
 0x28b   : > { %vm1388_vm6 = vcmp.eq.s32.totalorder %v1330_v31, %v5160_v6 }
 0x28c   : > { %4218 = vset.pattern.permute.xlu1 %v7056_v35  ;;  %v1420_v41 = vsel %vm1388_vm6, 1, %v6967_v16 }
 0x28d   : > { %1184 = vperm.xlu1 %4218, %v4408_v42  }
 0x28f   : > { %v1490_v52 = vpop.permute.xlu1 %1489 }
 0x290   : > { %vm1548_vm7 = vcmp.eq.s32.totalorder %v1490_v52, %v5160_v6 }
 0x291   : > { %v1580_v43 = vsel %vm1548_vm7, 1, %v6967_v16  ;;  %4219 = vset.pattern.permute.xlu1 %v6963_v50 }
 0x292   : > { %v1708_v12 = vadd.s32 %v1580_v43, %v1420_v41  ;;  %1344 = vperm.xlu1 %4219, %v4408_v42   ;;  %v461_v41 = vsel %vm429_vm10, 1, %v6967_v16 }
 0x294   : > { %v1772_v10 = vadd.s32 %v1708_v12, %v1676_v15  ;;  %v3628_v59 = vpop.f32.mrb[0].mxu0  ;;  %v5968_v25 = vpop.permute.xlu1 %532 }
 0x295   : > { %v1945_v8 = vadd.f32 %v3628_v59, %v5964_v0  ;;  %v1939_v33 = vpop.f32.mrb[1].mxu0  ;;  %vm589_vm11 = vcmp.eq.s32.totalorder %v5968_v25, %v5160_v6  ;;  %v1421_v59 = vsel %vm1389_vm13, 1, %v6967_v16 }
 0x296   : > { %4220 = vset.pattern.permute.xlu1 %v6967_v16  ;;  %v1804_v5 = vadd.s32 %v1772_v10, %v1740_v56  ;;  %v1940_v2 = vadd.f32 %v5964_v0, %v1939_v33  ;;  %v621_v43 = vsel %vm589_vm11, 1, %v6967_v16 }
 0x297   : > { %387 = vperm.xlu1 %4220, %v5974_v4   ;;  %v2099_v40 = vmax.f32 %v1945_v8, 0.0  ;;  %v1613_v38 = vadd.s32 %v621_v43, %v461_v41 }
 0x298   : > { %v3631_v1 = vpop.f32.mrb[2].mxu0  ;;  %v1836_v21 = vcvt.s32.f32 %v1804_v5  ;;  %v2098_v47 = vmax.f32 %v1940_v2, 0.0 }
 0x299   : > { %v1955_v36 = vadd.f32 %v3631_v1, %v5964_v0  ;;  %v1949_v26 = vpop.f32.mrb[3].mxu0  ;;  %v693_v29 = vpop.permute.xlu1 %692 }
 0x29a   : > { %v1950_v7 = vadd.f32 %v5964_v0, %v1949_v26  ;;  %3653 = vmatprep.mubr.f32.mxu0 %v1836_v21  ;;  %3706 = vmatprep.mubr.f32.mxu1 %v2098_v47  ;;  %vm749_vm9 = vcmp.eq.s32.totalorder %v693_v29, %v5160_v6 }
 0x29b   : > { %3707 = vmatmul.mubr.f32.vlgmr.msra.gmra.mrb[0].mxu1 %v2099_v40  ;;  %4221 = vset.pattern.permute.xlu1 %v6970_v55  ;;  %v2101_v27 = vmax.f32 %v1955_v36, 0.0  ;;  %v781_v52 = vsel %vm749_vm9, 1, %v6967_v16 }
 0x29c   : > { %v2100_v58 = vmax.f32 %v1950_v7, 0.0  ;;  %v3634_v3 = vpop.f32.mrb[4].mxu0  ;;  %547 = vperm.xlu1 %4221, %v5974_v4   ;;  %v1645_v56 = vadd.s32 %v941_v53, %v781_v52 }
 0x29d   : > { %v1965_v51 = vadd.f32 %v3634_v3, %v5964_v0  ;;  %v1959_v30 = vpop.f32.mrb[5].mxu0 }
 0x29e   : > { %v1960_v44 = vadd.f32 %v5964_v0, %v1959_v30  ;;  %3709 = vmatprep.mubr.f32.mxu1 %v2100_v58  ;;  %v1013_v32 = vpop.permute.xlu1 %1012  ;;  %v1741_v2 = vadd.s32 %v1645_v56, %v1613_v38 }
 0x29f   : > { %3710 = vmatmul.mubr.f32.gmra.mrb[2].mxu1 %v2101_v27  ;;  %v2103_v42 = vmax.f32 %v1965_v51, 0.0  ;;  %vm1069_vm14 = vcmp.eq.s32.totalorder %v1013_v32, %v5160_v6  ;;  %v4410_v51 = vld [vmem:[%s4587_s17 + $0xc8] sm:$0xff]  ;;  %v7075_v32 = vld [vmem:[#allocation37_spill] sm:$0xff] }
 0x2a0   : > { %v2102_v34 = vmax.f32 %v1960_v44, 0.0  ;;  %v3637_v45 = vpop.f32.mrb[6].mxu0  ;;  %4222 = vset.pattern.permute.xlu1 %v6957_v57  ;;  %v1101_v25 = vsel %vm1069_vm14, 1, %v6967_v16  ;;  %v7074_v44 = vld [vmem:[#allocation18_spill] sm:$0xff]  ;;  %vm1070_vm2 = vcmp.eq.s32.totalorder %v7075_v32, %v5160_v6  ;;  %v4412_v32 = vld [vmem:[%s4587_s17 + $0xd8] sm:$0xff] }
 0x2a1   : > { %v1975_v62 = vadd.f32 %v3637_v45, %v5964_v0  ;;  %v1969_v24 = vpop.f32.mrb[7].mxu0  ;;  %867 = vperm.xlu1 %4222, %v5974_v4   ;;  %vm590_vm1 = vcmp.eq.s32.totalorder %v7074_v44, %v5160_v6 }
 0x2a2   : > { %v1970_v49 = vadd.f32 %v5964_v0, %v1969_v24  ;;  %3712 = vmatprep.mubr.f32.mxu1 %v2102_v34  ;;  %v622_v45 = vsel %vm590_vm1, 1, %v6967_v16 }
 0x2a3   : > { %3713 = vmatmul.mubr.f32.gmra.mrb[4].mxu1 %v2103_v42  ;;  %v1173_v31 = vpop.permute.xlu1 %1172  ;;  %v2105_v17 = vmax.f32 %v1975_v62, 0.0  ;;  %v1102_v42 = vsel %vm1070_vm2, 1, %v6967_v16  ;;  %v1582_v62 = vsel %vm1550_vm3, 1, %v6967_v16  ;;  %vm432_vm2 = vcmp.eq.s32.totalorder %v5937_v61, %v5160_v6 }
 0x2a4   : > { %v2104_v11 = vmax.f32 %v1970_v49, 0.0  ;;  %v3640_v39 = vpop.f32.mrb[8].mxu0  ;;  %vm1229_vm12 = vcmp.eq.s32.totalorder %v1173_v31, %v5160_v6 }
 0x2a5   : > { %v1985_v20 = vadd.f32 %v3640_v39, %v5964_v0  ;;  %v1979_v13 = vpop.f32.mrb[9].mxu0  ;;  %4223 = vset.pattern.permute.xlu1 %v6975_v9  ;;  %v1261_v18 = vsel %vm1229_vm12, 1, %v6967_v16 }
 0x2a6   : > { %v1980_v54 = vadd.f32 %v5964_v0, %v1979_v13  ;;  %3715 = vmatprep.mubr.f32.mxu1 %v2104_v11  ;;  %1027 = vperm.xlu1 %4223, %v5974_v4   ;;  %v1677_v33 = vadd.s32 %v1261_v18, %v1101_v25  ;;  %v7078_v25 = vld [vmem:[#allocation21_spill] sm:$0xff] }
 0x2a7   : > { %3716 = vmatmul.mubr.f32.gmra.mrb[6].mxu1 %v2105_v17  ;;  %v2107_v10 = vmax.f32 %v1985_v20, 0.0  ;;  %vm1231_vm10 = vcmp.eq.s32.totalorder %v7078_v25, %v5160_v6 }
 0x2a8   : > { %v2106_v15 = vmax.f32 %v1980_v54, 0.0  ;;  %v1493_v12 = vpop.permute.xlu1 %1492 }
 0x2a9   : > { %vm1549_vm15 = vcmp.eq.s32.totalorder %v1493_v12, %v5160_v6 }
 0x2aa   : > { %v1581_v8 = vsel %vm1549_vm15, 1, %v6967_v16  ;;  %3718 = vmatprep.mubr.f32.mxu1 %v2106_v15  ;;  %4224 = vset.pattern.permute.xlu1 %v6963_v50  ;;  %v4411_v15 = vld [vmem:[%s4587_s17 + $0xd0] sm:$0xff] }
 0x2ab   : > { %v1709_v5 = vadd.s32 %v1581_v8, %v1421_v59  ;;  %3719 = vmatmul.mubr.f32.gmra.mrb[8].mxu1 %v2107_v10  ;;  %1347 = vperm.xlu1 %4224, %v5974_v4   ;;  %v7077_v10 = vld [vmem:[#allocation59_spill] sm:$0xff] }
 0x2ac   : > { %vm751_vm8 = vcmp.eq.s32.totalorder %v7077_v10, %v5160_v6 }
 0x2ad   : > { %v1773_v1 = vadd.s32 %v1709_v5, %v1677_v33  ;;  %v376_v21 = vpop.permute.xlu1 %375  ;;  %v783_v8 = vsel %vm751_vm8, 1, %v6967_v16  ;;  %v1263_v33 = vsel %vm1231_vm10, 1, %v6967_v16 }
 0x2ae   : > { %vm430_vm4 = vcmp.eq.s32.totalorder %v376_v21, %v5160_v6 }
 0x2af   : > { %v3643_v47 = vpop.f32.mrb[10].mxu0  ;;  %4225 = vset.pattern.permute.xlu1 %v6981_v28  ;;  %v1805_v40 = vadd.s32 %v1773_v1, %v1741_v2  ;;  %v462_v24 = vsel %vm430_vm4, 1, %v6967_v16 }
 0x2b0   : > { %v1995_v36 = vadd.f32 %v3643_v47, %v5964_v0  ;;  %v1989_v26 = vpop.f32.mrb[11].mxu0  ;;  %1507 = vperm.xlu1 %4225, %v5974_v4   ;;  %v1614_v20 = vadd.s32 %v622_v45, %v462_v24 }
 0x2b1   : > { %v1990_v29 = vadd.f32 %v5964_v0, %v1989_v26  ;;  %v1837_v7 = vcvt.s32.f32 %v1805_v40 }
 0x2b2   : > { %v696_v58 = vpop.permute.xlu1 %695  ;;  %v2109_v27 = vmax.f32 %v1995_v36, 0.0 }
 0x2b3   : > { %v2108_v3 = vmax.f32 %v1990_v29, 0.0  ;;  %3654 = vmatmul.mubr.f32.gmra.mrb[18].mxu0 %v1837_v7  ;;  %vm750_vm5 = vcmp.eq.s32.totalorder %v696_v58, %v5160_v6 }
 0x2b4   : > { %4226 = vset.pattern.permute.xlu1 %v6970_v55  ;;  %v782_v49 = vsel %vm750_vm5, 1, %v6967_v16 }
 0x2b5   : > { %3721 = vmatprep.mubr.f32.mxu1 %v2108_v3  ;;  %550 = vperm.xlu1 %4226, %v4410_v51  }
 0x2b6   : > { %3722 = vmatmul.mubr.f32.gmra.mrb[10].mxu1 %v2109_v27 }
 0x2b7   : > { %v856_v30 = vpop.permute.xlu1 %855 }
 0x2b8   : > { %vm910_vm0 = vcmp.eq.s32.totalorder %v856_v30, %v5160_v6 }
 0x2b9   : > { %4227 = vset.pattern.permute.xlu1 %v7052_v37  ;;  %v942_v34 = vsel %vm910_vm0, 1, %v6967_v16 }
 0x2ba   : > { %710 = vperm.xlu1 %4227, %v4410_v51   ;;  %v1646_v39 = vadd.s32 %v942_v34, %v782_v49  ;;  %v862_v49 = vpop.permute.xlu0 %861 }
 0x2bb   : > { %vm912_vm0 = vcmp.eq.s32.totalorder %v862_v49, %v5160_v6 }
 0x2bc   : > { %v1176_v4 = vpop.permute.xlu1 %1175  ;;  %v1742_v52 = vadd.s32 %v1646_v39, %v1614_v20  ;;  %v464_v20 = vsel %vm432_vm2, 1, %v6967_v16  ;;  %vm1234_vm2 = vcmp.eq.s32.totalorder %v5424_v19, %v5160_v6 }
 0x2bd   : > { %vm1230_vm6 = vcmp.eq.s32.totalorder %v1176_v4, %v5160_v6 }
 0x2be   : > { %4228 = vset.pattern.permute.xlu1 %v6975_v9  ;;  %v1262_v31 = vsel %vm1230_vm6, 1, %v6967_v16 }
 0x2bf   : > { %1030 = vperm.xlu1 %4228, %v4410_v51   ;;  %v1678_v13 = vadd.s32 %v1262_v31, %v1102_v42 }
 0x2c1   : > { %v1336_v11 = vpop.permute.xlu1 %1335 }
 0x2c2   : > { %vm1390_vm7 = vcmp.eq.s32.totalorder %v1336_v11, %v5160_v6  ;;  %v944_v11 = vsel %vm912_vm0, 1, %v6967_v16 }
 0x2c3   : > { %v1422_v17 = vsel %vm1390_vm7, 1, %v6967_v16  ;;  %4229 = vset.pattern.permute.xlu1 %v7056_v35 }
 0x2c4   : > { %v1710_v53 = vadd.s32 %v1582_v62, %v1422_v17  ;;  %1190 = vperm.xlu1 %4229, %v4410_v51   ;;  %v7079_v17 = vld [vmem:[#allocation10_spill] sm:$0xff] }
 0x2c5   : > { %vm1392_vm5 = vcmp.eq.s32.totalorder %v7079_v17, %v5160_v6 }
 0x2c6   : > { %v1774_v54 = vadd.s32 %v1710_v53, %v1678_v13  ;;  %v379_v14 = vpop.permute.xlu1 %378 }
 0x2c7   : > { %vm431_vm13 = vcmp.eq.s32.totalorder %v379_v14, %v5160_v6 }
 0x2c8   : > { %4230 = vset.pattern.permute.xlu1 %v6981_v28  ;;  %v1806_v41 = vadd.s32 %v1774_v54, %v1742_v52  ;;  %v463_v47 = vsel %vm431_vm13, 1, %v6967_v16  ;;  %v1424_v54 = vsel %vm1392_vm5, 1, %v6967_v16 }
 0x2c9   : > { %1510 = vperm.xlu1 %4230, %v4410_v51  }
 0x2ca   : > { %v1838_v43 = vcvt.s32.f32 %v1806_v41 }
 0x2cb   : > { %v539_v18 = vpop.permute.xlu1 %538 }
 0x2cc   : > { %3656 = vmatprep.mubr.f32.mxu0 %v1838_v43  ;;  %vm591_vm11 = vcmp.eq.s32.totalorder %v539_v18, %v5160_v6 }
 0x2cd   : > { %4231 = vset.pattern.permute.xlu1 %v6967_v16  ;;  %v623_v5 = vsel %vm591_vm11, 1, %v6967_v16 }
 0x2ce   : > { %393 = vperm.xlu1 %4231, %v4411_v15   ;;  %v1615_v26 = vadd.s32 %v623_v5, %v463_v47  ;;  %v7082_v47 = vld [vmem:[#allocation38_spill] sm:$0xff] }
 0x2d0   : > { %v859_v12 = vpop.permute.xlu1 %858 }
 0x2d1   : > { %vm911_vm9 = vcmp.eq.s32.totalorder %v859_v12, %v5160_v6 }
 0x2d2   : > { %4232 = vset.pattern.permute.xlu1 %v7052_v37  ;;  %v943_v38 = vsel %vm911_vm9, 1, %v6967_v16 }
 0x2d3   : > { %713 = vperm.xlu1 %4232, %v4411_v15   ;;  %v1647_v21 = vadd.s32 %v943_v38, %v783_v8  ;;  %v4413_v38 = vld [vmem:[%s4587_s17 + $0xe0] sm:$0xff] }
 0x2d5   : > { %v1019_v56 = vpop.permute.xlu1 %1018  ;;  %v1743_v58 = vadd.s32 %v1647_v21, %v1615_v26  ;;  %v7081_v21 = vld [vmem:[#allocation20_spill] sm:$0xff] }
 0x2d6   : > { %vm1071_vm12 = vcmp.eq.s32.totalorder %v1019_v56, %v5160_v6  ;;  %vm593_vm13 = vcmp.eq.s32.totalorder %v7081_v21, %v5160_v6 }
 0x2d7   : > { %4233 = vset.pattern.permute.xlu1 %v6957_v57  ;;  %v1103_v2 = vsel %vm1071_vm12, 1, %v6967_v16 }
 0x2d8   : > { %873 = vperm.xlu1 %4233, %v4411_v15   ;;  %v1679_v29 = vadd.s32 %v1263_v33, %v1103_v2  ;;  %v7080_v2 = vld [vmem:[#allocation47_spill] sm:$0xff] }
 0x2d9   : > { %vm1553_vm9 = vcmp.eq.s32.totalorder %v7080_v2, %v5160_v6 }
 0x2da   : > { %v1339_v59 = vpop.permute.xlu1 %1338 }
 0x2db   : > { %vm1391_vm14 = vcmp.eq.s32.totalorder %v1339_v59, %v5160_v6 }
 0x2dc   : > { %4234 = vset.pattern.permute.xlu1 %v7056_v35  ;;  %v1423_v40 = vsel %vm1391_vm14, 1, %v6967_v16  ;;  %vm1073_vm14 = vcmp.eq.s32.totalorder %v7082_v47, %v5160_v6 }
 0x2dd   : > { %1193 = vperm.xlu1 %4234, %v4411_v15  }
 0x2df   : > { %v1499_v1 = vpop.permute.xlu1 %1498 }
 0x2e0   : > { %vm1551_vm15 = vcmp.eq.s32.totalorder %v1499_v1, %v5160_v6 }
 0x2e1   : > { %v1583_v36 = vsel %vm1551_vm15, 1, %v6967_v16  ;;  %4235 = vset.pattern.permute.xlu1 %v6963_v50 }
 0x2e2   : > { %v1711_v7 = vadd.s32 %v1583_v36, %v1423_v40  ;;  %1353 = vperm.xlu1 %4235, %v4411_v15   ;;  %v1585_v40 = vsel %vm1553_vm9, 1, %v6967_v16 }
 0x2e4   : > { %v1775_v3 = vadd.s32 %v1711_v7, %v1679_v29  ;;  %v542_v27 = vpop.permute.xlu1 %541 }
 0x2e5   : > { %vm592_vm3 = vcmp.eq.s32.totalorder %v542_v27, %v5160_v6  ;;  %v1105_v27 = vsel %vm1073_vm14, 1, %v6967_v16 }
 0x2e6   : > { %v3646_v51 = vpop.f32.mrb[12].mxu0  ;;  %4236 = vset.pattern.permute.xlu1 %v6967_v16  ;;  %v1807_v30 = vadd.s32 %v1775_v3, %v1743_v58  ;;  %v624_v61 = vsel %vm592_vm3, 1, %v6967_v16  ;;  %v625_v3 = vsel %vm593_vm13, 1, %v6967_v16 }
 0x2e7   : > { %v2005_v4 = vadd.f32 %v3646_v51, %v5964_v0  ;;  %v1999_v44 = vpop.f32.mrb[13].mxu0  ;;  %396 = vperm.xlu1 %4236, %v4412_v32   ;;  %v1616_v43 = vadd.s32 %v624_v61, %v464_v20 }
 0x2e8   : > { %v2000_v48 = vadd.f32 %v5964_v0, %v1999_v44  ;;  %v1839_v34 = vcvt.s32.f32 %v1807_v30 }
 0x2e9   : > { %v702_v45 = vpop.permute.xlu1 %701  ;;  %v2111_v62 = vmax.f32 %v2005_v4, 0.0 }
 0x2ea   : > { %v2110_v42 = vmax.f32 %v2000_v48, 0.0  ;;  %3657 = vmatmul.mubr.f32.gmra.mrb[20].mxu0 %v1839_v34  ;;  %vm752_vm1 = vcmp.eq.s32.totalorder %v702_v45, %v5160_v6 }
 0x2eb   : > { %4237 = vset.pattern.permute.xlu1 %v6970_v55  ;;  %v784_v39 = vsel %vm752_vm1, 1, %v6967_v16 }
 0x2ec   : > { %3724 = vmatprep.mubr.f32.mxu1 %v2110_v42  ;;  %556 = vperm.xlu1 %4237, %v4412_v32   ;;  %v1648_v52 = vadd.s32 %v944_v11, %v784_v39  ;;  %v4414_v11 = vld [vmem:[%s4587_s17 + $0xe8] sm:$0xff] }
 0x2ed   : > { %3725 = vmatmul.mubr.f32.gmra.mrb[12].mxu1 %v2111_v62 }
 0x2ee   : > { %v1022_v24 = vpop.permute.xlu1 %1021  ;;  %v1744_v12 = vadd.s32 %v1648_v52, %v1616_v43 }
 0x2ef   : > { %vm1072_vm6 = vcmp.eq.s32.totalorder %v1022_v24, %v5160_v6 }
 0x2f0   : > { %4238 = vset.pattern.permute.xlu1 %v6957_v57  ;;  %v1104_v14 = vsel %vm1072_vm6, 1, %v6967_v16 }
 0x2f1   : > { %876 = vperm.xlu1 %4238, %v4412_v32  }
 0x2f3   : > { %v1182_v31 = vpop.permute.xlu1 %1181 }
 0x2f4   : > { %vm1232_vm4 = vcmp.eq.s32.totalorder %v1182_v31, %v5160_v6 }
 0x2f5   : > { %4239 = vset.pattern.permute.xlu1 %v6975_v9  ;;  %v1264_v13 = vsel %vm1232_vm4, 1, %v6967_v16 }
 0x2f6   : > { %1036 = vperm.xlu1 %4239, %v4412_v32   ;;  %v1680_v18 = vadd.s32 %v1264_v13, %v1104_v14 }
 0x2f8   : > { %v1502_v53 = vpop.permute.xlu1 %1501 }
 0x2f9   : > { %vm1552_vm7 = vcmp.eq.s32.totalorder %v1502_v53, %v5160_v6  ;;  %v7083_v53 = vld [vmem:[#allocation61_spill] sm:$0xff] }
 0x2fa   : > { %v1584_v41 = vsel %vm1552_vm7, 1, %v6967_v16  ;;  %4240 = vset.pattern.permute.xlu1 %v6963_v50  ;;  %vm754_vm0 = vcmp.eq.s32.totalorder %v7083_v53, %v5160_v6  ;;  %v3378_v53 = vld [vmem:[%s6906_s3 + $0x88] sm:$0xff] }
 0x2fb   : > { %v1712_v15 = vadd.s32 %v1584_v41, %v1424_v54  ;;  %1356 = vperm.xlu1 %4240, %v4412_v32   ;;  %v786_v54 = vsel %vm754_vm0, 1, %v6967_v16  ;;  %v1266_v41 = vsel %vm1234_vm2, 1, %v6967_v16 }
 0x2fd   : > { %v1776_v56 = vadd.s32 %v1712_v15, %v1680_v18  ;;  %v385_v10 = vpop.permute.xlu1 %384 }
 0x2fe   : > { %vm433_vm10 = vcmp.eq.s32.totalorder %v385_v10, %v5160_v6 }
 0x2ff   : > { %4241 = vset.pattern.permute.xlu1 %v6981_v28  ;;  %v1808_v59 = vadd.s32 %v1776_v56, %v1744_v12  ;;  %v465_v36 = vsel %vm433_vm10, 1, %v6967_v16  ;;  %vm435_vm10 = vcmp.eq.s32.totalorder %v5949_v60, %v5160_v6 }
 0x300   : > { %1516 = vperm.xlu1 %4241, %v4412_v32   ;;  %v1617_v30 = vadd.s32 %v625_v3, %v465_v36  ;;  %v871_v36 = vpop.permute.xlu0 %870 }
 0x301   : > { %v1840_v25 = vcvt.s32.f32 %v1808_v59 }
 0x302   : > { %v705_v8 = vpop.permute.xlu1 %704 }
 0x303   : > { %3659 = vmatprep.mubr.f32.mxu0 %v1840_v25  ;;  %vm753_vm11 = vcmp.eq.s32.totalorder %v705_v8, %v5160_v6 }
 0x304   : > { %4242 = vset.pattern.permute.xlu1 %v6970_v55  ;;  %v785_v26 = vsel %vm753_vm11, 1, %v6967_v16 }
 0x305   : > { %559 = vperm.xlu1 %4242, %v4413_v38  }
 0x307   : > { %v865_v33 = vpop.permute.xlu1 %864 }
 0x308   : > { %vm913_vm8 = vcmp.eq.s32.totalorder %v865_v33, %v5160_v6 }
 0x309   : > { %4243 = vset.pattern.permute.xlu1 %v7052_v37  ;;  %v945_v1 = vsel %vm913_vm8, 1, %v6967_v16  ;;  %vm915_vm8 = vcmp.eq.s32.totalorder %v871_v36, %v5160_v6 }
 0x30a   : > { %719 = vperm.xlu1 %4243, %v4413_v38   ;;  %v1649_v58 = vadd.s32 %v945_v1, %v785_v26  ;;  %v4415_v1 = vld [vmem:[%s4587_s17 + $0xf0] sm:$0xff] }
 0x30c   : > { %v1185_v5 = vpop.permute.xlu1 %1184  ;;  %v1745_v32 = vadd.s32 %v1649_v58, %v1617_v30  ;;  %v467_v58 = vsel %vm435_vm10, 1, %v6967_v16 }
 0x30d   : > { %vm1233_vm12 = vcmp.eq.s32.totalorder %v1185_v5, %v5160_v6 }
 0x30e   : > { %4244 = vset.pattern.permute.xlu1 %v6975_v9  ;;  %v1265_v29 = vsel %vm1233_vm12, 1, %v6967_v16 }
 0x30f   : > { %1039 = vperm.xlu1 %4244, %v4413_v38   ;;  %v1681_v4 = vadd.s32 %v1265_v29, %v1105_v27  ;;  %v947_v29 = vsel %vm915_vm8, 1, %v6967_v16 }
 0x311   : > { %v1345_v7 = vpop.permute.xlu1 %1344 }
 0x312   : > { %vm1393_vm15 = vcmp.eq.s32.totalorder %v1345_v7, %v5160_v6 }
 0x313   : > { %v1425_v51 = vsel %vm1393_vm15, 1, %v6967_v16  ;;  %4245 = vset.pattern.permute.xlu1 %v7056_v35 }
 0x314   : > { %v1713_v44 = vadd.s32 %v1585_v40, %v1425_v51  ;;  %1199 = vperm.xlu1 %4245, %v4413_v38  }
 0x316   : > { %v1777_v48 = vadd.s32 %v1713_v44, %v1681_v4  ;;  %v388_v34 = vpop.permute.xlu1 %387 }
 0x317   : > { %vm434_vm5 = vcmp.eq.s32.totalorder %v388_v34, %v5160_v6 }
 0x318   : > { %4247 = vset.pattern.permute.xlu1 %v6981_v28  ;;  %v1809_v45 = vadd.s32 %v1777_v48, %v1745_v32  ;;  %v466_v12 = vsel %vm434_vm5, 1, %v6967_v16 }
 0x319   : > { %1519 = vperm.xlu1 %4247, %v4413_v38  }
 0x31a   : > { %v1841_v42 = vcvt.s32.f32 %v1809_v45 }
 0x31b   : > { %v548_v62 = vpop.permute.xlu1 %547 }
 0x31c   : > { %3660 = vmatmul.mubr.f32.gmra.mrb[22].mxu0 %v1841_v42  ;;  %vm594_vm3 = vcmp.eq.s32.totalorder %v548_v62, %v5160_v6 }
 0x31d   : > { %v3649_v24 = vpop.f32.mrb[14].mxu0  ;;  %4248 = vset.pattern.permute.xlu1 %v6967_v16  ;;  %v626_v43 = vsel %vm594_vm3, 1, %v6967_v16 }
 0x31e   : > { %v2015_v49 = vadd.f32 %v3649_v24, %v5964_v0  ;;  %v2009_v31 = vpop.f32.mrb[15].mxu0  ;;  %402 = vperm.xlu1 %4248, %v4414_v11   ;;  %v1618_v59 = vadd.s32 %v626_v43, %v466_v12 }
 0x31f   : > { %v2010_v39 = vadd.f32 %v5964_v0, %v2009_v31 }
 0x320   : > { %v868_v17 = vpop.permute.xlu1 %867  ;;  %v2113_v61 = vmax.f32 %v2015_v49, 0.0 }
 0x321   : > { %v2112_v20 = vmax.f32 %v2010_v39, 0.0  ;;  %vm914_vm1 = vcmp.eq.s32.totalorder %v868_v17, %v5160_v6 }
 0x322   : > { %4250 = vset.pattern.permute.xlu1 %v7052_v37  ;;  %v946_v14 = vsel %vm914_vm1, 1, %v6967_v16 }
 0x323   : > { %3727 = vmatprep.mubr.f32.mxu1 %v2112_v20  ;;  %722 = vperm.xlu1 %4250, %v4414_v11   ;;  %v1650_v15 = vadd.s32 %v946_v14, %v786_v54 }
 0x324   : > { %3728 = vmatmul.mubr.f32.gmra.mrb[14].mxu1 %v2113_v61 }
 0x325   : > { %v1028_v13 = vpop.permute.xlu1 %1027  ;;  %v1746_v38 = vadd.s32 %v1650_v15, %v1618_v59  ;;  %v3382_v15 = vld [vmem:[%s6906_s3 + $0xa8] sm:$0xff]  ;;  %v7087_v59 = vld [vmem:[#allocation48_spill] sm:$0xff] }
 0x326   : > { %vm1074_vm4 = vcmp.eq.s32.totalorder %v1028_v13, %v5160_v6  ;;  %v3377_v13 = vld [vmem:[%s6906_s3 + $0x80] sm:$0xff] }
 0x327   : > { %4251 = vset.pattern.permute.xlu1 %v6957_v57  ;;  %v1106_v19 = vsel %vm1074_vm4, 1, %v6967_v16  ;;  %v3978_v54 = vpack.c.bf16 %v3378_v53, %v3377_v13 }
 0x328   : > { %882 = vperm.xlu1 %4251, %v4414_v11   ;;  %v1682_v25 = vadd.s32 %v1266_v41, %v1106_v19  ;;  %v3380_v41 = vld [vmem:[%s6906_s3 + $0x98] sm:$0xff] }
 0x329   : > { %3979 = vmatprep.subr.bf16.mxu0 %v3978_v54 }
 0x32a   : > { %v1348_v52 = vpop.permute.xlu1 %1347  ;;  %3981 = vmatpush3.bf16.msra.mxu0 %v3978_v54  ;;  %v7088_v54 = vld [vmem:[#allocation63_spill] sm:$0xff] }
 0x32b   : > { %vm1394_vm6 = vcmp.eq.s32.totalorder %v1348_v52, %v5160_v6  ;;  %v4416_v52 = vld [vmem:[%s4587_s17 + $0xf8] sm:$0xff] }
 0x32c   : > { %4253 = vset.pattern.permute.xlu1 %v7056_v35  ;;  %v1426_v56 = vsel %vm1394_vm6, 1, %v6967_v16  ;;  %vm1556_vm6 = vcmp.eq.s32.totalorder %v7087_v59, %v5160_v6 }
 0x32d   : > { %1202 = vperm.xlu1 %4253, %v4414_v11  }
 0x32f   : > { %v1508_v18 = vpop.permute.xlu1 %1507 }
 0x330   : > { %vm1554_vm7 = vcmp.eq.s32.totalorder %v1508_v18, %v5160_v6  ;;  %v3381_v18 = vld [vmem:[%s6906_s3 + $0xa0] sm:$0xff] }
 0x331   : > { %v1586_v10 = vsel %vm1554_vm7, 1, %v6967_v16  ;;  %4254 = vset.pattern.permute.xlu1 %v6963_v50  ;;  %v3986_v12 = vpack.c.bf16 %v3382_v15, %v3381_v18 }
 0x332   : > { %v1714_v8 = vadd.s32 %v1586_v10, %v1426_v56  ;;  %1362 = vperm.xlu1 %4254, %v4414_v11   ;;  %v7085_v56 = vld [vmem:[#allocation22_spill] sm:$0xff]  ;;  %v7086_v10 = vld [vmem:[#allocation39_spill] sm:$0xff] }
 0x333   : > { %vm596_vm4 = vcmp.eq.s32.totalorder %v7085_v56, %v5160_v6  ;;  %vm1076_vm5 = vcmp.eq.s32.totalorder %v7086_v10, %v5160_v6 }
 0x334   : > { %v1778_v33 = vadd.s32 %v1714_v8, %v1682_v25  ;;  %v551_v5 = vpop.permute.xlu1 %550  ;;  %v3383_v25 = vld [vmem:[%s6906_s3 + $0xb0] sm:$0xff] }
 0x335   : > { %vm595_vm11 = vcmp.eq.s32.totalorder %v551_v5, %v5160_v6 }
 0x336   : > { %4256 = vset.pattern.permute.xlu1 %v6967_v16  ;;  %v1810_v2 = vadd.s32 %v1778_v33, %v1746_v38  ;;  %v627_v60 = vsel %vm595_vm11, 1, %v6967_v16 }
 0x337   : > { %405 = vperm.xlu1 %4256, %v4415_v1   ;;  %v1619_v32 = vadd.s32 %v627_v60, %v467_v58  ;;  %v3386_v58 = vld [vmem:[%s6906_s3 + $0xc8] sm:$0xff] }
 0x338   : > { %v1842_v21 = vcvt.s32.f32 %v1810_v2 }
 0x339   : > { %v711_v47 = vpop.permute.xlu1 %710 }
 0x33a   : > { %3662 = vmatprep.mubr.f32.mxu0 %v1842_v21  ;;  %vm755_vm9 = vcmp.eq.s32.totalorder %v711_v47, %v5160_v6  ;;  %v628_v21 = vsel %vm596_vm4, 1, %v6967_v16  ;;  %v1108_v47 = vsel %vm1076_vm5, 1, %v6967_v16 }
 0x33b   : > { %4257 = vset.pattern.permute.xlu1 %v6970_v55  ;;  %v787_v7 = vsel %vm755_vm9, 1, %v6967_v16  ;;  %vm757_vm9 = vcmp.eq.s32.totalorder %v7088_v54, %v5160_v6 }
 0x33c   : > { %565 = vperm.xlu1 %4257, %v4415_v1   ;;  %v1651_v51 = vadd.s32 %v947_v29, %v787_v7 }
 0x33e   : > { %v1031_v40 = vpop.permute.xlu1 %1030  ;;  %v1747_v45 = vadd.s32 %v1651_v51, %v1619_v32 }
 0x33f   : > { %vm1075_vm14 = vcmp.eq.s32.totalorder %v1031_v40, %v5160_v6  ;;  %v1588_v40 = vsel %vm1556_vm6, 1, %v6967_v16 }
 0x340   : > { %4259 = vset.pattern.permute.xlu1 %v6957_v57  ;;  %v7084_v57 = vld [vmem:[#allocation11_spill] sm:$0xff]  ;;  %v1107_v4 = vsel %vm1075_vm14, 1, %v6967_v16 }
 0x341   : > { %885 = vperm.xlu1 %4259, %v4415_v1   ;;  %vm1395_vm13 = vcmp.eq.s32.totalorder %v7084_v57, %v5160_v6  ;;  %v3385_v57 = vld [vmem:[%s6906_s3 + $0xc0] sm:$0xff] }
 0x342   : > { %v1427_v30 = vsel %vm1395_vm13, 1, %v6967_v16  ;;  %v3994_v60 = vpack.c.bf16 %v3386_v58, %v3385_v57 }
 0x343   : > { %v1191_v26 = vpop.permute.xlu1 %1190 }
 0x344   : > { %vm1235_vm12 = vcmp.eq.s32.totalorder %v1191_v26, %v5160_v6 }
 0x345   : > { %4260 = vset.pattern.permute.xlu1 %v6975_v9  ;;  %v1267_v3 = vsel %vm1235_vm12, 1, %v6967_v16  ;;  %vm1237_vm12 = vcmp.eq.s32.totalorder %v5463_v23, %v5160_v6 }
 0x346   : > { %1045 = vperm.xlu1 %4260, %v4415_v1   ;;  %v1683_v48 = vadd.s32 %v1267_v3, %v1107_v4  ;;  %v3388_v4 = vld [vmem:[%s6906_s3 + $0xd8] sm:$0xff]  ;;  %v1269_v23 = vsel %vm1237_vm12, 1, %v6967_v16 }
 0x348   : > { %v1511_v27 = vpop.permute.xlu1 %1510 }
 0x349   : > { %vm1555_vm15 = vcmp.eq.s32.totalorder %v1511_v27, %v5160_v6 }
 0x34a   : > { %v1587_v44 = vsel %vm1555_vm15, 1, %v6967_v16  ;;  %4262 = vset.pattern.permute.xlu1 %v6963_v50 }
 0x34b   : > { %v1715_v34 = vadd.s32 %v1587_v44, %v1427_v30  ;;  %1365 = vperm.xlu1 %4262, %v4415_v1   ;;  %v3387_v30 = vld [vmem:[%s6906_s3 + $0xd0] sm:$0xff] }
 0x34c   : > { %v3998_v44 = vpack.c.bf16 %v3388_v4, %v3387_v30 }
 0x34d   : > { %v1779_v42 = vadd.s32 %v1715_v34, %v1683_v48  ;;  %v394_v62 = vpop.permute.xlu1 %393  ;;  %v3390_v34 = vld [vmem:[%s6906_s3 + $0xe8] sm:$0xff] }
 0x34e   : > { %vm436_vm1 = vcmp.eq.s32.totalorder %v394_v62, %v5160_v6 }
 0x34f   : > { %v3652_v24 = vpop.f32.mrb[16].mxu0  ;;  %4263 = vset.pattern.permute.xlu1 %v6981_v28  ;;  %v1811_v49 = vadd.s32 %v1779_v42, %v1747_v45  ;;  %v468_v8 = vsel %vm436_vm1, 1, %v6967_v16 }
 0x350   : > { %v2025_v31 = vadd.f32 %v3652_v24, %v5964_v0  ;;  %v2019_v11 = vpop.f32.mrb[17].mxu0  ;;  %1525 = vperm.xlu1 %4263, %v4415_v1   ;;  %v1620_v26 = vadd.s32 %v628_v21, %v468_v8 }
 0x351   : > { %v2020_v39 = vadd.f32 %v5964_v0, %v2019_v11  ;;  %v1843_v17 = vcvt.s32.f32 %v1811_v49  ;;  %v3391_v49 = vld [vmem:[%s6906_s3 + $0xf0] sm:$0xff] }
 0x352   : > { %v714_v50 = vpop.permute.xlu1 %713  ;;  %v2115_v61 = vmax.f32 %v2025_v31, 0.0  ;;  %v3392_v31 = vld [vmem:[%s6906_s3 + $0xf8] sm:$0xff] }
 0x353   : > { %v2114_v20 = vmax.f32 %v2020_v39, 0.0  ;;  %3663 = vmatmul.mubr.f32.gmra.mrb[24].mxu0 %v1843_v17  ;;  %vm756_vm2 = vcmp.eq.s32.totalorder %v714_v50, %v5160_v6  ;;  %v4006_v11 = vpack.c.bf16 %v3392_v31, %v3391_v49 }
 0x354   : > { %4265 = vset.pattern.permute.xlu1 %v6970_v55  ;;  %v3379_v55 = vld [vmem:[%s6906_s3 + $0x90] sm:$0xff]  ;;  %v788_v38 = vsel %vm756_vm2, 1, %v6967_v16  ;;  %vm438_vm2 = vcmp.eq.s32.totalorder %v5966_v22, %v5160_v6 }
 0x355   : > { %3730 = vmatprep.mubr.f32.mxu1 %v2114_v20  ;;  %568 = vperm.xlu1 %4265, %v4416_v52   ;;  %v3982_v43 = vpack.c.bf16 %v3380_v41, %v3379_v55  ;;  %v789_v41 = vsel %vm757_vm9, 1, %v6967_v16 }
 0x356   : > { %3731 = vmatmul.mubr.f32.gmra.mrb[16].mxu1 %v2115_v61 }
 0x357   : > { %v874_v14 = vpop.permute.xlu1 %873  ;;  %3983 = vmatprep.subr.bf16.mxu0 %v3982_v43 }
 0x358   : > { %vm916_vm0 = vcmp.eq.s32.totalorder %v874_v14, %v5160_v6  ;;  %3985 = vmatpush3.bf16.msra.mxu0 %v3982_v43 }
 0x359   : > { %4266 = vset.pattern.permute.xlu1 %v7052_v37  ;;  %v948_v37 = vsel %vm916_vm0, 1, %v6967_v16  ;;  %3987 = vmatprep.subr.bf16.mxu0 %v3986_v12 }
 0x35a   : > { %728 = vperm.xlu1 %4266, %v4416_v52   ;;  %v1652_v1 = vadd.s32 %v948_v37, %v788_v38 }
 0x35c   : > { %v1194_v19 = vpop.permute.xlu1 %1193  ;;  %3989 = vmatpush3.bf16.msra.mxu0 %v3986_v12  ;;  %v1748_v3 = vadd.s32 %v1652_v1, %v1620_v26 }
 0x35d   : > { %vm1236_vm3 = vcmp.eq.s32.totalorder %v1194_v19, %v5160_v6 }
 0x35e   : > { %4267 = vset.pattern.permute.xlu1 %v6975_v9  ;;  %v3384_v9 = vld [vmem:[%s6906_s3 + $0xb8] sm:$0xff]  ;;  %v1268_v33 = vsel %vm1236_vm3, 1, %v6967_v16 }
 0x35f   : > { %1048 = vperm.xlu1 %4267, %v4416_v52   ;;  %v3990_v2 = vpack.c.bf16 %v3384_v9, %v3383_v25  ;;  %v1684_v29 = vadd.s32 %v1268_v33, %v1108_v47 }
 0x361   : > { %v1354_v5 = vpop.permute.xlu1 %1353  ;;  %3991 = vmatprep.subr.bf16.mxu0 %v3990_v2 }
 0x362   : > { %vm1396_vm7 = vcmp.eq.s32.totalorder %v1354_v5, %v5160_v6  ;;  %3993 = vmatpush3.bf16.msra.mxu0 %v3990_v2 }
 0x363   : > { %v1428_v36 = vsel %vm1396_vm7, 1, %v6967_v16  ;;  %4268 = vset.pattern.permute.xlu1 %v7056_v35  ;;  %3995 = vmatprep.subr.bf16.mxu0 %v3994_v60 }
 0x364   : > { %v1716_v7 = vadd.s32 %v1588_v40, %v1428_v36  ;;  %1208 = vperm.xlu1 %4268, %v4416_v52  }
 0x366   : > { %v1780_v27 = vadd.s32 %v1716_v7, %v1684_v29  ;;  %v397_v51 = vpop.permute.xlu1 %396  ;;  %3997 = vmatpush3.bf16.msra.mxu0 %v3994_v60  ;;  %v880_v60 = vpop.permute.xlu0 %879 }
 0x367   : > { %3999 = vmatprep.subr.bf16.mxu0 %v3998_v44  ;;  %vm437_vm13 = vcmp.eq.s32.totalorder %v397_v51, %v5160_v6  ;;  %vm918_vm0 = vcmp.eq.s32.totalorder %v880_v60, %v5160_v6  ;;  %v7089_v51 = vld [vmem:[#allocation12_spill] sm:$0xff] }
 0x368   : > { %4270 = vset.pattern.permute.xlu1 %v6981_v28  ;;  %v1812_v35 = vadd.s32 %v1780_v27, %v1748_v3  ;;  %v3389_v28 = vld [vmem:[%s6906_s3 + $0xe0] sm:$0xff]  ;;  %v469_v37 = vsel %vm437_vm13, 1, %v6967_v16  ;;  %vm1398_vm5 = vcmp.eq.s32.totalorder %v7089_v51, %v5160_v6 }
 0x369   : > { %1528 = vperm.xlu1 %4270, %v4416_v52   ;;  %v4002_v45 = vpack.c.bf16 %v3390_v34, %v3389_v28 }
 0x36a   : > { %v1844_v32 = vcvt.s32.f32 %v1812_v35  ;;  %4001 = vmatpush3.bf16.msra.mxu0 %v3998_v44  ;;  %v470_v35 = vsel %vm438_vm2, 1, %v6967_v16 }
 0x36b   : > { %v557_v48 = vpop.permute.xlu1 %556  ;;  %4003 = vmatprep.subr.bf16.mxu0 %v4002_v45 }
 0x36c   : > { %3665 = vmatprep.mubr.f32.mxu0 %v1844_v32  ;;  %vm597_vm10 = vcmp.eq.s32.totalorder %v557_v48, %v5160_v6  ;;  %v1430_v32 = vsel %vm1398_vm5, 1, %v6967_v16 }
 0x36d   : > { %v629_v43 = vsel %vm597_vm10, 1, %v6967_v16 }
 0x36e   : > { %v6242_v42 = vpop.f32.mrb[0].mxu1  ;;  %4005 = vmatpush3.bf16.msra.mxu0 %v4002_v45  ;;  %v1621_v59 = vadd.s32 %v629_v43, %v469_v37 }
 0x36f   : > { %v6244_v62 = vpop.f32.mrb[1].mxu1  ;;  %4007 = vmatprep.subr.bf16.mxu0 %v4006_v11 }
 0x370   : > { %v877_v24 = vpop.permute.xlu1 %876 }
 0x371   : > { %vm917_vm8 = vcmp.eq.s32.totalorder %v877_v24, %v5160_v6 }
 0x372   : > { %v6252_v39 = vpop.f32.mrb[2].mxu1  ;;  %4009 = vmatpush3.bf16.msra.mxu0 %v4006_v11  ;;  %v949_v14 = vsel %vm917_vm8, 1, %v6967_v16 }
 0x373   : > { %v6254_v17 = vpop.f32.mrb[3].mxu1  ;;  %v1653_v12 = vadd.s32 %v949_v14, %v789_v41 }
 0x375   : > { %v1037_v50 = vpop.permute.xlu1 %1036  ;;  %v1749_v8 = vadd.s32 %v1653_v12, %v1621_v59  ;;  %v7092_v12 = vld [vmem:[#allocation50_spill] sm:$0xff] }
 0x376   : > { %v6256_v20 = vpop.f32.mrb[4].mxu1  ;;  %vm1077_vm11 = vcmp.eq.s32.totalorder %v1037_v50, %v5160_v6 }
 0x377   : > { %v6258_v61 = vpop.f32.mrb[5].mxu1  ;;  %v1109_v19 = vsel %vm1077_vm11, 1, %v6967_v16 }
 0x378   : > { %v1685_v25 = vadd.s32 %v1269_v23, %v1109_v19  ;;  %v7090_v19 = vld [vmem:[#allocation24_spill] sm:$0xff] }
 0x379   : > { %vm599_vm12 = vcmp.eq.s32.totalorder %v7090_v19, %v5160_v6 }
 0x37a   : > { %v6261_v13 = vpop.f32.mrb[6].mxu1  ;;  %v1357_v53 = vpop.permute.xlu1 %1356 }
 0x37b   : > { %v6263_v52 = vpop.f32.mrb[7].mxu1  ;;  %vm1397_vm14 = vcmp.eq.s32.totalorder %v1357_v53, %v5160_v6 }
 0x37c   : > { %v1429_v56 = vsel %vm1397_vm14, 1, %v6967_v16  ;;  %vm1559_vm14 = vcmp.eq.s32.totalorder %v7092_v12, %v5160_v6 }
 0x37e   : > { %v6274_v55 = vpop.f32.mrb[8].mxu1 }
 0x37f   : > { %v6279_v18 = vpop.f32.mrb[9].mxu1  ;;  %v1517_v15 = vpop.permute.xlu1 %1516 }
 0x380   : > { %vm1557_vm15 = vcmp.eq.s32.totalorder %v1517_v15, %v5160_v6  ;;  %v7091_v15 = vld [vmem:[#allocation40_spill] sm:$0xff] }
 0x381   : > { %v1589_v10 = vsel %vm1557_vm15, 1, %v6967_v16  ;;  %vm1079_vm13 = vcmp.eq.s32.totalorder %v7091_v15, %v5160_v6 }
 0x382   : > { %v1717_v9 = vadd.s32 %v1589_v10, %v1429_v56 }
 0x384   : > { %v1781_v38 = vadd.s32 %v1717_v9, %v1685_v25  ;;  %v560_v33 = vpop.permute.xlu1 %559  ;;  %v631_v25 = vsel %vm599_vm12, 1, %v6967_v16  ;;  %v1111_v9 = vsel %vm1079_vm13, 1, %v6967_v16  ;;  %vm441_vm13 = vcmp.eq.s32.totalorder %v5978_v46, %v5160_v6 }
 0x385   : > { %vm598_vm3 = vcmp.eq.s32.totalorder %v560_v33, %v5160_v6 }
 0x386   : > { %v3655_v5 = vpop.f32.mrb[18].mxu0  ;;  %v1813_v2 = vadd.s32 %v1781_v38, %v1749_v8  ;;  %v630_v30 = vsel %vm598_vm3, 1, %v6967_v16  ;;  %v1591_v8 = vsel %vm1559_vm14, 1, %v6967_v16 }
 0x387   : > { %v2035_v1 = vadd.f32 %v3655_v5, %v5964_v0  ;;  %v2029_v21 = vpop.f32.mrb[19].mxu0  ;;  %v1622_v34 = vadd.s32 %v630_v30, %v470_v35 }
 0x388   : > { %v2030_v47 = vadd.f32 %v5964_v0, %v2029_v21  ;;  %v1845_v40 = vcvt.s32.f32 %v1813_v2  ;;  %v950_v0 = vsel %vm918_vm0, 1, %v6967_v16 }
 0x389   : > { %v6288_v36 = vpop.f32.mrb[10].mxu1  ;;  %v720_v26 = vpop.permute.xlu1 %719  ;;  %v2117_v57 = vmax.f32 %v2035_v1, 0.0 }
 0x38a   : > { %v2116_v29 = vmax.f32 %v2030_v47, 0.0  ;;  %3666 = vmatmul.mubr.f32.gmra.mrb[26].mxu0 %v1845_v40  ;;  %v6290_v7 = vpop.f32.mrb[11].mxu1  ;;  %vm758_vm1 = vcmp.eq.s32.totalorder %v720_v26, %v5160_v6 }
 0x38b   : > { %v790_v27 = vsel %vm758_vm1, 1, %v6967_v16 }
 0x38c   : > { %3733 = vmatprep.mubr.f32.mxu1 %v2116_v29  ;;  %v1654_v44 = vadd.s32 %v950_v0, %v790_v27 }
 0x38d   : > { %3734 = vmatmul.mubr.f32.gmra.mrb[18].mxu1 %v2117_v57 }
 0x38e   : > { %v1040_v58 = vpop.permute.xlu1 %1039  ;;  %v1750_v49 = vadd.s32 %v1654_v44, %v1622_v34 }
 0x38f   : > { %vm1078_vm6 = vcmp.eq.s32.totalorder %v1040_v58, %v5160_v6  ;;  %v6332_v58 = vld [vmem:[%s6905_s2] ss:$0 sm:$0xff] }
 0x390   : > { %v1110_v48 = vsel %vm1078_vm6, 1, %v6967_v16 }
 0x393   : > { %v1200_v3 = vpop.permute.xlu1 %1199 }
 0x394   : > { %vm1238_vm4 = vcmp.eq.s32.totalorder %v1200_v3, %v5160_v6 }
 0x395   : > { %v1270_v4 = vsel %vm1238_vm4, 1, %v6967_v16  ;;  %vm1240_vm4 = vcmp.eq.s32.totalorder %v5495_v63, %v5160_v6 }
 0x396   : > { %v1686_v45 = vadd.s32 %v1270_v4, %v1110_v48 }
 0x398   : > { %v1520_v22 = vpop.permute.xlu1 %1519 }
 0x399   : > { %vm1558_vm7 = vcmp.eq.s32.totalorder %v1520_v22, %v5160_v6 }
 0x39a   : > { %v1590_v28 = vsel %vm1558_vm7, 1, %v6967_v16 }
 0x39b   : > { %v1718_v24 = vadd.s32 %v1590_v28, %v1430_v32  ;;  %v7093_v32 = vld [vmem:[#allocation64_spill] sm:$0xff] }
 0x39c   : > { %vm760_vm1 = vcmp.eq.s32.totalorder %v7093_v32, %v5160_v6 }
 0x39d   : > { %v1782_v31 = vadd.s32 %v1718_v24, %v1686_v45  ;;  %v403_v11 = vpop.permute.xlu1 %402  ;;  %v792_v28 = vsel %vm760_vm1, 1, %v6967_v16 }
 0x39e   : > { %vm439_vm9 = vcmp.eq.s32.totalorder %v403_v11, %v5160_v6 }
 0x39f   : > { %v1814_v50 = vadd.s32 %v1782_v31, %v1750_v49  ;;  %v471_v23 = vsel %vm439_vm9, 1, %v6967_v16  ;;  %v1272_v31 = vsel %vm1240_vm4, 1, %v6967_v16 }
 0x3a0   : > { %v1623_v33 = vadd.s32 %v631_v25, %v471_v23 }
 0x3a1   : > { %v1846_v53 = vcvt.s32.f32 %v1814_v50 }
 0x3a2   : > { %v723_v54 = vpop.permute.xlu1 %722 }
 0x3a3   : > { %3668 = vmatprep.mubr.f32.mxu0 %v1846_v53  ;;  %vm759_vm10 = vcmp.eq.s32.totalorder %v723_v54, %v5160_v6 }
 0x3a4   : > { %v791_v37 = vsel %vm759_vm10, 1, %v6967_v16 }
 0x3a7   : > { %v883_v14 = vpop.permute.xlu1 %882 }
 0x3a8   : > { %vm919_vm8 = vcmp.eq.s32.totalorder %v883_v14, %v5160_v6 }
 0x3a9   : > { %v951_v43 = vsel %vm919_vm8, 1, %v6967_v16 }
 0x3aa   : > { %v1655_v59 = vadd.s32 %v951_v43, %v791_v37  ;;  %v889_v37 = vpop.permute.xlu0 %888 }
 0x3ab   : > { %vm921_vm9 = vcmp.eq.s32.totalorder %v889_v37, %v5160_v6 }
 0x3ac   : > { %v1203_v41 = vpop.permute.xlu1 %1202  ;;  %v1751_v1 = vadd.s32 %v1655_v59, %v1623_v33 }
 0x3ad   : > { %vm1239_vm11 = vcmp.eq.s32.totalorder %v1203_v41, %v5160_v6 }
 0x3ae   : > { %v1271_v56 = vsel %vm1239_vm11, 1, %v6967_v16 }
 0x3af   : > { %v1687_v5 = vadd.s32 %v1271_v56, %v1111_v9  ;;  %v953_v9 = vsel %vm921_vm9, 1, %v6967_v16 }
 0x3b1   : > { %v1363_v10 = vpop.permute.xlu1 %1362 }
 0x3b2   : > { %vm1399_vm15 = vcmp.eq.s32.totalorder %v1363_v10, %v5160_v6  ;;  %v1369_v10 = vpop.permute.xlu0 %1368 }
 0x3b3   : > { %v1431_v38 = vsel %vm1399_vm15, 1, %v6967_v16  ;;  %vm1401_vm12 = vcmp.eq.s32.totalorder %v1369_v10, %v5160_v6 }
 0x3b4   : > { %v1719_v2 = vadd.s32 %v1591_v8, %v1431_v38  ;;  %v1433_v33 = vsel %vm1401_vm12, 1, %v6967_v16 }
 0x3b6   : > { %v1783_v21 = vadd.s32 %v1719_v2, %v1687_v5  ;;  %v406_v47 = vpop.permute.xlu1 %405 }
 0x3b7   : > { %vm440_vm5 = vcmp.eq.s32.totalorder %v406_v47, %v5160_v6  ;;  %v6378_v47 = vld [vmem:[%s6907_s4] ss:$0 sm:$0xff] }
 0x3b8   : > { %v1815_v40 = vadd.s32 %v1783_v21, %v1751_v1  ;;  %v472_v11 = vsel %vm440_vm5, 1, %v6967_v16  ;;  %v473_v1 = vsel %vm441_vm13, 1, %v6967_v16  ;;  %v2230_v32 = vadd.f32 %v6378_v47, %v6254_v17 }
 0x3b9   : > { %v2245_v17 = vadd.f32 %v6256_v20, %v6378_v47  ;;  %v2265_v20 = vadd.f32 %v6274_v55, %v6378_v47 }
 0x3ba   : > { %v1847_v26 = vcvt.s32.f32 %v1815_v40 }
 0x3bb   : > { %v566_v29 = vpop.permute.xlu1 %565 }
 0x3bc   : > { %3669 = vmatmul.mubr.f32.gmra.mrb[28].mxu0 %v1847_v26  ;;  %vm600_vm2 = vcmp.eq.s32.totalorder %v566_v29, %v5160_v6 }
 0x3bd   : > { %v3658_v57 = vpop.f32.mrb[20].mxu0  ;;  %v632_v34 = vsel %vm600_vm2, 1, %v6967_v16 }
 0x3be   : > { %v2045_v60 = vadd.f32 %v6332_v58, %v3658_v57  ;;  %v2039_v3 = vpop.f32.mrb[21].mxu0  ;;  %v1624_v53 = vadd.s32 %v632_v34, %v472_v11  ;;  %v2235_v34 = vadd.f32 %v6252_v39, %v6378_v47  ;;  %v2383_v39 = vmax.f32 %v2245_v17, 0.0 }
 0x3bf   : > { %v2040_v0 = vadd.f32 %v6332_v58, %v2039_v3  ;;  %v2220_v3 = vadd.f32 %v6378_v47, %v6244_v62 }
 0x3c0   : > { %v6336_v27 = vpop.f32.mrb[12].mxu1  ;;  %v886_v51 = vpop.permute.xlu1 %885  ;;  %v2119_v4 = vmax.f32 %v2045_v60, 0.0 }
 0x3c1   : > { %v2118_v35 = vmax.f32 %v2040_v0, 0.0  ;;  %v6338_v30 = vpop.f32.mrb[13].mxu1  ;;  %vm920_vm0 = vcmp.eq.s32.totalorder %v886_v51, %v5160_v6  ;;  %v2285_v55 = vadd.f32 %v6336_v27, %v6378_v47  ;;  %v2693_v27 = vld [vmem:[%s6908_s5 + $0x8] sm:$0xff] }
 0x3c2   : > { %v952_v48 = vsel %vm920_vm0, 1, %v6967_v16 }
 0x3c3   : > { %3736 = vmatprep.mubr.f32.mxu1 %v2118_v35  ;;  %v1656_v49 = vadd.s32 %v952_v48, %v792_v28 }
 0x3c4   : > { %3737 = vmatmul.mubr.f32.gmra.mrb[20].mxu1 %v2119_v4 }
 0x3c5   : > { %v1046_v22 = vpop.permute.xlu1 %1045  ;;  %v1752_v41 = vadd.s32 %v1656_v49, %v1624_v53  ;;  %v2260_v53 = vadd.f32 %v6378_v47, %v6279_v18  ;;  %v2280_v18 = vadd.f32 %v6378_v47, %v6338_v30  ;;  %v2692_v30 = vld [vmem:[%s6908_s5] sm:$0xff] }
 0x3c6   : > { %vm1080_vm3 = vcmp.eq.s32.totalorder %v1046_v22, %v5160_v6  ;;  %v4010_v10 = vpack.c.bf16 %v2693_v27, %v2692_v30 }
 0x3c7   : > { %v1112_v45 = vsel %vm1080_vm3, 1, %v6967_v16 }
 0x3c8   : > { %v1688_v54 = vadd.s32 %v1272_v31, %v1112_v45  ;;  %v2380_v45 = vmax.f32 %v2230_v32, 0.0  ;;  %v2381_v31 = vmax.f32 %v2235_v34, 0.0  ;;  %4011 = vmatprep.subr.bf16.mxu1 %v4010_v10  ;;  %v2706_v34 = vld [vmem:[%s6908_s5 + $0x70] sm:$0xff] }
 0x3c9   : > { %4013 = vmatpush3.bf16.msra.mxu1 %v4010_v10 }
 0x3ca   : > { %v1366_v44 = vpop.permute.xlu1 %1365 }
 0x3cb   : > { %vm1400_vm6 = vcmp.eq.s32.totalorder %v1366_v44, %v5160_v6  ;;  %v2378_v44 = vmax.f32 %v2220_v3, 0.0 }
 0x3cc   : > { %v1432_v63 = vsel %vm1400_vm6, 1, %v6967_v16 }
 0x3cf   : > { %v1526_v24 = vpop.permute.xlu1 %1525 }
 0x3d0   : > { %vm1560_vm7 = vcmp.eq.s32.totalorder %v1526_v24, %v5160_v6 }
 0x3d1   : > { %v1592_v50 = vsel %vm1560_vm7, 1, %v6967_v16 }
 0x3d2   : > { %v1720_v14 = vadd.s32 %v1592_v50, %v1432_v63  ;;  %v2250_v63 = vadd.f32 %v6378_v47, %v6263_v52  ;;  %v2255_v50 = vadd.f32 %v6261_v13, %v6378_v47  ;;  %v2270_v52 = vadd.f32 %v6378_v47, %v6290_v7 }
 0x3d3   : > { %v2275_v13 = vadd.f32 %v6288_v36, %v6378_v47  ;;  %v2391_v7 = vmax.f32 %v2285_v55, 0.0 }
 0x3d4   : > { %v1784_v43 = vadd.s32 %v1720_v14, %v1688_v54  ;;  %v569_v19 = vpop.permute.xlu1 %568  ;;  %v2385_v54 = vmax.f32 %v2255_v50, 0.0  ;;  %v2386_v14 = vmax.f32 %v2260_v53, 0.0 }
 0x3d5   : > { %vm601_vm10 = vcmp.eq.s32.totalorder %v569_v19, %v5160_v6  ;;  %v2389_v19 = vmax.f32 %v2275_v13, 0.0 }
 0x3d6   : > { %v1816_v15 = vadd.s32 %v1784_v43, %v1752_v41  ;;  %v633_v8 = vsel %vm601_vm10, 1, %v6967_v16  ;;  %v2387_v41 = vmax.f32 %v2265_v20, 0.0  ;;  %v2388_v43 = vmax.f32 %v2270_v52, 0.0 }
 0x3d7   : > { %v1625_v40 = vadd.s32 %v633_v8, %v473_v1  ;;  %v2697_v8 = vld [vmem:[%s6908_s5 + $0x28] sm:$0xff] }
 0x3d8   : > { %v1848_v12 = vcvt.s32.f32 %v1816_v15  ;;  %v2390_v15 = vmax.f32 %v2280_v18, 0.0 }
 0x3d9   : > { %v729_v23 = vpop.permute.xlu1 %728 }
 0x3da   : > { %3671 = vmatprep.mubr.f32.mxu0 %v1848_v12  ;;  %vm761_vm8 = vcmp.eq.s32.totalorder %v729_v23, %v5160_v6 }
 0x3db   : > { %v793_v25 = vsel %vm761_vm8, 1, %v6967_v16 }
 0x3dc   : > { %v1657_v2 = vadd.s32 %v953_v9, %v793_v25  ;;  %v2696_v9 = vld [vmem:[%s6908_s5 + $0x20] sm:$0xff] }
 0x3de   : > { %v1049_v56 = vpop.permute.xlu1 %1048  ;;  %v1753_v57 = vadd.s32 %v1657_v2, %v1625_v40 }
 0x3df   : > { %vm1081_vm14 = vcmp.eq.s32.totalorder %v1049_v56, %v5160_v6  ;;  %v2694_v56 = vld [vmem:[%s6908_s5 + $0x10] sm:$0xff] }
 0x3e0   : > { %v1113_v21 = vsel %vm1081_vm14, 1, %v6967_v16 }
 0x3e3   : > { %v1209_v59 = vpop.permute.xlu1 %1208 }
 0x3e4   : > { %vm1241_vm11 = vcmp.eq.s32.totalorder %v1209_v59, %v5160_v6  ;;  %v2695_v59 = vld [vmem:[%s6908_s5 + $0x18] sm:$0xff] }
 0x3e5   : > { %v1273_v38 = vsel %vm1241_vm11, 1, %v6967_v16  ;;  %v4014_v25 = vpack.c.bf16 %v2695_v59, %v2694_v56  ;;  %v6477_v56 = vld [vmem:[%s6907_s4 + $0x1] ss:$0 sm:$0xff] }
 0x3e6   : > { %v1689_v26 = vadd.s32 %v1273_v38, %v1113_v21  ;;  %v4018_v38 = vpack.c.bf16 %v2697_v8, %v2696_v9 }
 0x3e7   : > { %4015 = vmatprep.subr.bf16.mxu1 %v4014_v25 }
 0x3e8   : > { %v1529_v5 = vpop.permute.xlu1 %1528  ;;  %4017 = vmatpush3.bf16.msra.mxu1 %v4014_v25 }
 0x3e9   : > { %vm1561_vm15 = vcmp.eq.s32.totalorder %v1529_v5, %v5160_v6  ;;  %v2699_v5 = vld [vmem:[%s6908_s5 + $0x38] sm:$0xff]  ;;  %4019 = vmatprep.subr.bf16.mxu1 %v4018_v38 }
 0x3ea   : > { %v1593_v46 = vsel %vm1561_vm15, 1, %v6967_v16  ;;  %v2225_v16 = vadd.f32 %v6242_v42, %v6378_v47  ;;  %v2240_v42 = vadd.f32 %v6378_v47, %v6258_v61  ;;  %v2384_v61 = vmax.f32 %v2250_v63, 0.0 }
 0x3eb   : > { %v1721_v29 = vadd.s32 %v1593_v46, %v1433_v33  ;;  %v2698_v33 = vld [vmem:[%s6908_s5 + $0x30] sm:$0xff] }
 0x3ec   : > { %v2379_v62 = vmax.f32 %v2225_v16, 0.0  ;;  %v2382_v11 = vmax.f32 %v2240_v42, 0.0  ;;  %v4022_v46 = vpack.c.bf16 %v2699_v5, %v2698_v33  ;;  %4021 = vmatpush3.bf16.msra.mxu1 %v4018_v38  ;;  %v2702_v16 = vld [vmem:[%s6908_s5 + $0x50] sm:$0xff] }
 0x3ed   : > { %v1785_v60 = vadd.s32 %v1721_v29, %v1689_v26  ;;  %v2700_v26 = vld [vmem:[%s6908_s5 + $0x40] sm:$0xff]  ;;  %v2701_v29 = vld [vmem:[%s6908_s5 + $0x48] sm:$0xff] }
 0x3ee   : > { %4023 = vmatprep.subr.bf16.mxu1 %v4022_v46 }
 0x3ef   : > { %v3661_v6 = vpop.f32.mrb[22].mxu0  ;;  %v1817_v0 = vadd.s32 %v1785_v60, %v1753_v57 }
 0x3f0   : > { %v2055_v51 = vadd.f32 %v6332_v58, %v3661_v6  ;;  %v2049_v35 = vpop.f32.mrb[23].mxu0  ;;  %4025 = vmatpush3.bf16.msra.mxu1 %v4022_v46 }
 0x3f1   : > { %v2050_v4 = vadd.f32 %v6332_v58, %v2049_v35  ;;  %v1849_v22 = vcvt.s32.f32 %v1817_v0  ;;  %v4026_v35 = vpack.c.bf16 %v2701_v29, %v2700_v26 }
 0x3f2   : > { %v2121_v28 = vmax.f32 %v2055_v51, 0.0 }
 0x3f3   : > { %v2120_v48 = vmax.f32 %v2050_v4, 0.0  ;;  %3672 = vmatmul.mubr.f32.gmra.mrb[30].mxu0 %v1849_v22  ;;  %v2703_v4 = vld [vmem:[%s6908_s5 + $0x58] sm:$0xff]  ;;  %4027 = vmatprep.subr.bf16.mxu1 %v4026_v35 }
 0x3f4   : > { %3786 = vmatprep.mubr.f32.mxu0 %v2378_v44  ;;  %v4030_v32 = vpack.c.bf16 %v2703_v4, %v2702_v16  ;;  %4029 = vmatpush3.bf16.msra.mxu1 %v4026_v35 }
 0x3f5   : > { %3739 = vmatprep.mubr.f32.mxu1 %v2120_v48  ;;  %v2704_v48 = vld [vmem:[%s6908_s5 + $0x60] sm:$0xff] }
 0x3f6   : > { %3740 = vmatmul.mubr.f32.gmra.mrb[22].mxu1 %v2121_v28  ;;  %4031 = vmatprep.subr.bf16.mxu1 %v4030_v32  ;;  %v2705_v28 = vld [vmem:[%s6908_s5 + $0x68] sm:$0xff] }
 0x3f7   : > { %v3729_v24 = vpop.f32.mrb[14].mxu1  ;;  %3787 = vmatmul.mubr.f32.vlgmr.msra.gmra.mrb[32].mxu0 %v2379_v62  ;;  %v4034_v62 = vpack.c.bf16 %v2705_v28, %v2704_v48 }
 0x3f8   : > { %v2289_v49 = vpop.f32.mrb[15].mxu1  ;;  %3789 = vmatprep.mubr.f32.mxu0 %v2380_v45  ;;  %v2295_v23 = vadd.f32 %v3729_v24, %v6378_v47  ;;  %4033 = vmatpush3.bf16.msra.mxu1 %v4030_v32  ;;  %v2707_v45 = vld [vmem:[%s6908_s5 + $0x78] sm:$0xff] }
 0x3f9   : > { %v2290_v12 = vadd.f32 %v6378_v47, %v2289_v49  ;;  %4035 = vmatprep.subr.bf16.mxu1 %v4034_v62  ;;  %v4038_v42 = vpack.c.bf16 %v2707_v45, %v2706_v34 }
 0x3fa   : > { %v2393_v36 = vmax.f32 %v2295_v23, 0.0 }
 0x3fb   : > { %3790 = vmatmul.mubr.f32.gmra.mrb[34].mxu0 %v2381_v31  ;;  %v2392_v37 = vmax.f32 %v2290_v12, 0.0 }
 0x3fc   : > { %3792 = vmatprep.mubr.f32.mxu0 %v2382_v11  ;;  %4037 = vmatpush3.bf16.msra.mxu1 %v4034_v62 }
 0x3fd   : > { %4039 = vmatprep.subr.bf16.mxu1 %v4038_v42 }
 0x3ff   : > { %3793 = vmatmul.mubr.f32.gmra.mrb[36].mxu0 %v2383_v39 }
 0x400   : > { %3795 = vmatprep.mubr.f32.mxu0 %v2384_v61  ;;  %4041 = vmatpush3.bf16.msra.mxu1 %v4038_v42 }
 0x403   : > { %3796 = vmatmul.mubr.f32.gmra.mrb[38].mxu0 %v2385_v54 }
 0x404   : > { %3798 = vmatprep.mubr.f32.mxu0 %v2386_v14 }
 0x407   : > { %3799 = vmatmul.mubr.f32.gmra.mrb[40].mxu0 %v2387_v41 }
 0x408   : > { %3801 = vmatprep.mubr.f32.mxu0 %v2388_v43 }
 0x40b   : > { %3802 = vmatmul.mubr.f32.gmra.mrb[42].mxu0 %v2389_v19 }
 0x40c   : > { %3804 = vmatprep.mubr.f32.mxu0 %v2390_v15 }
 0x40f   : > { %3805 = vmatmul.mubr.f32.gmra.mrb[44].mxu0 %v2391_v7 }
 0x410   : > { %3807 = vmatprep.mubr.f32.mxu0 %v2392_v37 }
 0x413   : > { %3808 = vmatmul.mubr.f32.gmra.mrb[46].mxu0 %v2393_v36 }
 0x426   : > { %v3664_v2 = vpop.f32.mrb[24].mxu0 }
 0x427   : > { %v2065_v1 = vadd.f32 %v6332_v58, %v3664_v2  ;;  %v2059_v21 = vpop.f32.mrb[25].mxu0 }
 0x428   : > { %v2060_v40 = vadd.f32 %v6332_v58, %v2059_v21 }
 0x429   : > { %v3732_v57 = vpop.f32.mrb[16].mxu1  ;;  %v2123_v0 = vmax.f32 %v2065_v1, 0.0 }
 0x42a   : > { %v2122_v60 = vmax.f32 %v2060_v40, 0.0  ;;  %v2305_v3 = vadd.f32 %v3732_v57, %v6378_v47  ;;  %v2299_v6 = vpop.f32.mrb[17].mxu1 }
 0x42b   : > { %v2300_v51 = vadd.f32 %v6378_v47, %v2299_v6 }
 0x42c   : > { %3742 = vmatprep.mubr.f32.mxu1 %v2122_v60  ;;  %v2395_v44 = vmax.f32 %v2305_v3, 0.0 }
 0x42d   : > { %v2394_v22 = vmax.f32 %v2300_v51, 0.0  ;;  %3743 = vmatmul.mubr.f32.gmra.mrb[24].mxu1 %v2123_v0 }
 0x42f   : > { %3810 = vmatprep.mubr.f32.mxu0 %v2394_v22 }
 0x430   : > { %3811 = vmatmul.mubr.f32.gmra.mrb[48].mxu0 %v2395_v44 }
 0x45d   : > { %v3667_v24 = vpop.f32.mrb[26].mxu0 }
 0x45e   : > { %v2075_v49 = vadd.f32 %v6332_v58, %v3667_v24  ;;  %v2069_v31 = vpop.f32.mrb[27].mxu0 }
 0x45f   : > { %v2070_v17 = vadd.f32 %v6332_v58, %v2069_v31 }
 0x460   : > { %v3735_v11 = vpop.f32.mrb[18].mxu1  ;;  %v2125_v61 = vmax.f32 %v2075_v49, 0.0 }
 0x461   : > { %v2124_v63 = vmax.f32 %v2070_v17, 0.0  ;;  %v2315_v39 = vadd.f32 %v3735_v11, %v6378_v47  ;;  %v2309_v50 = vpop.f32.mrb[19].mxu1 }
 0x462   : > { %v2310_v53 = vadd.f32 %v6378_v47, %v2309_v50 }
 0x463   : > { %3745 = vmatprep.mubr.f32.mxu1 %v2124_v63  ;;  %v2397_v20 = vmax.f32 %v2315_v39, 0.0 }
 0x464   : > { %v2396_v54 = vmax.f32 %v2310_v53, 0.0  ;;  %3746 = vmatmul.mubr.f32.gmra.mrb[26].mxu1 %v2125_v61 }
 0x466   : > { %3813 = vmatprep.mubr.f32.mxu0 %v2396_v54 }
 0x467   : > { %3814 = vmatmul.mubr.f32.gmra.mrb[50].mxu0 %v2397_v20 }
 0x48f   : > { %v3670_v14 = vpop.f32.mrb[28].mxu0 }
 0x490   : > { %v2085_v52 = vadd.f32 %v6332_v58, %v3670_v14  ;;  %v2079_v41 = vpop.f32.mrb[29].mxu0 }
 0x491   : > { %v2080_v13 = vadd.f32 %v6332_v58, %v2079_v41 }
 0x492   : > { %v2127_v18 = vmax.f32 %v2085_v52, 0.0 }
 0x493   : > { %v2126_v43 = vmax.f32 %v2080_v13, 0.0 }
 0x495   : > { %3748 = vmatprep.mubr.f32.mxu1 %v2126_v43 }
 0x496   : > { %3749 = vmatmul.mubr.f32.gmra.mrb[28].mxu1 %v2127_v18 }
 0x497   : > { %v3738_v19 = vpop.f32.mrb[20].mxu1 }
 0x498   : > { %v2325_v55 = vadd.f32 %v3738_v19, %v6378_v47  ;;  %v2319_v15 = vpop.f32.mrb[21].mxu1 }
 0x499   : > { %v2320_v12 = vadd.f32 %v6378_v47, %v2319_v15 }
 0x49a   : > { %v2399_v23 = vmax.f32 %v2325_v55, 0.0 }
 0x49b   : > { %v2398_v7 = vmax.f32 %v2320_v12, 0.0 }
 0x49d   : > { %3816 = vmatprep.mubr.f32.mxu0 %v2398_v7 }
 0x49e   : > { %3817 = vmatmul.mubr.f32.gmra.mrb[52].mxu0 %v2399_v23 }
 0x4c6   : > { %v3673_v37 = vpop.f32.mrb[30].mxu0 }
 0x4c7   : > { %v2095_v36 = vadd.f32 %v6332_v58, %v3673_v37  ;;  %v2089_v30 = vpop.f32.mrb[31].mxu0 }
 0x4c8   : > { %v2090_v27 = vadd.f32 %v6332_v58, %v2089_v30 }
 0x4c9   : > { %v3741_v10 = vpop.f32.mrb[22].mxu1  ;;  %v2129_v38 = vmax.f32 %v2095_v36, 0.0 }
 0x4ca   : > { %v2128_v59 = vmax.f32 %v2090_v27, 0.0  ;;  %v2335_v25 = vadd.f32 %v3741_v10, %v6378_v47  ;;  %v2329_v9 = vpop.f32.mrb[23].mxu1  ;;  %v3788_v8 = vpop.f32.mrb[32].mxu0 }
 0x4cb   : > { %v2330_v33 = vadd.f32 %v6378_v47, %v2329_v9  ;;  %v2507_v5 = vadd.f32 %v3788_v8, %v6477_v56  ;;  %v2501_v2 = vpop.f32.mrb[33].mxu0 }
 0x4cc   : > { %v2502_v1 = vadd.f32 %v6477_v56, %v2501_v2  ;;  %3751 = vmatprep.mubr.f32.mxu1 %v2128_v59  ;;  %v2401_v21 = vmax.f32 %v2335_v25, 0.0 }
 0x4cd   : > { %v2400_v58 = vmax.f32 %v2330_v33, 0.0  ;;  %3752 = vmatmul.mubr.f32.gmra.mrb[30].mxu1 %v2129_v38  ;;  %v2661_v26 = vmax.f32 %v2507_v5, 0.0 }
 0x4ce   : > { %v2660_v46 = vmax.f32 %v2502_v1, 0.0  ;;  %v3791_v40 = vpop.f32.mrb[34].mxu0 }
 0x4cf   : > { %v2517_v29 = vadd.f32 %v3791_v40, %v6477_v56  ;;  %v2511_v57 = vpop.f32.mrb[35].mxu0  ;;  %3819 = vmatprep.mubr.f32.mxu0 %v2400_v58 }
 0x4d0   : > { %v2512_v60 = vadd.f32 %v6477_v56, %v2511_v57  ;;  %3820 = vmatmul.mubr.f32.gmra.mrb[54].mxu0 %v2401_v21  ;;  %3866 = vmatprep.mubr.f32.mxu1 %v2660_v46 }
 0x4d1   : > { %3867 = vmatmul.mubr.f32.vlgmr.msra.gmra.mrb[32].mxu1 %v2661_v26  ;;  %v2663_v0 = vmax.f32 %v2517_v29, 0.0 }
 0x4d2   : > { %v2662_v3 = vmax.f32 %v2512_v60, 0.0  ;;  %v3794_v6 = vpop.f32.mrb[36].mxu0 }
 0x4d3   : > { %v2527_v51 = vadd.f32 %v3794_v6, %v6477_v56  ;;  %v2521_v35 = vpop.f32.mrb[37].mxu0 }
 0x4d4   : > { %v2522_v16 = vadd.f32 %v6477_v56, %v2521_v35  ;;  %3869 = vmatprep.mubr.f32.mxu1 %v2662_v3 }
 0x4d5   : > { %3870 = vmatmul.mubr.f32.gmra.mrb[34].mxu1 %v2663_v0  ;;  %v2665_v44 = vmax.f32 %v2527_v51, 0.0 }
 0x4d6   : > { %v2664_v4 = vmax.f32 %v2522_v16, 0.0  ;;  %v3797_v22 = vpop.f32.mrb[38].mxu0 }
 0x4d7   : > { %v2537_v32 = vadd.f32 %v3797_v22, %v6477_v56  ;;  %v2531_v48 = vpop.f32.mrb[39].mxu0 }
 0x4d8   : > { %v2532_v28 = vadd.f32 %v6477_v56, %v2531_v48  ;;  %3872 = vmatprep.mubr.f32.mxu1 %v2664_v4 }
 0x4d9   : > { %3873 = vmatmul.mubr.f32.gmra.mrb[36].mxu1 %v2665_v44  ;;  %v2667_v45 = vmax.f32 %v2537_v32, 0.0 }
 0x4da   : > { %v2666_v62 = vmax.f32 %v2532_v28, 0.0  ;;  %v3800_v34 = vpop.f32.mrb[40].mxu0 }
 0x4db   : > { %v2547_v42 = vadd.f32 %v3800_v34, %v6477_v56  ;;  %v2541_v24 = vpop.f32.mrb[41].mxu0 }
 0x4dc   : > { %v2542_v49 = vadd.f32 %v6477_v56, %v2541_v24  ;;  %3875 = vmatprep.mubr.f32.mxu1 %v2666_v62  ;;  %v6514_v24 = vld [vmem:[%s6909_s6] ss:$0 sm:$0xff] }
 0x4dd   : > { %3876 = vmatmul.mubr.f32.gmra.mrb[38].mxu1 %v2667_v45  ;;  %v2669_v11 = vmax.f32 %v2547_v42, 0.0 }
 0x4de   : > { %v2668_v31 = vmax.f32 %v2542_v49, 0.0  ;;  %v3803_v17 = vpop.f32.mrb[42].mxu0 }
 0x4df   : > { %v2557_v63 = vadd.f32 %v3803_v17, %v6477_v56  ;;  %v2551_v39 = vpop.f32.mrb[43].mxu0 }
 0x4e0   : > { %v2552_v50 = vadd.f32 %v6477_v56, %v2551_v39  ;;  %3878 = vmatprep.mubr.f32.mxu1 %v2668_v31 }
 0x4e1   : > { %3879 = vmatmul.mubr.f32.gmra.mrb[40].mxu1 %v2669_v11  ;;  %v2671_v54 = vmax.f32 %v2557_v63, 0.0 }
 0x4e2   : > { %v2670_v61 = vmax.f32 %v2552_v50, 0.0  ;;  %v3806_v53 = vpop.f32.mrb[44].mxu0 }
 0x4e3   : > { %v2567_v20 = vadd.f32 %v3806_v53, %v6477_v56  ;;  %v2561_v14 = vpop.f32.mrb[45].mxu0 }
 0x4e4   : > { %v2562_v52 = vadd.f32 %v6477_v56, %v2561_v14  ;;  %3881 = vmatprep.mubr.f32.mxu1 %v2670_v61 }
 0x4e5   : > { %3882 = vmatmul.mubr.f32.gmra.mrb[42].mxu1 %v2671_v54  ;;  %v2673_v43 = vmax.f32 %v2567_v20, 0.0 }
 0x4e6   : > { %v2672_v41 = vmax.f32 %v2562_v52, 0.0  ;;  %v3809_v13 = vpop.f32.mrb[46].mxu0 }
 0x4e7   : > { %v2577_v18 = vadd.f32 %v3809_v13, %v6477_v56  ;;  %v2571_v19 = vpop.f32.mrb[47].mxu0 }
 0x4e8   : > { %v2572_v55 = vadd.f32 %v6477_v56, %v2571_v19  ;;  %3884 = vmatprep.mubr.f32.mxu1 %v2672_v41 }
 0x4e9   : > { %3885 = vmatmul.mubr.f32.gmra.mrb[44].mxu1 %v2673_v43  ;;  %v2675_v12 = vmax.f32 %v2577_v18, 0.0 }
 0x4ea   : > { %v2674_v15 = vmax.f32 %v2572_v55, 0.0 }
 0x4ec   : > { %3887 = vmatprep.mubr.f32.mxu1 %v2674_v15 }
 0x4ed   : > { %3888 = vmatmul.mubr.f32.gmra.mrb[46].mxu1 %v2675_v12 }
 0x500   : > { %v3744_v7 = vpop.f32.mrb[24].mxu1 }
 0x501   : > { %v2345_v23 = vadd.f32 %v3744_v7, %v6378_v47  ;;  %v2339_v37 = vpop.f32.mrb[25].mxu1 }
 0x502   : > { %v2340_v36 = vadd.f32 %v6378_v47, %v2339_v37 }
 0x503   : > { %v3812_v30 = vpop.f32.mrb[48].mxu0  ;;  %v2403_v25 = vmax.f32 %v2345_v23, 0.0 }
 0x504   : > { %v2402_v27 = vmax.f32 %v2340_v36, 0.0  ;;  %v2587_v10 = vadd.f32 %v3812_v30, %v6477_v56  ;;  %v2581_v59 = vpop.f32.mrb[49].mxu0 }
 0x505   : > { %v2582_v9 = vadd.f32 %v6477_v56, %v2581_v59 }
 0x506   : > { %3822 = vmatprep.mubr.f32.mxu0 %v2402_v27  ;;  %v2677_v38 = vmax.f32 %v2587_v10, 0.0 }
 0x507   : > { %v2676_v8 = vmax.f32 %v2582_v9, 0.0  ;;  %3823 = vmatmul.mubr.f32.gmra.mrb[56].mxu0 %v2403_v25 }
 0x509   : > { %3890 = vmatprep.mubr.f32.mxu1 %v2676_v8 }
 0x50a   : > { %3891 = vmatmul.mubr.f32.gmra.mrb[48].mxu1 %v2677_v38 }
 0x537   : > { %v3747_v33 = vpop.f32.mrb[26].mxu1 }
 0x538   : > { %v2355_v5 = vadd.f32 %v3747_v33, %v6378_v47  ;;  %v2349_v2 = vpop.f32.mrb[27].mxu1 }
 0x539   : > { %v2350_v1 = vadd.f32 %v6378_v47, %v2349_v2 }
 0x53a   : > { %v3815_v58 = vpop.f32.mrb[50].mxu0  ;;  %v2405_v26 = vmax.f32 %v2355_v5, 0.0 }
 0x53b   : > { %v2404_v21 = vmax.f32 %v2350_v1, 0.0  ;;  %v2597_v46 = vadd.f32 %v3815_v58, %v6477_v56  ;;  %v2591_v40 = vpop.f32.mrb[51].mxu0 }
 0x53c   : > { %v2592_v29 = vadd.f32 %v6477_v56, %v2591_v40 }
 0x53d   : > { %3825 = vmatprep.mubr.f32.mxu0 %v2404_v21  ;;  %v2679_v60 = vmax.f32 %v2597_v46, 0.0 }
 0x53e   : > { %v2678_v57 = vmax.f32 %v2592_v29, 0.0  ;;  %3826 = vmatmul.mubr.f32.gmra.mrb[58].mxu0 %v2405_v26 }
 0x540   : > { %3893 = vmatprep.mubr.f32.mxu1 %v2678_v57 }
 0x541   : > { %3894 = vmatmul.mubr.f32.gmra.mrb[50].mxu1 %v2679_v60 }
 0x569   : > { %v3750_v3 = vpop.f32.mrb[28].mxu1 }
 0x56a   : > { %v2365_v6 = vadd.f32 %v3750_v3, %v6378_v47  ;;  %v2359_v0 = vpop.f32.mrb[29].mxu1 }
 0x56b   : > { %v2360_v51 = vadd.f32 %v6378_v47, %v2359_v0 }
 0x56c   : > { %v2407_v16 = vmax.f32 %v2365_v6, 0.0 }
 0x56d   : > { %v2406_v35 = vmax.f32 %v2360_v51, 0.0 }
 0x56f   : > { %3828 = vmatprep.mubr.f32.mxu0 %v2406_v35 }
 0x570   : > { %3829 = vmatmul.mubr.f32.gmra.mrb[60].mxu0 %v2407_v16 }
 0x571   : > { %v3818_v4 = vpop.f32.mrb[52].mxu0 }
 0x572   : > { %v2607_v22 = vadd.f32 %v3818_v4, %v6477_v56  ;;  %v2601_v44 = vpop.f32.mrb[53].mxu0 }
 0x573   : > { %v2602_v32 = vadd.f32 %v6477_v56, %v2601_v44 }
 0x574   : > { %v2681_v28 = vmax.f32 %v2607_v22, 0.0 }
 0x575   : > { %v2680_v48 = vmax.f32 %v2602_v32, 0.0 }
 0x577   : > { %3896 = vmatprep.mubr.f32.mxu1 %v2680_v48 }
 0x578   : > { %3897 = vmatmul.mubr.f32.gmra.mrb[52].mxu1 %v2681_v28 }
 0x5a0   : > { %v3753_v62 = vpop.f32.mrb[30].mxu1 }
 0x5a1   : > { %v2375_v34 = vadd.f32 %v3753_v62, %v6378_v47  ;;  %v2369_v45 = vpop.f32.mrb[31].mxu1 }
 0x5a2   : > { %v2370_v42 = vadd.f32 %v6378_v47, %v2369_v45 }
 0x5a3   : > { %v3821_v49 = vpop.f32.mrb[54].mxu0  ;;  %v2409_v39 = vmax.f32 %v2375_v34, 0.0 }
 0x5a4   : > { %v2408_v31 = vmax.f32 %v2370_v42, 0.0  ;;  %v2617_v17 = vadd.f32 %v3821_v49, %v6477_v56  ;;  %v2611_v11 = vpop.f32.mrb[55].mxu0  ;;  %v3868_v63 = vpop.f32.mrb[32].mxu1 }
 0x5a5   : > { %v2612_v50 = vadd.f32 %v6477_v56, %v2611_v11  ;;  %v6519_v61 = vadd.f32 %v3868_v63, %v6514_v24  ;;  %v2781_v53 = vpop.f32.mrb[33].mxu1 }
 0x5a6   : > { %v6522_v47 = vadd.f32 %v6514_v24, %v2781_v53  ;;  %3831 = vmatprep.mubr.f32.mxu0 %v2408_v31  ;;  %v2683_v20 = vmax.f32 %v2617_v17, 0.0 }
 0x5a7   : > { %v2682_v54 = vmax.f32 %v2612_v50, 0.0  ;;  %2942 = vmax.xlane.f32.xlu0 %v6519_v61  ;;  %3832 = vmatmul.mubr.f32.gmra.mrb[62].mxu0 %v2409_v39 }
 0x5a8   : > { %v3871_v14 = vpop.f32.mrb[34].mxu1  ;;  %2940 = vmax.xlane.f32.xlu1 %v6522_v47 }
 0x5a9   : > { %v6527_v52 = vadd.f32 %v3871_v14, %v6514_v24  ;;  %v2791_v41 = vpop.f32.mrb[35].mxu1  ;;  %3899 = vmatprep.mubr.f32.mxu1 %v2682_v54 }
 0x5aa   : > { %v6530_v13 = vadd.f32 %v6514_v24, %v2791_v41  ;;  %3900 = vmatmul.mubr.f32.gmra.mrb[54].mxu1 %v2683_v20 }
 0x5ac   : > { %v3874_v43 = vpop.f32.mrb[36].mxu1  ;;  %2944 = vmax.xlane.f32.xlu0 %v6530_v13  ;;  %2946 = vmax.xlane.f32.xlu1 %v6527_v52 }
 0x5ad   : > { %v6535_v18 = vadd.f32 %v3874_v43, %v6514_v24  ;;  %v2801_v19 = vpop.f32.mrb[37].mxu1 }
 0x5ae   : > { %v6538_v55 = vadd.f32 %v6514_v24, %v2801_v19 }
 0x5b0   : > { %v3877_v15 = vpop.f32.mrb[38].mxu1  ;;  %2948 = vmax.xlane.f32.xlu0 %v6538_v55  ;;  %2950 = vmax.xlane.f32.xlu1 %v6535_v18 }
 0x5b1   : > { %v6543_v12 = vadd.f32 %v3877_v15, %v6514_v24  ;;  %v2811_v7 = vpop.f32.mrb[39].mxu1 }
 0x5b2   : > { %v6546_v23 = vadd.f32 %v6514_v24, %v2811_v7 }
 0x5b4   : > { %v3880_v37 = vpop.f32.mrb[40].mxu1  ;;  %2952 = vmax.xlane.f32.xlu0 %v6546_v23  ;;  %2954 = vmax.xlane.f32.xlu1 %v6543_v12 }
 0x5b5   : > { %v6551_v36 = vadd.f32 %v3880_v37, %v6514_v24  ;;  %v2821_v30 = vpop.f32.mrb[41].mxu1 }
 0x5b6   : > { %v6554_v27 = vadd.f32 %v6514_v24, %v2821_v30 }
 0x5b8   : > { %v3883_v10 = vpop.f32.mrb[42].mxu1  ;;  %2956 = vmax.xlane.f32.xlu0 %v6554_v27  ;;  %2958 = vmax.xlane.f32.xlu1 %v6551_v36 }
 0x5b9   : > { %v6559_v59 = vadd.f32 %v3883_v10, %v6514_v24  ;;  %v2831_v25 = vpop.f32.mrb[43].mxu1 }
 0x5ba   : > { %v6562_v9 = vadd.f32 %v6514_v24, %v2831_v25 }
 0x5bc   : > { %v3886_v8 = vpop.f32.mrb[44].mxu1  ;;  %2960 = vmax.xlane.f32.xlu0 %v6562_v9  ;;  %2962 = vmax.xlane.f32.xlu1 %v6559_v59 }
 0x5bd   : > { %v6567_v38 = vadd.f32 %v3886_v8, %v6514_v24  ;;  %v2841_v33 = vpop.f32.mrb[45].mxu1 }
 0x5be   : > { %v6570_v5 = vadd.f32 %v6514_v24, %v2841_v33 }
 0x5c0   : > { %v3889_v2 = vpop.f32.mrb[46].mxu1  ;;  %2964 = vmax.xlane.f32.xlu0 %v6570_v5  ;;  %2966 = vmax.xlane.f32.xlu1 %v6567_v38 }
 0x5c1   : > { %v6575_v1 = vadd.f32 %v3889_v2, %v6514_v24  ;;  %v2851_v58 = vpop.f32.mrb[47].mxu1 }
 0x5c2   : > { %v6578_v21 = vadd.f32 %v6514_v24, %v2851_v58 }
 0x5c4   : > { %2968 = vmax.xlane.f32.xlu0 %v6578_v21  ;;  %2970 = vmax.xlane.f32.xlu1 %v6575_v1 }
 0x5da   : > { %v3824_v46 = vpop.f32.mrb[56].mxu0 }
 0x5db   : > { %v2627_v40 = vadd.f32 %v3824_v46, %v6477_v56  ;;  %v2621_v26 = vpop.f32.mrb[57].mxu0 }
 0x5dc   : > { %v2622_v29 = vadd.f32 %v6477_v56, %v2621_v26 }
 0x5dd   : > { %v3892_v57 = vpop.f32.mrb[48].mxu1  ;;  %v2685_v0 = vmax.f32 %v2627_v40, 0.0 }
 0x5de   : > { %v2684_v60 = vmax.f32 %v2622_v29, 0.0  ;;  %v6585_v3 = vadd.f32 %v3892_v57, %v6514_v24  ;;  %v2861_v6 = vpop.f32.mrb[49].mxu1 }
 0x5df   : > { %v6588_v51 = vadd.f32 %v6514_v24, %v2861_v6 }
 0x5e0   : > { %3902 = vmatprep.mubr.f32.mxu1 %v2684_v60  ;;  %2974 = vmax.xlane.f32.xlu1 %v6585_v3 }
 0x5e1   : > { %3903 = vmatmul.mubr.f32.gmra.mrb[56].mxu1 %v2685_v0  ;;  %2972 = vmax.xlane.f32.xlu0 %v6588_v51 }
 0x611   : > { %v3827_v35 = vpop.f32.mrb[58].mxu0 }
 0x612   : > { %v2637_v16 = vadd.f32 %v3827_v35, %v6477_v56  ;;  %v2631_v4 = vpop.f32.mrb[59].mxu0 }
 0x613   : > { %v2632_v22 = vadd.f32 %v6477_v56, %v2631_v4 }
 0x614   : > { %v3895_v44 = vpop.f32.mrb[50].mxu1  ;;  %v2687_v62 = vmax.f32 %v2637_v16, 0.0 }
 0x615   : > { %v2686_v32 = vmax.f32 %v2632_v22, 0.0  ;;  %v6595_v48 = vadd.f32 %v3895_v44, %v6514_v24  ;;  %v2871_v28 = vpop.f32.mrb[51].mxu1 }
 0x616   : > { %v6598_v34 = vadd.f32 %v6514_v24, %v2871_v28 }
 0x617   : > { %3905 = vmatprep.mubr.f32.mxu1 %v2686_v32  ;;  %2978 = vmax.xlane.f32.xlu1 %v6595_v48 }
 0x618   : > { %3906 = vmatmul.mubr.f32.gmra.mrb[58].mxu1 %v2687_v62  ;;  %2976 = vmax.xlane.f32.xlu0 %v6598_v34 }
 0x634   : > { %v2943_v6 = vpop.xlane.xlu0 %2942 }
 0x635   : > { %v2941_v60 = vpop.xlane.xlu1 %2940  ;;  %v6647_v22 = vsub.f32 %v6519_v61, %v2943_v6 }
 0x636   : > { %v6650_v44 = vsub.f32 %v6522_v47, %v2941_v60 }
 0x637   : > { %v3038_v62 = vmul.f32 1.442695, %v6647_v22 }
 0x639   : > { %v2947_v0 = vpop.xlane.xlu1 %2946  ;;  %v2945_v35 = vpop.xlane.xlu0 %2944  ;;  %4272 = vpow2.f32 %v3038_v62 }
 0x63d   : > { %v2951_v16 = vpop.xlane.xlu1 %2950  ;;  %v2949_v4 = vpop.xlane.xlu0 %2948 }
 0x641   : > { %v2955_v32 = vpop.xlane.xlu1 %2954  ;;  %v2953_v28 = vpop.xlane.xlu0 %2952 }
 0x643   : > { %v3830_v45 = vpop.f32.mrb[60].mxu0 }
 0x644   : > { %v2647_v42 = vadd.f32 %v3830_v45, %v6477_v56  ;;  %v2641_v49 = vpop.f32.mrb[61].mxu0  ;;  %v6654_v45 = vsub.f32 %v6527_v52, %v2947_v0 }
 0x645   : > { %v2642_v31 = vadd.f32 %v6477_v56, %v2641_v49  ;;  %v6658_v49 = vsub.f32 %v6530_v13, %v2945_v35  ;;  %v2957_v47 = vpop.xlane.xlu0 %2956  ;;  %v6670_v13 = vsub.f32 %v6543_v12, %v2955_v32 }
 0x646   : > { %v2689_v11 = vmax.f32 %v2647_v42, 0.0  ;;  %v3036_v42 = vmul.f32 1.442695, %v6650_v44  ;;  %v3042_v61 = vmul.f32 1.442695, %v6654_v45 }
 0x647   : > { %v2688_v17 = vmax.f32 %v2642_v31, 0.0  ;;  %v2959_v31 = vpop.xlane.xlu1 %2958  ;;  %v3050_v12 = vmul.f32 1.442695, %v6670_v13 }
 0x648   : > { %4274 = vpow2.f32 %v3036_v42 }
 0x649   : > { %3908 = vmatprep.mubr.f32.mxu1 %v2688_v17  ;;  %v6662_v17 = vsub.f32 %v6535_v18, %v2951_v16  ;;  %4276 = vpow2.f32 %v3042_v61  ;;  %v6674_v18 = vsub.f32 %v6546_v23, %v2953_v28 }
 0x64a   : > { %3909 = vmatmul.mubr.f32.gmra.mrb[60].mxu1 %v2689_v11  ;;  %v3040_v11 = vmul.f32 1.442695, %v6658_v49 }
 0x64b   : > { %v3898_v63 = vpop.f32.mrb[52].mxu1  ;;  %v3046_v52 = vmul.f32 1.442695, %v6662_v17  ;;  %v3048_v23 = vmul.f32 1.442695, %v6674_v18 }
 0x64c   : > { %v6605_v39 = vadd.f32 %v3898_v63, %v6514_v24  ;;  %v2881_v50 = vpop.f32.mrb[53].mxu1  ;;  %v6666_v63 = vsub.f32 %v6538_v55, %v2949_v4  ;;  %4278 = vpow2.f32 %v3040_v11  ;;  %v2961_v55 = vpop.xlane.xlu0 %2960 }
 0x64d   : > { %v6608_v53 = vadd.f32 %v6514_v24, %v2881_v50  ;;  %4280 = vpow2.f32 %v3046_v52 }
 0x64e   : > { %2982 = vmax.xlane.f32.xlu1 %v6605_v39 }
 0x64f   : > { %2980 = vmax.xlane.f32.xlu0 %v6608_v53 }
 0x67a   : > { %v3833_v54 = vpop.f32.mrb[62].mxu0 }
 0x67b   : > { %v2657_v20 = vadd.f32 %v3833_v54, %v6477_v56  ;;  %v2651_v14 = vpop.f32.mrb[63].mxu0  ;;  %v3044_v54 = vmul.f32 1.442695, %v6666_v63 }
 0x67c   : > { %v2652_v41 = vadd.f32 %v6477_v56, %v2651_v14 }
 0x67d   : > { %v3901_v43 = vpop.f32.mrb[54].mxu1  ;;  %v2691_v37 = vmax.f32 %v2657_v20, 0.0  ;;  %v2963_v20 = vpop.xlane.xlu1 %2962  ;;  %4282 = vpow2.f32 %v3044_v54 }
 0x67e   : > { %v2690_v19 = vmax.f32 %v2652_v41, 0.0  ;;  %v6615_v15 = vadd.f32 %v3901_v43, %v6514_v24  ;;  %v2891_v7 = vpop.f32.mrb[55].mxu1  ;;  %4284 = vpow2.f32 %v3050_v12 }
 0x67f   : > { %v6618_v30 = vadd.f32 %v6514_v24, %v2891_v7  ;;  %v6690_v7 = vsub.f32 %v6554_v27, %v2957_v47  ;;  %4286 = vpow2.f32 %v3048_v23 }
 0x680   : > { %2986 = vmax.xlane.f32.xlu1 %v6615_v15  ;;  %3911 = vmatprep.mubr.f32.mxu1 %v2690_v19  ;;  %v6685_v19 = vsub.f32 %v6551_v36, %v2959_v31  ;;  %v2965_v36 = vpop.xlane.xlu0 %2964 }
 0x681   : > { %2984 = vmax.xlane.f32.xlu0 %v6618_v30  ;;  %3912 = vmatmul.mubr.f32.gmra.mrb[62].mxu1 %v2691_v37  ;;  %v4273_v37 = vpop.eup %4272  ;;  %v6706_v0 = vsub.f32 %v6570_v5, %v2965_v36 }
 0x6b4   : > { %v3904_v10 = vpop.f32.mrb[56].mxu1 }
 0x6b5   : > { %v6623_v25 = vadd.f32 %v3904_v10, %v6514_v24  ;;  %v2901_v56 = vpop.f32.mrb[57].mxu1  ;;  %v4275_v10 = vpop.eup %4274 }
 0x6b6   : > { %v6626_v8 = vadd.f32 %v6514_v24, %v2901_v56  ;;  %v3054_v56 = vmul.f32 1.442695, %v6685_v19  ;;  %v4277_v27 = vpop.eup %4276 }
 0x6b7   : > { %2990 = vmax.xlane.f32.xlu1 %v6623_v25 }
 0x6b8   : > { %2988 = vmax.xlane.f32.xlu0 %v6626_v8  ;;  %4288 = vpow2.f32 %v3054_v56 }
 0x6eb   : > { %v3907_v33 = vpop.f32.mrb[58].mxu1 }
 0x6ec   : > { %v6631_v2 = vadd.f32 %v3907_v33, %v6514_v24  ;;  %v2911_v58 = vpop.f32.mrb[59].mxu1  ;;  %v6694_v33 = vsub.f32 %v6559_v59, %v2963_v20 }
 0x6ed   : > { %v6634_v46 = vadd.f32 %v6514_v24, %v2911_v58  ;;  %v3052_v58 = vmul.f32 1.442695, %v6690_v7 }
 0x6ee   : > { %2994 = vmax.xlane.f32.xlu1 %v6631_v2  ;;  %v3058_v60 = vmul.f32 1.442695, %v6694_v33 }
 0x6ef   : > { %2992 = vmax.xlane.f32.xlu0 %v6634_v46  ;;  %4290 = vpow2.f32 %v3052_v58 }
 0x6f0   : > { %4292 = vpow2.f32 %v3058_v60 }
 0x71d   : > { %v3910_v40 = vpop.f32.mrb[60].mxu1 }
 0x71e   : > { %v6639_v26 = vadd.f32 %v3910_v40, %v6514_v24  ;;  %v2921_v29 = vpop.f32.mrb[61].mxu1  ;;  %v6698_v40 = vsub.f32 %v6562_v9, %v2961_v55  ;;  %v2969_v9 = vpop.xlane.xlu0 %2968 }
 0x71f   : > { %v6642_v57 = vadd.f32 %v6514_v24, %v2921_v29  ;;  %v4279_v29 = vpop.eup %4278  ;;  %v6714_v62 = vsub.f32 %v6578_v21, %v2969_v9 }
 0x720   : > { %2998 = vmax.xlane.f32.xlu1 %v6639_v26  ;;  %v3056_v59 = vmul.f32 1.442695, %v6698_v40  ;;  %v4281_v16 = vpop.eup %4280 }
 0x721   : > { %2996 = vmax.xlane.f32.xlu0 %v6642_v57  ;;  %v4283_v4 = vpop.eup %4282 }
 0x722   : > { %4294 = vpow2.f32 %v3056_v59  ;;  %v4285_v42 = vpop.eup %4284  ;;  %v2973_v31 = vpop.xlane.xlu0 %2972 }
 0x723   : > { %v4287_v61 = vpop.eup %4286  ;;  %v6722_v52 = vsub.f32 %v6588_v51, %v2973_v31 }
 0x726   : > { %v2977_v54 = vpop.xlane.xlu0 %2976 }
 0x727   : > { %v6730_v12 = vsub.f32 %v6598_v34, %v2977_v54 }
 0x754   : > { %v3913_v50 = vpop.f32.mrb[62].mxu1 }
 0x755   : > { %v6677_v14 = vadd.f32 %v3913_v50, %v6514_v24  ;;  %v2931_v41 = vpop.f32.mrb[63].mxu1  ;;  %v4289_v50 = vpop.eup %4288 }
 0x756   : > { %v6680_v43 = vadd.f32 %v6514_v24, %v2931_v41  ;;  %v2967_v24 = vpop.xlane.xlu1 %2966  ;;  %v4291_v20 = vpop.eup %4290 }
 0x757   : > { %3002 = vmax.xlane.f32.xlu1 %v6677_v14  ;;  %v6702_v6 = vsub.f32 %v6567_v38, %v2967_v24  ;;  %v3060_v38 = vmul.f32 1.442695, %v6706_v0  ;;  %v4293_v23 = vpop.eup %4292 }
 0x758   : > { %3000 = vmax.xlane.f32.xlu0 %v6680_v43 }
 0x759   : > { %v3062_v32 = vmul.f32 1.442695, %v6702_v6 }
 0x75a   : > { %v2971_v35 = vpop.xlane.xlu1 %2970 }
 0x75b   : > { %3102 = vadd.xlane.f32.xlu1 %v4273_v37  ;;  %v6710_v28 = vsub.f32 %v6575_v1, %v2971_v35  ;;  %4296 = vpow2.f32 %v3062_v32  ;;  %v3064_v1 = vmul.f32 1.442695, %v6714_v62  ;;  %v2981_v37 = vpop.xlane.xlu0 %2980 }
 0x75c   : > { %3100 = vadd.xlane.f32.xlu0 %v4275_v10  ;;  %4298 = vpow2.f32 %v3060_v38  ;;  %v4295_v10 = vpop.eup %4294  ;;  %v6738_v36 = vsub.f32 %v6608_v53, %v2981_v37 }
 0x75d   : > { %v3066_v47 = vmul.f32 1.442695, %v6710_v28 }
 0x75e   : > { %v2975_v5 = vpop.xlane.xlu1 %2974 }
 0x75f   : > { %3106 = vadd.xlane.f32.xlu1 %v4277_v27  ;;  %v6718_v11 = vsub.f32 %v6585_v3, %v2975_v5  ;;  %4300 = vpow2.f32 %v3066_v47  ;;  %v3068_v3 = vmul.f32 1.442695, %v6722_v52  ;;  %v2985_v27 = vpop.xlane.xlu0 %2984 }
 0x760   : > { %3104 = vadd.xlane.f32.xlu0 %v4279_v29  ;;  %4302 = vpow2.f32 %v3064_v1  ;;  %v6746_v35 = vsub.f32 %v6618_v30, %v2985_v27 }
 0x761   : > { %v3070_v41 = vmul.f32 1.442695, %v6718_v11 }
 0x762   : > { %v2979_v21 = vpop.xlane.xlu1 %2978 }
 0x763   : > { %3110 = vadd.xlane.f32.xlu1 %v4281_v16  ;;  %v6726_v55 = vsub.f32 %v6595_v48, %v2979_v21  ;;  %4304 = vpow2.f32 %v3070_v41  ;;  %v3072_v48 = vmul.f32 1.442695, %v6730_v12  ;;  %v2989_v9 = vpop.xlane.xlu0 %2988 }
 0x764   : > { %3108 = vadd.xlane.f32.xlu0 %v4283_v4  ;;  %4306 = vpow2.f32 %v3068_v3  ;;  %v6754_v5 = vsub.f32 %v6626_v8, %v2989_v9 }
 0x765   : > { %v3074_v24 = vmul.f32 1.442695, %v6726_v55  ;;  %v4297_v58 = vpop.eup %4296 }
 0x766   : > { %v2983_v51 = vpop.xlane.xlu1 %2982  ;;  %v4299_v29 = vpop.eup %4298 }
 0x767   : > { %3114 = vadd.xlane.f32.xlu1 %v4285_v42  ;;  %v6734_v56 = vsub.f32 %v6605_v39, %v2983_v51  ;;  %4308 = vpow2.f32 %v3074_v24  ;;  %v3076_v39 = vmul.f32 1.442695, %v6738_v36 }
 0x768   : > { %3112 = vadd.xlane.f32.xlu0 %v4287_v61  ;;  %4310 = vpow2.f32 %v3072_v48 }
 0x769   : > { %v3078_v60 = vmul.f32 1.442695, %v6734_v56  ;;  %v4301_v16 = vpop.eup %4300 }
 0x76a   : > { %v2987_v34 = vpop.xlane.xlu1 %2986  ;;  %v4303_v4 = vpop.eup %4302 }
 0x76b   : > { %3118 = vadd.xlane.f32.xlu1 %v4289_v50  ;;  %v6742_v59 = vsub.f32 %v6615_v15, %v2987_v34  ;;  %4312 = vpow2.f32 %v3078_v60  ;;  %v3080_v15 = vmul.f32 1.442695, %v6746_v35 }
 0x76c   : > { %3116 = vadd.xlane.f32.xlu0 %v4291_v20  ;;  %4314 = vpow2.f32 %v3076_v39 }
 0x76d   : > { %v3082_v32 = vmul.f32 1.442695, %v6742_v59  ;;  %v4305_v30 = vpop.eup %4304 }
 0x76e   : > { %v2991_v53 = vpop.xlane.xlu1 %2990  ;;  %v4307_v42 = vpop.eup %4306 }
 0x76f   : > { %3122 = vadd.xlane.f32.xlu1 %v4293_v23  ;;  %v6750_v38 = vsub.f32 %v6623_v25, %v2991_v53  ;;  %4316 = vpow2.f32 %v3082_v32  ;;  %v3084_v25 = vmul.f32 1.442695, %v6754_v5 }
 0x770   : > { %3120 = vadd.xlane.f32.xlu0 %v4295_v10  ;;  %4318 = vpow2.f32 %v3080_v15 }
 0x771   : > { %v3086_v61 = vmul.f32 1.442695, %v6750_v38  ;;  %v4309_v8 = vpop.eup %4308 }
 0x772   : > { %v4311_v50 = vpop.eup %4310 }
 0x773   : > { %3126 = vadd.xlane.f32.xlu1 %v4297_v58  ;;  %4320 = vpow2.f32 %v3086_v61 }
 0x774   : > { %3124 = vadd.xlane.f32.xlu0 %v4299_v29  ;;  %4322 = vpow2.f32 %v3084_v25 }
 0x777   : > { %3130 = vadd.xlane.f32.xlu1 %v4301_v16 }
 0x778   : > { %3128 = vadd.xlane.f32.xlu0 %v4303_v4 }
 0x77b   : > { %v2995_v31 = vpop.xlane.xlu1 %2994  ;;  %3134 = vadd.xlane.f32.xlu1 %v4305_v30 }
 0x77c   : > { %v6758_v47 = vsub.f32 %v6631_v2, %v2995_v31  ;;  %v2993_v1 = vpop.xlane.xlu0 %2992  ;;  %3132 = vadd.xlane.f32.xlu0 %v4307_v42  ;;  %v4313_v2 = vpop.eup %4312 }
 0x77d   : > { %v6762_v21 = vsub.f32 %v6634_v46, %v2993_v1  ;;  %v4315_v41 = vpop.eup %4314 }
 0x77e   : > { %v3090_v54 = vmul.f32 1.442695, %v6758_v47  ;;  %v4317_v3 = vpop.eup %4316 }
 0x77f   : > { %3138 = vadd.xlane.f32.xlu1 %v4309_v8  ;;  %v3088_v20 = vmul.f32 1.442695, %v6762_v21  ;;  %v4319_v51 = vpop.eup %4318 }
 0x780   : > { %3136 = vadd.xlane.f32.xlu0 %v4311_v50  ;;  %4324 = vpow2.f32 %v3090_v54  ;;  %v4321_v46 = vpop.eup %4320 }
 0x781   : > { %4326 = vpow2.f32 %v3088_v20  ;;  %v4323_v23 = vpop.eup %4322 }
 0x783   : > { %3142 = vadd.xlane.f32.xlu1 %v4313_v2 }
 0x784   : > { %3140 = vadd.xlane.f32.xlu0 %v4315_v41 }
 0x787   : > { %3146 = vadd.xlane.f32.xlu1 %v4317_v3 }
 0x788   : > { %3144 = vadd.xlane.f32.xlu0 %v4319_v51 }
 0x78a   : > { %v4325_v37 = vpop.eup %4324 }
 0x78b   : > { %3150 = vadd.xlane.f32.xlu1 %v4321_v46  ;;  %v4327_v10 = vpop.eup %4326 }
 0x78c   : > { %3148 = vadd.xlane.f32.xlu0 %v4323_v23 }
 0x78f   : > { %3154 = vadd.xlane.f32.xlu1 %v4325_v37 }
 0x790   : > { %3152 = vadd.xlane.f32.xlu0 %v4327_v10 }
 0x7ad   : > { %v2999_v24 = vpop.xlane.xlu1 %2998 }
 0x7ae   : > { %v6767_v48 = vsub.f32 %v6639_v26, %v2999_v24  ;;  %v2997_v34 = vpop.xlane.xlu0 %2996 }
 0x7af   : > { %v6770_v58 = vsub.f32 %v6642_v57, %v2997_v34 }
 0x7b0   : > { %v3094_v27 = vmul.f32 1.442695, %v6767_v48 }
 0x7b1   : > { %v3092_v29 = vmul.f32 1.442695, %v6770_v58 }
 0x7b2   : > { %4328 = vpow2.f32 %v3094_v27 }
 0x7b3   : > { %4330 = vpow2.f32 %v3092_v29 }
 0x7bc   : > { %v4329_v60 = vpop.eup %4328 }
 0x7bd   : > { %v4331_v39 = vpop.eup %4330  ;;  %3158 = vadd.xlane.f32.xlu1 %v4329_v60 }
 0x7be   : > { %3156 = vadd.xlane.f32.xlu0 %v4331_v39 }
 0x7e4   : > { %v3003_v53 = vpop.xlane.xlu1 %3002 }
 0x7e5   : > { %v6775_v16 = vsub.f32 %v6677_v14, %v3003_v53  ;;  %v3001_v26 = vpop.xlane.xlu0 %3000 }
 0x7e6   : > { %v6778_v9 = vsub.f32 %v6680_v43, %v3001_v26 }
 0x7e7   : > { %v3098_v57 = vmul.f32 1.442695, %v6775_v16 }
 0x7e8   : > { %v3096_v4 = vmul.f32 1.442695, %v6778_v9  ;;  %v3103_v32 = vpop.xlane.xlu1 %3102 }
 0x7e9   : > { %4332 = vpow2.f32 %v3098_v57  ;;  %v3101_v15 = vpop.xlane.xlu0 %3100 }
 0x7ea   : > { %4334 = vpow2.f32 %v3096_v4 }
 0x7eb   : > { %4336 = vlog2.f32 %v3103_v32 }
 0x7ec   : > { %4338 = vlog2.f32 %v3101_v15  ;;  %v3107_v30 = vpop.xlane.xlu1 %3106 }
 0x7ed   : > { %4340 = vlog2.f32 %v3107_v30  ;;  %v3105_v14 = vpop.xlane.xlu0 %3104 }
 0x7ee   : > { %4342 = vlog2.f32 %v3105_v14 }
 0x7f0   : > { %v3111_v42 = vpop.xlane.xlu1 %3110 }
 0x7f1   : > { %4344 = vlog2.f32 %v3111_v42  ;;  %v3109_v43 = vpop.xlane.xlu0 %3108 }
 0x7f2   : > { %4346 = vlog2.f32 %v3109_v43 }
 0x7f3   : > { %v4333_v31 = vpop.eup %4332 }
 0x7f4   : > { %v4335_v61 = vpop.eup %4334  ;;  %3162 = vadd.xlane.f32.xlu1 %v4333_v31  ;;  %v3115_v1 = vpop.xlane.xlu1 %3114 }
 0x7f5   : > { %v4337_v25 = vpop.eup %4336  ;;  %4348 = vlog2.f32 %v3115_v1  ;;  %3160 = vadd.xlane.f32.xlu0 %v4335_v61  ;;  %v3113_v8 = vpop.xlane.xlu0 %3112 }
 0x7f6   : > { %v4339_v50 = vpop.eup %4338  ;;  %v3167_v54 = vmul.f32 0.6931472, %v4337_v25  ;;  %4350 = vlog2.f32 %v3113_v8 }
 0x7f7   : > { %v4341_v20 = vpop.eup %4340  ;;  %v3165_v2 = vmul.f32 0.6931472, %v4339_v50 }
 0x7f8   : > { %v4343_v41 = vpop.eup %4342  ;;  %v3229_v3 = vsub.f32 %v6647_v22, %v3167_v54  ;;  %v3171_v51 = vmul.f32 0.6931472, %v4341_v20  ;;  %v3119_v46 = vpop.xlane.xlu1 %3118 }
 0x7f9   : > { %v3228_v23 = vsub.f32 %v6650_v44, %v3165_v2  ;;  %v3169_v37 = vmul.f32 0.6931472, %v4343_v41  ;;  %4352 = vlog2.f32 %v3119_v46  ;;  %v3117_v10 = vpop.xlane.xlu0 %3116 }
 0x7fa   : > { %3261 = vst [vmem:[%s6787_s23 + $0x8] sm:$0xff] %v3229_v3  ;;  %v3231_v24 = vsub.f32 %v6654_v45, %v3171_v51  ;;  %4354 = vlog2.f32 %v3117_v10 }
 0x7fb   : > { %v4345_v34 = vpop.eup %4344  ;;  %3260 = vst [vmem:[%s6787_s23] sm:$0xff] %v3228_v23  ;;  %v3230_v22 = vsub.f32 %v6658_v49, %v3169_v37 }
 0x7fc   : > { %v4347_v27 = vpop.eup %4346  ;;  %3263 = vst [vmem:[%s6787_s23 + $0x18] sm:$0xff] %v3231_v24  ;;  %v3175_v44 = vmul.f32 0.6931472, %v4345_v34  ;;  %v3123_v29 = vpop.xlane.xlu1 %3122 }
 0x7fd   : > { %3262 = vst [vmem:[%s6787_s23 + $0x10] sm:$0xff] %v3230_v22  ;;  %v3173_v60 = vmul.f32 0.6931472, %v4347_v27  ;;  %4356 = vlog2.f32 %v3123_v29  ;;  %v3121_v39 = vpop.xlane.xlu0 %3120 }
 0x7fe   : > { %v3233_v53 = vsub.f32 %v6662_v17, %v3175_v44  ;;  %4358 = vlog2.f32 %v3121_v39 }
 0x7ff   : > { %v4349_v45 = vpop.eup %4348  ;;  %v3232_v26 = vsub.f32 %v6666_v63, %v3173_v60 }
 0x800   : > { %v4351_v57 = vpop.eup %4350  ;;  %3265 = vst [vmem:[%s6787_s23 + $0x28] sm:$0xff] %v3233_v53  ;;  %v3179_v49 = vmul.f32 0.6931472, %v4349_v45  ;;  %v3127_v4 = vpop.xlane.xlu1 %3126 }
 0x801   : > { %3264 = vst [vmem:[%s6787_s23 + $0x20] sm:$0xff] %v3232_v26  ;;  %v3177_v32 = vmul.f32 0.6931472, %v4351_v57  ;;  %4360 = vlog2.f32 %v3127_v4  ;;  %v3125_v15 = vpop.xlane.xlu0 %3124 }
 0x802   : > { %v3235_v30 = vsub.f32 %v6670_v13, %v3179_v49  ;;  %4362 = vlog2.f32 %v3125_v15 }
 0x803   : > { %v4353_v14 = vpop.eup %4352  ;;  %v3234_v17 = vsub.f32 %v6674_v18, %v3177_v32 }
 0x804   : > { %v4355_v42 = vpop.eup %4354  ;;  %3267 = vst [vmem:[%s6787_s23 + $0x38] sm:$0xff] %v3235_v30  ;;  %v3183_v63 = vmul.f32 0.6931472, %v4353_v14  ;;  %v3131_v43 = vpop.xlane.xlu1 %3130 }
 0x805   : > { %3266 = vst [vmem:[%s6787_s23 + $0x30] sm:$0xff] %v3234_v17  ;;  %v3181_v31 = vmul.f32 0.6931472, %v4355_v42  ;;  %4364 = vlog2.f32 %v3131_v43  ;;  %v3129_v61 = vpop.xlane.xlu0 %3128 }
 0x806   : > { %v3237_v1 = vsub.f32 %v6685_v19, %v3183_v63  ;;  %4366 = vlog2.f32 %v3129_v61 }
 0x807   : > { %v4357_v25 = vpop.eup %4356  ;;  %v3236_v13 = vsub.f32 %v6690_v7, %v3181_v31 }
 0x808   : > { %v4359_v8 = vpop.eup %4358  ;;  %3269 = vst [vmem:[%s6787_s23 + $0x48] sm:$0xff] %v3237_v1  ;;  %v3187_v18 = vmul.f32 0.6931472, %v4357_v25  ;;  %v3135_v50 = vpop.xlane.xlu1 %3134 }
 0x809   : > { %3268 = vst [vmem:[%s6787_s23 + $0x40] sm:$0xff] %v3236_v13  ;;  %v3185_v54 = vmul.f32 0.6931472, %v4359_v8  ;;  %4368 = vlog2.f32 %v3135_v50  ;;  %v3133_v20 = vpop.xlane.xlu0 %3132 }
 0x80a   : > { %v3239_v2 = vsub.f32 %v6694_v33, %v3187_v18  ;;  %4370 = vlog2.f32 %v3133_v20 }
 0x80b   : > { %v4361_v41 = vpop.eup %4360  ;;  %v3238_v19 = vsub.f32 %v6698_v40, %v3185_v54 }
 0x80c   : > { %v4363_v3 = vpop.eup %4362  ;;  %3271 = vst [vmem:[%s6787_s23 + $0x58] sm:$0xff] %v3239_v2  ;;  %v3191_v7 = vmul.f32 0.6931472, %v4361_v41  ;;  %v3139_v51 = vpop.xlane.xlu1 %3138 }
 0x80d   : > { %3270 = vst [vmem:[%s6787_s23 + $0x50] sm:$0xff] %v3238_v19  ;;  %v3189_v46 = vmul.f32 0.6931472, %v4363_v3  ;;  %4372 = vlog2.f32 %v3139_v51  ;;  %v3137_v23 = vpop.xlane.xlu0 %3136 }
 0x80e   : > { %v3241_v37 = vsub.f32 %v6702_v6, %v3191_v7  ;;  %4374 = vlog2.f32 %v3137_v23 }
 0x80f   : > { %v4365_v10 = vpop.eup %4364  ;;  %v3240_v33 = vsub.f32 %v6706_v0, %v3189_v46 }
 0x810   : > { %v4367_v24 = vpop.eup %4366  ;;  %3273 = vst [vmem:[%s6787_s23 + $0x68] sm:$0xff] %v3241_v37  ;;  %v3195_v40 = vmul.f32 0.6931472, %v4365_v10  ;;  %v3143_v34 = vpop.xlane.xlu1 %3142 }
 0x811   : > { %3272 = vst [vmem:[%s6787_s23 + $0x60] sm:$0xff] %v3240_v33  ;;  %v3193_v22 = vmul.f32 0.6931472, %v4367_v24  ;;  %4376 = vlog2.f32 %v3143_v34  ;;  %v3141_v27 = vpop.xlane.xlu0 %3140 }
 0x812   : > { %v3243_v44 = vsub.f32 %v6710_v28, %v3195_v40  ;;  %4378 = vlog2.f32 %v3141_v27 }
 0x813   : > { %v4369_v29 = vpop.eup %4368  ;;  %v3242_v6 = vsub.f32 %v6714_v62, %v3193_v22 }
 0x814   : > { %v4371_v60 = vpop.eup %4370  ;;  %3275 = vst [vmem:[%s6787_s23 + $0x78] sm:$0xff] %v3243_v44  ;;  %v3199_v0 = vmul.f32 0.6931472, %v4369_v29  ;;  %v3147_v39 = vpop.xlane.xlu1 %3146 }
 0x815   : > { %3274 = vst [vmem:[%s6787_s23 + $0x70] sm:$0xff] %v3242_v6  ;;  %v3197_v53 = vmul.f32 0.6931472, %v4371_v60  ;;  %4380 = vlog2.f32 %v3147_v39  ;;  %v3145_v45 = vpop.xlane.xlu0 %3144 }
 0x816   : > { %v3245_v26 = vsub.f32 %v6718_v11, %v3199_v0  ;;  %4382 = vlog2.f32 %v3145_v45 }
 0x817   : > { %v4373_v57 = vpop.eup %4372  ;;  %v3244_v28 = vsub.f32 %v6722_v52, %v3197_v53 }
 0x818   : > { %v4375_v49 = vpop.eup %4374  ;;  %3277 = vst [vmem:[%s6787_s23 + $0x88] sm:$0xff] %v3245_v26  ;;  %v3203_v62 = vmul.f32 0.6931472, %v4373_v57  ;;  %v3151_v4 = vpop.xlane.xlu1 %3150 }
 0x819   : > { %3276 = vst [vmem:[%s6787_s23 + $0x80] sm:$0xff] %v3244_v28  ;;  %v3201_v32 = vmul.f32 0.6931472, %v4375_v49  ;;  %4384 = vlog2.f32 %v3151_v4  ;;  %v3149_v15 = vpop.xlane.xlu0 %3148 }
 0x81a   : > { %v3247_v30 = vsub.f32 %v6726_v55, %v3203_v62  ;;  %4386 = vlog2.f32 %v3149_v15 }
 0x81b   : > { %v4377_v14 = vpop.eup %4376  ;;  %v3246_v11 = vsub.f32 %v6730_v12, %v3201_v32 }
 0x81c   : > { %v4379_v17 = vpop.eup %4378  ;;  %3279 = vst [vmem:[%s6787_s23 + $0x98] sm:$0xff] %v3247_v30  ;;  %v3207_v52 = vmul.f32 0.6931472, %v4377_v14  ;;  %v3155_v42 = vpop.xlane.xlu1 %3154 }
 0x81d   : > { %3278 = vst [vmem:[%s6787_s23 + $0x90] sm:$0xff] %v3246_v11  ;;  %v3205_v63 = vmul.f32 0.6931472, %v4379_v17  ;;  %4388 = vlog2.f32 %v3155_v42  ;;  %v3153_v43 = vpop.xlane.xlu0 %3152 }
 0x81e   : > { %v3249_v31 = vsub.f32 %v6734_v56, %v3207_v52  ;;  %4390 = vlog2.f32 %v3153_v43 }
 0x81f   : > { %v4381_v55 = vpop.eup %4380  ;;  %v3248_v61 = vsub.f32 %v6738_v36, %v3205_v63 }
 0x820   : > { %v4383_v1 = vpop.eup %4382  ;;  %3281 = vst [vmem:[%s6787_s23 + $0xa8] sm:$0xff] %v3249_v31  ;;  %v3211_v12 = vmul.f32 0.6931472, %v4381_v55 }
 0x821   : > { %3280 = vst [vmem:[%s6787_s23 + $0xa0] sm:$0xff] %v3248_v61  ;;  %v3209_v25 = vmul.f32 0.6931472, %v4383_v1 }
 0x822   : > { %v3251_v13 = vsub.f32 %v6742_v59, %v3211_v12 }
 0x823   : > { %v4385_v8 = vpop.eup %4384  ;;  %v3250_v18 = vsub.f32 %v6746_v35, %v3209_v25 }
 0x824   : > { %v4387_v50 = vpop.eup %4386  ;;  %3283 = vst [vmem:[%s6787_s23 + $0xb8] sm:$0xff] %v3251_v13  ;;  %v3215_v56 = vmul.f32 0.6931472, %v4385_v8 }
 0x825   : > { %3282 = vst [vmem:[%s6787_s23 + $0xb0] sm:$0xff] %v3250_v18  ;;  %v3213_v54 = vmul.f32 0.6931472, %v4387_v50 }
 0x826   : > { %v3253_v36 = vsub.f32 %v6750_v38, %v3215_v56 }
 0x827   : > { %v4389_v20 = vpop.eup %4388  ;;  %v3252_v2 = vsub.f32 %v6754_v5, %v3213_v54 }
 0x828   : > { %v4391_v41 = vpop.eup %4390  ;;  %3285 = vst [vmem:[%s6787_s23 + $0xc8] sm:$0xff] %v3253_v36  ;;  %v3219_v19 = vmul.f32 0.6931472, %v4389_v20 }
 0x829   : > { %3284 = vst [vmem:[%s6787_s23 + $0xc0] sm:$0xff] %v3252_v2  ;;  %v3217_v59 = vmul.f32 0.6931472, %v4391_v41 }
 0x82a   : > { %v3255_v35 = vsub.f32 %v6758_v47, %v3219_v19 }
 0x82b   : > { %v3254_v3 = vsub.f32 %v6762_v21, %v3217_v59 }
 0x82c   : > { %3287 = vst [vmem:[%s6787_s23 + $0xd8] sm:$0xff] %v3255_v35 }
 0x82d   : > { %3286 = vst [vmem:[%s6787_s23 + $0xd0] sm:$0xff] %v3254_v3 }
 0x84a   : > { %v3159_v7 = vpop.xlane.xlu1 %3158 }
 0x84b   : > { %4392 = vlog2.f32 %v3159_v7  ;;  %v3157_v38 = vpop.xlane.xlu0 %3156 }
 0x84c   : > { %4394 = vlog2.f32 %v3157_v38 }
 0x855   : > { %v4393_v5 = vpop.eup %4392 }
 0x856   : > { %v4395_v51 = vpop.eup %4394  ;;  %v3223_v46 = vmul.f32 0.6931472, %v4393_v5 }
 0x857   : > { %v3221_v23 = vmul.f32 0.6931472, %v4395_v51 }
 0x858   : > { %v3257_v37 = vsub.f32 %v6767_v48, %v3223_v46 }
 0x859   : > { %v3256_v10 = vsub.f32 %v6770_v58, %v3221_v23 }
 0x85a   : > { %3289 = vst [vmem:[%s6787_s23 + $0xe8] sm:$0xff] %v3257_v37 }
 0x85b   : > { %3288 = vst [vmem:[%s6787_s23 + $0xe0] sm:$0xff] %v3256_v10 }
 0x881   : > { %v3163_v47 = vpop.xlane.xlu1 %3162 }
 0x882   : > { %4396 = vlog2.f32 %v3163_v47  ;;  %v3161_v21 = vpop.xlane.xlu0 %3160 }
 0x883   : > { %4398 = vlog2.f32 %v3161_v21 }
 0x88c   : > { %v4397_v33 = vpop.eup %4396 }
 0x88d   : > { %v4399_v24 = vpop.eup %4398  ;;  %v3227_v40 = vmul.f32 0.6931472, %v4397_v33 }
 0x88e   : > { %v3225_v34 = vmul.f32 0.6931472, %v4399_v24 }
 0x88f   : > { %v3259_v48 = vsub.f32 %v6775_v16, %v3227_v40 }
 0x890   : > { %v3258_v58 = vsub.f32 %v6778_v9, %v3225_v34 }
 0x891   : > { %3291 = vst [vmem:[%s6787_s23 + $0xf8] sm:$0xff] %v3259_v48 }
 0x892   : > { %3290 = vst [vmem:[%s6787_s23 + $0xf0] sm:$0xff] %v3258_v58 }
 0x893   : > { %4431 = shalt.err (!%p4428_p3)
}
 0x894   : > { %s4432_s19 = scalar_lea.hbm %s6853_s13, 4096  ;;  %s4436_s22 = scalar_lea.hbm %s6910_s7, 8192 }
 0x895   : > { %p4433_p4 = scmp.ne.s32.totalorder %s6853_s13, %s4432_s19  ;;  %p4437_p9 = scmp.lt.u32.totalorder %s6853_s13, %s6910_s7 }
 0x896   : > { %p4438_p10 = scmp.lt.u32.totalorder %s4436_s22, %s4432_s19  ;;  %p4440_p12 = scmp.lt.u32.totalorder %s4432_s19, %s6853_s13 }
 0x897   : > { %p4434_p7 = pnand %p4433_p4, %p4571_p5 }
 0x898   : > { %p4439_p11 = por %p4438_p10, %p4437_p9 }
 0x899   : > { %p4435_p8 = pneg %p4434_p7 }
 0x89a   : > { %p4441_p13 = por %p4440_p12, %p4439_p11 }
 0x89c   : > { %p4442_p0 = pnand %p4441_p13, %p4435_p8 }
 0x89e   : > { %4445 = shalt.err (!%p4442_p0)
}
 0x89f   : > { %s4491_s9 = smov 128   ;;  %s4492_s17 = smov 8  }
 0x8a0   : > { %4042 = dma.vmem_to_hbm [thread:$0]  (%p4571_p5), %s6855_s8, 4096, %s6853_s13, %s6862_s28, %s4491_s9, %s4491_s9, %s4492_s17  }
 0x8a1 PF: > { %p4048_p1 = scmp.ge.s32.totalorder %s4480_s27, 2  ;;  %s3321_s14 = sand.u32 1, %s4468_s24  }
 0x8a2   : > { %s3322_s15 = scalar_lea.sflag [#allocation3], %s3321_s14 }
 0x8a3   : > { %p4045_p2 = pnand %p4048_p1, %p4575_p6 }
 0x8a5   : > { %4463 = dma.done.wait (!%p4045_p2), %s3322_s15, 4096  }
 0x8a6   : > { %4465 = vsyncadd (!%p4045_p2), %s3322_s15, 4294963200  ;;  %p17_p3 = scmp.ge.s32.totalorder %s4558_s30, 4   ;;  %s7094_s24 = smov %s4472_s25 }
 0x8a7   : > { %s7095_s25 = smov %s4476_s26  ;;  %s7096_s26 = smov %s4569_s10 }
 0x8a8   : > { %s7097_s27 = smov %s4558_s30  ;;  %19 = sbr.rel (!%p17_p3) target bundleno = 3 (0x3), region = 85 }
 0x8af   :  { %3327 = vsyncpa [#allocation3], 1 }
 0x8b0   :  { %3329 = vsyncpa [#allocation3 + $0x1], 1 }

</bundles_post_ra>
